<compile_context>
chip_gen: v7x
topology: tpu7x:2x2x1
jax: 0.10.0
libtpu: 0.0.40
codegen_flags: <defaults>
</compile_context>

<pallas_src>
import functools

import jax
import jax.numpy as jnp
from jax import lax
from jax.experimental import pallas as pl
from jax.experimental.pallas import tpu as pltpu

IN_FEATURE = 200
MLP_INPUT = 20
MLP_OUTPUT = 1
OUT_FEATURE = 200
L = 10  # forward's reshape((L, -1)) must yield width == MLP_INPUT => L = 200 / 20

NUM_CORES = 2          # v7x has 2 TensorCores/chip; costs at most 1 extra step elsewhere.
DEFAULT_TILE_N = 2048  # (2048, 200) f32 tile ~2 MiB (256-lane padded), ~4 MiB double-buffered.
_LANE = 128
_SUBLANE = 8


def _round_up(x, m):
    return ((x + m - 1) // m) * m


# --------------------------------------------------------------------------- #
# Kernel 1: streaming global max over the node axis.
# grid = (NUM_CORES, tiles_per_core); outer axis "parallel", inner "arbitrary".
# --------------------------------------------------------------------------- #
def stream_max_kernel(n_ref, x_ref, o_ref, max_sc):
    i = pl.program_id(1)
    tile_n = x_ref.shape[0]
    gt = pl.program_id(0) * pl.num_programs(1) + i       # global tile index

    @pl.when(i == 0)
    def _():
        max_sc[...] = jnp.full(max_sc.shape, -jnp.inf, dtype=max_sc.dtype)

    def _merge(x):
        # (tile_n, 200) -> (tile_n//8, 8, 200); reduce leading axis = vreg-wise vmax.
        part = jnp.max(x.reshape(tile_n // _SUBLANE, _SUBLANE, IN_FEATURE), axis=0)
        max_sc[...] = jnp.maximum(max_sc[...], part.astype(jnp.float32))

    # Only the boundary / beyond-end tiles pay for iota + compare + select.
    needs_mask = (gt + 1) * tile_n > n_ref[0]

    @pl.when(needs_mask)
    def _():
        x = x_ref[...]                                     # native dtype (f32 or bf16)
        row = gt * tile_n + lax.broadcasted_iota(jnp.int32, (tile_n, 1), 0)
        neg = jnp.array(-jnp.inf, dtype=x.dtype)
        _merge(jnp.where(row < n_ref[0], x, neg))

    @pl.when(jnp.logical_not(needs_mask))
    def _():
        _merge(x_ref[...])

    @pl.when(i == pl.num_programs(1) - 1)
    def _():
        o_ref[...] = max_sc[...]                           # (8, 200) per-core partials


# --------------------------------------------------------------------------- #
# Kernel 2: one-shot epilogue — collapse partials + 4-matmul MLP tail.
# --------------------------------------------------------------------------- #
def mlp_kernel(p_ref, w1_ref, b1_ref, w2_ref, b2_ref, w3_ref, b3_ref,
               w4_ref, b4_ref, o_ref):
    pooled = jnp.max(p_ref[...], axis=0, keepdims=True)   # (1, 200) global max

    # Linear(200, 200) + ReLU
    h = jnp.dot(pooled, w1_ref[...], preferred_element_type=jnp.float32) + b1_ref[...]
    h = jnp.maximum(h, 0.0)

    # reshape((10, 20)) + global_max_pool == max over ten contiguous 20-wide segments.
    seg = h[:, 0:MLP_INPUT]
    for t in range(1, L):
        seg = jnp.maximum(seg, h[:, t * MLP_INPUT:(t + 1) * MLP_INPUT])
    h = seg                                                # (1, 20)

    # Linear(20,20)+ReLU ; Linear(20,20) ; Linear(20,1)  (no ReLU after linear3)
    h = jnp.dot(h, w2_ref[...], preferred_element_type=jnp.float32) + b2_ref[...]
    h = jnp.maximum(h, 0.0)
    h = jnp.dot(h, w3_ref[...], preferred_element_type=jnp.float32) + b3_ref[...]
    h = jnp.dot(h, w4_ref[...], preferred_element_type=jnp.float32) + b4_ref[...]
    o_ref[...] = h                                         # (1, 1)


@functools.partial(jax.jit, static_argnames=("tile_n",))
def gnn_forward(feature, params, *, tile_n=DEFAULT_TILE_N):
    node = feature.shape[0]
    if node == 0:
        raise ValueError("empty graph not supported")
    x = feature.reshape(node, -1)                          # (node, 200), native dtype
    assert x.shape[1] == IN_FEATURE and feature.shape[1] == L

    tn = min(tile_n, _round_up(node, _SUBLANE))            # multiple of 8 rows
    total_blocks = pl.cdiv(node, tn)
    tiles_per_core = pl.cdiv(total_blocks, NUM_CORES)
    n_arr = jnp.array([node], jnp.int32)                   # scalar-prefetched

    def x_map(c, i, n):
        # Clamp beyond-end tiles into range; their rows are masked to -inf in-kernel.
        return (jnp.minimum(c * tiles_per_core + i, total_blocks - 1), 0)

    lanes = _round_up(IN_FEATURE, _LANE)
    tile_bytes = tn * lanes * x.dtype.itemsize
    vmem_limit = int(2 * tile_bytes + 8 * 1024 * 1024)     # 2 x-buffers + headroom

    partials = pl.pallas_call(
        stream_max_kernel,
        out_shape=jax.ShapeDtypeStruct((NUM_CORES * _SUBLANE, IN_FEATURE), jnp.float32),
        grid_spec=pltpu.PrefetchScalarGridSpec(
            num_scalar_prefetch=1,
            grid=(NUM_CORES, tiles_per_core),
            in_specs=[pl.BlockSpec((tn, IN_FEATURE), x_map)],
            out_specs=pl.BlockSpec((_SUBLANE, IN_FEATURE), lambda c, i, n: (c, 0)),
            scratch_shapes=[pltpu.VMEM((_SUBLANE, IN_FEATURE), jnp.float32)],
        ),
        compiler_params=pltpu.CompilerParams(
            dimension_semantics=("parallel", "arbitrary"),
            vmem_limit_bytes=vmem_limit,
        ),
        cost_estimate=pl.CostEstimate(
            flops=node * IN_FEATURE,
            transcendentals=0,
            bytes_accessed=node * IN_FEATURE * x.dtype.itemsize
            + NUM_CORES * _SUBLANE * IN_FEATURE * 4,
        ),
    )(n_arr, x)

    out = pl.pallas_call(
        mlp_kernel,
        out_shape=jax.ShapeDtypeStruct((1, MLP_OUTPUT), jnp.float32),
    )(partials, params["w1"], params["b1"], params["w2"], params["b2"],
      params["w3"], params["b3"], params["w4"], params["b4"])
    return out[0]                                          # shape (1,)


def gnn_forward_ref(feature, params):
    """Pure-JAX reference for correctness checking."""
    node = feature.shape[0]
    x = feature.reshape(node, -1)
    h = jnp.max(x, axis=0, keepdims=True).astype(jnp.float32)
    h = jnp.maximum(h @ params["w1"] + params["b1"], 0.0)
    h = jnp.max(h.reshape(L, MLP_INPUT), axis=0, keepdims=True)
    h = jnp.maximum(h @ params["w2"] + params["b2"], 0.0)
    h = h @ params["w3"] + params["b3"]
    h = h @ params["w4"] + params["b4"]
    return h[0]


def init_params(key):
    # Deterministic init mirroring torch.nn.Linear's U(-1/sqrt(fan_in), 1/sqrt(fan_in)).
    def linear(k, fan_in, fan_out):
        kw, kb = jax.random.split(k)
        bound = 1.0 / jnp.sqrt(jnp.float32(fan_in))
        w = jax.random.uniform(kw, (fan_in, fan_out), jnp.float32, -bound, bound)
        b = jax.random.uniform(kb, (1, fan_out), jnp.float32, -bound, bound)
        return w, b

    k1, k2, k3, k4 = jax.random.split(key, 4)
    w1, b1 = linear(k1, IN_FEATURE, OUT_FEATURE)
    w2, b2 = linear(k2, MLP_INPUT, MLP_INPUT)
    w3, b3 = linear(k3, MLP_INPUT, MLP_INPUT)
    w4, b4 = linear(k4, MLP_INPUT, MLP_OUTPUT)
    return dict(w1=w1, b1=b1, w2=w2, b2=b2, w3=w3, b3=b3, w4=w4, b4=b4)


if __name__ == "__main__":
    key = jax.random.PRNGKey(0)
    k_x, k_x2, k_p = jax.random.split(key, 3)
    params = init_params(k_p)

    # Case 1: f32 graph, single node-tile per core, second core fully masked.
    x_big = jax.random.normal(k_x, (1000, L, MLP_INPUT), jnp.float32)
    out = jax.block_until_ready(gnn_forward(x_big, params))
    ref = jax.block_until_ready(gnn_forward_ref(x_big, params))
    assert out.shape == (1,)
    assert jnp.allclose(out, ref, atol=1e-4, rtol=1e-4)

    # Case 2: tiny graph (block clamped to 8 rows).
    x_small = jax.random.normal(k_x2, (8, L, MLP_INPUT), jnp.float32)
    out2 = jax.block_until_ready(gnn_forward(x_small, params))
    ref2 = jax.block_until_ready(gnn_forward_ref(x_small, params))
    assert out2.shape == (1,) and jnp.allclose(out2, ref2, atol=1e-4, rtol=1e-4)

    # Case 3: multi-tile inner reduction with a masked partial last tile (1000 = 4x256-ish).
    out3 = jax.block_until_ready(gnn_forward(x_big, params, tile_n=256))
    assert out3.shape == (1,) and jnp.allclose(out3, ref, atol=1e-4, rtol=1e-4)

    # Case 4: bf16 streaming path (max in native dtype, cast after — bit-exact vs ref).
    x_bf16 = x_big.astype(jnp.bfloat16)
    out4 = jax.block_until_ready(gnn_forward(x_bf16, params))
    ref4 = jax.block_until_ready(gnn_forward_ref(x_bf16, params))
    assert out4.shape == (1,) and jnp.allclose(out4, ref4, atol=1e-4, rtol=1e-4)

    print("KERNEL_OK")
</pallas_src>

<mosaic_0001>
module attributes {stable_mosaic.version = 11 : i64} {
  func.func @stream_max_kernel(%arg0: i32, %arg1: i32, %arg2: memref<1xi32, #tpu.memory_space<smem>>, %arg3: memref<1000x200xf32, #tpu.memory_space<vmem>>, %arg4: memref<8x200xf32, #tpu.memory_space<vmem>>, %arg5: memref<8x200xf32, #tpu.memory_space<vmem>>) attributes {dimension_semantics = [#tpu.dimension_semantics<parallel>, #tpu.dimension_semantics<arbitrary>], iteration_bounds = array<i64: 2, 1>, scalar_prefetch = 1 : i64, scratch_operands = 1 : i64, tpu.core_type = #tpu.core_type<tc>, window_params = [{transform_indices = @transform_0, window_bounds = array<i64: 1000, 200>}, {transform_indices = @transform_1, window_bounds = array<i64: 8, 200>}]} {
    %c1_i32 = arith.constant 1 : i32
    %0 = arith.muli %arg0, %c1_i32 : i32
    %1 = arith.addi %0, %arg1 : i32
    %c0_i32 = arith.constant 0 : i32
    %2 = arith.cmpi eq, %arg1, %c0_i32 : i32
    %3 = arith.extui %2 : i1 to i32
    %c0_i32_0 = arith.constant 0 : i32
    %4 = arith.cmpi ne, %3, %c0_i32_0 : i32
    scf.if %4 {
      %cst = arith.constant 0xFF800000 : f32
      %17 = vector.broadcast %cst : f32 to vector<8x200xf32>
      %c0_6 = arith.constant 0 : index
      %c0_7 = arith.constant 0 : index
      %18 = vector.load %arg5[%c0_6, %c0_7] : memref<8x200xf32, #tpu.memory_space<vmem>>, vector<8x200xf32>
      tpu.vector_store %arg5[%c0_6, %c0_7], %17 {strides = array<i32>} : memref<8x200xf32, #tpu.memory_space<vmem>>, vector<8x200xf32>,
    } else {
    }
    %c1_i32_1 = arith.constant 1 : i32
    %5 = arith.addi %1, %c1_i32_1 : i32
    %c1000_i32 = arith.constant 1000 : i32
    %6 = arith.muli %5, %c1000_i32 : i32
    %c0 = arith.constant 0 : index
    %7 = memref.load %arg2[%c0] : memref<1xi32, #tpu.memory_space<smem>>
    %8 = arith.cmpi sgt, %6, %7 : i32
    %9 = arith.extui %8 : i1 to i32
    %c0_i32_2 = arith.constant 0 : i32
    %10 = arith.cmpi ne, %9, %c0_i32_2 : i32
    scf.if %10 {
      %c0_6 = arith.constant 0 : index
      %c0_7 = arith.constant 0 : index
      %17 = vector.load %arg3[%c0_6, %c0_7] : memref<1000x200xf32, #tpu.memory_space<vmem>>, vector<1000x200xf32>
      %c1000_i32_8 = arith.constant 1000 : i32
      %18 = arith.muli %1, %c1000_i32_8 : i32
      %19 = tpu.iota {dimensions = array<i32: 0>} : vector<1000x1xi32>
      %20 = vector.broadcast %18 : i32 to vector<1000x1xi32>
      %21 = arith.addi %20, %19 : vector<1000x1xi32>
      %c0_9 = arith.constant 0 : index
      %22 = memref.load %arg2[%c0_9] : memref<1xi32, #tpu.memory_space<smem>>
      %23 = vector.broadcast %22 : i32 to vector<1000x1xi32>
      %24 = arith.cmpi slt, %21, %23 : vector<1000x1xi32>
      %cst = arith.constant 0xFF800000 : f32
      %25 = vector.shape_cast %24 : vector<1000x1xi1> to vector<1000x1xi1>
      %26 = vector.broadcast %25 : vector<1000x1xi1> to vector<1000x200xi1>
      %27 = vector.broadcast %cst : f32 to vector<1000x200xf32>
      %28 = arith.select %26, %17, %27 : vector<1000x200xi1>, vector<1000x200xf32>
      %29 = vector.shape_cast %28 : vector<1000x200xf32> to vector<125x8x200xf32>
      %cst_10 = arith.constant dense<0xFF800000> : vector<8x200xf32>
      %30 = vector.multi_reduction <maximumf>, %29, %cst_10 [0] : vector<125x8x200xf32> to vector<8x200xf32>
      %c0_11 = arith.constant 0 : index
      %c0_12 = arith.constant 0 : index
      %31 = vector.load %arg5[%c0_11, %c0_12] : memref<8x200xf32, #tpu.memory_space<vmem>>, vector<8x200xf32>
      %32 = arith.maximumf %31, %30 : vector<8x200xf32>
      %c0_13 = arith.constant 0 : index
      %c0_14 = arith.constant 0 : index
      %33 = vector.load %arg5[%c0_13, %c0_14] : memref<8x200xf32, #tpu.memory_space<vmem>>, vector<8x200xf32>
      tpu.vector_store %arg5[%c0_13, %c0_14], %32 {strides = array<i32>} : memref<8x200xf32, #tpu.memory_space<vmem>>, vector<8x200xf32>,
    } else {
    }
    %true = arith.constant true
    %11 = arith.xori %8, %true : i1
    %12 = arith.extui %11 : i1 to i32
    %c0_i32_3 = arith.constant 0 : i32
    %13 = arith.cmpi ne, %12, %c0_i32_3 : i32
    scf.if %13 {
      %c0_6 = arith.constant 0 : index
      %c0_7 = arith.constant 0 : index
      %17 = vector.load %arg3[%c0_6, %c0_7] : memref<1000x200xf32, #tpu.memory_space<vmem>>, vector<1000x200xf32>
      %18 = vector.shape_cast %17 : vector<1000x200xf32> to vector<125x8x200xf32>
      %cst = arith.constant dense<0xFF800000> : vector<8x200xf32>
      %19 = vector.multi_reduction <maximumf>, %18, %cst [0] : vector<125x8x200xf32> to vector<8x200xf32>
      %c0_8 = arith.constant 0 : index
      %c0_9 = arith.constant 0 : index
      %20 = vector.load %arg5[%c0_8, %c0_9] : memref<8x200xf32, #tpu.memory_space<vmem>>, vector<8x200xf32>
      %21 = arith.maximumf %20, %19 : vector<8x200xf32>
      %c0_10 = arith.constant 0 : index
      %c0_11 = arith.constant 0 : index
      %22 = vector.load %arg5[%c0_10, %c0_11] : memref<8x200xf32, #tpu.memory_space<vmem>>, vector<8x200xf32>
      tpu.vector_store %arg5[%c0_10, %c0_11], %21 {strides = array<i32>} : memref<8x200xf32, #tpu.memory_space<vmem>>, vector<8x200xf32>,
    } else {
    }
    %c0_i32_4 = arith.constant 0 : i32
    %14 = arith.cmpi eq, %arg1, %c0_i32_4 : i32
    %15 = arith.extui %14 : i1 to i32
    %c0_i32_5 = arith.constant 0 : i32
    %16 = arith.cmpi ne, %15, %c0_i32_5 : i32
    scf.if %16 {
      %c0_6 = arith.constant 0 : index
      %c0_7 = arith.constant 0 : index
      %17 = vector.load %arg5[%c0_6, %c0_7] : memref<8x200xf32, #tpu.memory_space<vmem>>, vector<8x200xf32>
      %c0_8 = arith.constant 0 : index
      %c0_9 = arith.constant 0 : index
      %18 = vector.load %arg4[%c0_8, %c0_9] : memref<8x200xf32, #tpu.memory_space<vmem>>, vector<8x200xf32>
      tpu.vector_store %arg4[%c0_8, %c0_9], %17 {strides = array<i32>} : memref<8x200xf32, #tpu.memory_space<vmem>>, vector<8x200xf32>,
    } else {
    }
    return
  }
  func.func @transform_0(%arg0: i32, %arg1: i32, %arg2: memref<1xi32, #tpu.memory_space<smem>>) -> (i32, i32) {
    %c1_i32 = arith.constant 1 : i32
    %0 = arith.muli %arg0, %c1_i32 : i32
    %1 = arith.addi %0, %arg1 : i32
    %c0_i32 = arith.constant 0 : i32
    %2 = arith.minsi %1, %c0_i32 : i32
    %c0_i32_0 = arith.constant 0 : i32
    %c0_i32_1 = arith.constant 0 : i32
    return %2, %c0_i32_0 : i32, i32
  }
  func.func @transform_1(%arg0: i32, %arg1: i32, %arg2: memref<1xi32, #tpu.memory_space<smem>>) -> (i32, i32) {
    %c0_i32 = arith.constant 0 : i32
    %c0_i32_0 = arith.constant 0 : i32
    return %arg0, %c0_i32 : i32, i32
  }
}

module attributes {stable_mosaic.version = 11 : i64} {
  func.func @mlp_kernel(%arg0: memref<16x200xf32, #tpu.memory_space<vmem>>, %arg1: memref<200x200xf32, #tpu.memory_space<vmem>>, %arg2: memref<1x200xf32, #tpu.memory_space<vmem>>, %arg3: memref<20x20xf32, #tpu.memory_space<vmem>>, %arg4: memref<1x20xf32, #tpu.memory_space<vmem>>, %arg5: memref<20x20xf32, #tpu.memory_space<vmem>>, %arg6: memref<1x20xf32, #tpu.memory_space<vmem>>, %arg7: memref<20x1xf32, #tpu.memory_space<vmem>>, %arg8: memref<1x1xf32, #tpu.memory_space<vmem>>, %arg9: memref<1x1xf32, #tpu.memory_space<vmem>>) attributes {dimension_semantics = [], scalar_prefetch = 0 : i64, scratch_operands = 0 : i64, tpu.core_type = #tpu.core_type<tc>} {
    %c0 = arith.constant 0 : index
    %c0_0 = arith.constant 0 : index
    %0 = vector.load %arg0[%c0, %c0_0] : memref<16x200xf32, #tpu.memory_space<vmem>>, vector<16x200xf32>
    %cst = arith.constant dense<0xFF800000> : vector<200xf32>
    %1 = vector.multi_reduction <maximumf>, %0, %cst [0] : vector<16x200xf32> to vector<200xf32>
    %2 = vector.shape_cast %1 : vector<200xf32> to vector<1x200xf32>
    %c0_1 = arith.constant 0 : index
    %c0_2 = arith.constant 0 : index
    %3 = vector.load %arg1[%c0_1, %c0_2] : memref<200x200xf32, #tpu.memory_space<vmem>>, vector<200x200xf32>
    %cst_3 = arith.constant dense<0.000000e+00> : vector<1x200xf32>
    %4 = tpu.matmul %2, %3, %cst_3 {dimension_numbers = #tpu.dot_dimension_numbers<[1], [0], [0], [1], [0, 0, 1, 1], [], []>} : vector<1x200xf32>, vector<200x200xf32>, vector<1x200xf32> -> vector<1x200xf32>
    %c0_4 = arith.constant 0 : index
    %c0_5 = arith.constant 0 : index
    %5 = vector.load %arg2[%c0_4, %c0_5] : memref<1x200xf32, #tpu.memory_space<vmem>>, vector<1x200xf32>
    %6 = arith.addf %4, %5 : vector<1x200xf32>
    %cst_6 = arith.constant 0.000000e+00 : f32
    %7 = vector.broadcast %cst_6 : f32 to vector<1x200xf32>
    %8 = arith.maximumf %6, %7 : vector<1x200xf32>
    %9 = vector.extract_strided_slice %8 {offsets = [0, 0], sizes = [1, 20], strides = [1, 1]} : vector<1x200xf32> to vector<1x20xf32>
    %10 = vector.extract_strided_slice %8 {offsets = [0, 20], sizes = [1, 20], strides = [1, 1]} : vector<1x200xf32> to vector<1x20xf32>
    %11 = arith.maximumf %9, %10 : vector<1x20xf32>
    %12 = vector.extract_strided_slice %8 {offsets = [0, 40], sizes = [1, 20], strides = [1, 1]} : vector<1x200xf32> to vector<1x20xf32>
    %13 = arith.maximumf %11, %12 : vector<1x20xf32>
    %14 = vector.extract_strided_slice %8 {offsets = [0, 60], sizes = [1, 20], strides = [1, 1]} : vector<1x200xf32> to vector<1x20xf32>
    %15 = arith.maximumf %13, %14 : vector<1x20xf32>
    %16 = vector.extract_strided_slice %8 {offsets = [0, 80], sizes = [1, 20], strides = [1, 1]} : vector<1x200xf32> to vector<1x20xf32>
    %17 = arith.maximumf %15, %16 : vector<1x20xf32>
    %18 = vector.extract_strided_slice %8 {offsets = [0, 100], sizes = [1, 20], strides = [1, 1]} : vector<1x200xf32> to vector<1x20xf32>
    %19 = arith.maximumf %17, %18 : vector<1x20xf32>
    %20 = vector.extract_strided_slice %8 {offsets = [0, 120], sizes = [1, 20], strides = [1, 1]} : vector<1x200xf32> to vector<1x20xf32>
    %21 = arith.maximumf %19, %20 : vector<1x20xf32>
    %22 = vector.extract_strided_slice %8 {offsets = [0, 140], sizes = [1, 20], strides = [1, 1]} : vector<1x200xf32> to vector<1x20xf32>
    %23 = arith.maximumf %21, %22 : vector<1x20xf32>
    %24 = vector.extract_strided_slice %8 {offsets = [0, 160], sizes = [1, 20], strides = [1, 1]} : vector<1x200xf32> to vector<1x20xf32>
    %25 = arith.maximumf %23, %24 : vector<1x20xf32>
    %26 = vector.extract_strided_slice %8 {offsets = [0, 180], sizes = [1, 20], strides = [1, 1]} : vector<1x200xf32> to vector<1x20xf32>
    %27 = arith.maximumf %25, %26 : vector<1x20xf32>
    %c0_7 = arith.constant 0 : index
    %c0_8 = arith.constant 0 : index
    %28 = vector.load %arg3[%c0_7, %c0_8] : memref<20x20xf32, #tpu.memory_space<vmem>>, vector<20x20xf32>
    %cst_9 = arith.constant dense<0.000000e+00> : vector<1x20xf32>
    %29 = tpu.matmul %27, %28, %cst_9 {dimension_numbers = #tpu.dot_dimension_numbers<[1], [0], [0], [1], [0, 0, 1, 1], [], []>} : vector<1x20xf32>, vector<20x20xf32>, vector<1x20xf32> -> vector<1x20xf32>
    %c0_10 = arith.constant 0 : index
    %c0_11 = arith.constant 0 : index
    %30 = vector.load %arg4[%c0_10, %c0_11] : memref<1x20xf32, #tpu.memory_space<vmem>>, vector<1x20xf32>
    %31 = arith.addf %29, %30 : vector<1x20xf32>
    %cst_12 = arith.constant 0.000000e+00 : f32
    %32 = vector.broadcast %cst_12 : f32 to vector<1x20xf32>
    %33 = arith.maximumf %31, %32 : vector<1x20xf32>
    %c0_13 = arith.constant 0 : index
    %c0_14 = arith.constant 0 : index
    %34 = vector.load %arg5[%c0_13, %c0_14] : memref<20x20xf32, #tpu.memory_space<vmem>>, vector<20x20xf32>
    %cst_15 = arith.constant dense<0.000000e+00> : vector<1x20xf32>
    %35 = tpu.matmul %33, %34, %cst_15 {dimension_numbers = #tpu.dot_dimension_numbers<[1], [0], [0], [1], [0, 0, 1, 1], [], []>} : vector<1x20xf32>, vector<20x20xf32>, vector<1x20xf32> -> vector<1x20xf32>
    %c0_16 = arith.constant 0 : index
    %c0_17 = arith.constant 0 : index
    %36 = vector.load %arg6[%c0_16, %c0_17] : memref<1x20xf32, #tpu.memory_space<vmem>>, vector<1x20xf32>
    %37 = arith.addf %35, %36 : vector<1x20xf32>
    %c0_18 = arith.constant 0 : index
    %c0_19 = arith.constant 0 : index
    %38 = vector.load %arg7[%c0_18, %c0_19] : memref<20x1xf32, #tpu.memory_space<vmem>>, vector<20x1xf32>
    %cst_20 = arith.constant dense<0.000000e+00> : vector<1x1xf32>
    %39 = tpu.matmul %37, %38, %cst_20 {dimension_numbers = #tpu.dot_dimension_numbers<[1], [0], [0], [1], [0, 0, 1, 1], [], []>} : vector<1x20xf32>, vector<20x1xf32>, vector<1x1xf32> -> vector<1x1xf32>
    %c0_21 = arith.constant 0 : index
    %c0_22 = arith.constant 0 : index
    %40 = vector.load %arg8[%c0_21, %c0_22] : memref<1x1xf32, #tpu.memory_space<vmem>>, vector<1x1xf32>
    %41 = arith.addf %39, %40 : vector<1x1xf32>
    %c0_23 = arith.constant 0 : index
    %c0_24 = arith.constant 0 : index
    %42 = vector.load %arg9[%c0_23, %c0_24] : memref<1x1xf32, #tpu.memory_space<vmem>>, vector<1x1xf32>
    tpu.vector_store %arg9[%c0_23, %c0_24], %41 {strides = array<i32>} : memref<1x1xf32, #tpu.memory_space<vmem>>, vector<1x1xf32>,
    return
  }
}

</mosaic_0001>

<bundles_post_ra>
// kernel: gnn_forward.3
= control target key start
LH: loop header
LB: loop body
LE: loop exit
PB: predicated region body
PF: predicated region fallthrough
CT: control target
= control target key end

     0   :  { %s923_s0 = inlined_call_operand.vmem [shape: f32[16,200], index: 0, kind: input, shape index: {}]   ;;  %s924_s1 = inlined_call_operand.vmem [shape: f32[200,200], index: 1, kind: input, shape index: {}]   ;;  %s925_s2 = inlined_call_operand.vmem [shape: f32[1,200], index: 2, kind: input, shape index: {}]   ;;  %s926_s3 = inlined_call_operand.vmem [shape: f32[20,20], index: 3, kind: input, shape index: {}]   ;;  %s927_s4 = inlined_call_operand.vmem [shape: f32[1,20], index: 4, kind: input, shape index: {}]   ;;  %s928_s5 = inlined_call_operand.vmem [shape: f32[20,20], index: 5, kind: input, shape index: {}]   ;;  %s929_s6 = inlined_call_operand.vmem [shape: f32[1,20], index: 6, kind: input, shape index: {}]   ;;  %s930_s7 = inlined_call_operand.vmem [shape: f32[20,1], index: 7, kind: input, shape index: {}]   ;;  %s931_s8 = inlined_call_operand.<no memory space> [shape: f32[1,1], index: 8, kind: input, shape index: {}]   ;;  %s932_s9 = inlined_call_operand.hbm [shape: f32[1,1], index: 9, kind: output, shape index: {}]  }
   0x1   :  { %v14_v0 = vstv %s931_s8 }
   0x2   :  { %15 = vst [vmem:[#allocation2] sm:$0x1] %v14_v0 }
   0x3   :  { %v57_v1 = vld [vmem:[%s924_s1 + $0x8] sm:$0xff]  ;;  %v59_v2 = vld [vmem:[%s924_s1 + $0x18] sm:$0xff]  ;;  %v56_v3 = vld [vmem:[%s924_s1] sm:$0xff]  ;;  %vm46_vm0 = vcmask 588800  }
   0x4   :  { %v541_v4 = vpack.c.bf16 %v59_v2, %v57_v1  ;;  %v58_v5 = vld [vmem:[%s924_s1 + $0x10] sm:$0xff]  ;;  %v61_v6 = vld [vmem:[%s924_s1 + $0x28] sm:$0xff]  ;;  %v63_v7 = vld [vmem:[%s924_s1 + $0x38] sm:$0xff] }
   0x5   :  { %v543_v8 = vpack.c.bf16 %v58_v5, %v56_v3  ;;  %v545_v9 = vpack.c.bf16 %v63_v7, %v61_v6  ;;  %v60_v10 = vld [vmem:[%s924_s1 + $0x20] sm:$0xff]  ;;  %v62_v11 = vld [vmem:[%s924_s1 + $0x30] sm:$0xff]  ;;  %v65_v12 = vld [vmem:[%s924_s1 + $0x48] sm:$0xff] }
   0x6   :  { %542 = vmatprep.subr.bf16.mxu0 %v541_v4  ;;  %v67_v13 = vld [vmem:[%s924_s1 + $0x58] sm:$0xff]  ;;  %v547_v14 = vpack.c.bf16 %v62_v11, %v60_v10  ;;  %v64_v16 = vld [vmem:[%s924_s1 + $0x40] sm:$0xff]  ;;  %v66_v17 = vld [vmem:[%s924_s1 + $0x50] sm:$0xff] }
   0x7   :  { %544 = vmatpush1.bf16.msra.mxu0 %v543_v8  ;;  %v549_v15 = vpack.c.bf16 %v67_v13, %v65_v12  ;;  %v69_v18 = vld [vmem:[%s924_s1 + $0x68] sm:$0xff]  ;;  %v71_v19 = vld [vmem:[%s924_s1 + $0x78] sm:$0xff]  ;;  %v551_v20 = vpack.c.bf16 %v66_v17, %v64_v16  ;;  %v68_v22 = vld [vmem:[%s924_s1 + $0x60] sm:$0xff] }
   0x8   :  { %546 = vmatprep.subr.bf16.mxu0 %v545_v9  ;;  %v553_v21 = vpack.c.bf16 %v71_v19, %v69_v18  ;;  %v70_v23 = vld [vmem:[%s924_s1 + $0x70] sm:$0xff]  ;;  %v73_v24 = vld [vmem:[%s924_s1 + $0x88] sm:$0xff]  ;;  %v75_v25 = vld [vmem:[%s924_s1 + $0x98] sm:$0xff] }
   0x9   :  { %v555_v26 = vpack.c.bf16 %v70_v23, %v68_v22  ;;  %v557_v27 = vpack.c.bf16 %v75_v25, %v73_v24  ;;  %v72_v28 = vld [vmem:[%s924_s1 + $0x80] sm:$0xff]  ;;  %v74_v29 = vld [vmem:[%s924_s1 + $0x90] sm:$0xff]  ;;  %v77_v30 = vld [vmem:[%s924_s1 + $0xa8] sm:$0xff] }
   0xa   :  { %v79_v31 = vld [vmem:[%s924_s1 + $0xb8] sm:$0xff]  ;;  %v559_v32 = vpack.c.bf16 %v74_v29, %v72_v28  ;;  %v36_v33 = vld [vmem:[%s923_s0 + $0x8] sm:$0xff]  ;;  %v76_v35 = vld [vmem:[%s924_s1 + $0xa0] sm:$0xff] }
   0xb   :  { %548 = vmatpush1.bf16.msra.mxu0 %v547_v14  ;;  %v561_v34 = vpack.c.bf16 %v79_v31, %v77_v30  ;;  %v78_v36 = vld [vmem:[%s924_s1 + $0xb0] sm:$0xff]  ;;  %v38_v37 = vld [vmem:[%s923_s0 + $0x18] sm:$0xff]  ;;  %v47_v38 = vsel %vm46_vm0, %v36_v33, -inf  ;;  %v81_v39 = vld [vmem:[%s924_s1 + $0xc8] sm:$0xff] }
   0xc   :  { %550 = vmatprep.subr.bf16.mxu0 %v549_v15  ;;  %v83_v40 = vld [vmem:[%s924_s1 + $0xd8] sm:$0xff]  ;;  %v48_v41 = vsel %vm46_vm0, %v38_v37, -inf }
   0xf   :  { %552 = vmatpush1.bf16.msra.mxu0 %v551_v20 }
  0x10   :  { %554 = vmatprep.subr.bf16.mxu0 %v553_v21 }
  0x13   :  { %556 = vmatpush1.bf16.msra.mxu0 %v555_v26 }
  0x14   :  { %558 = vmatprep.subr.bf16.mxu0 %v557_v27 }
  0x15   :  { %16 = vsyncpa [#allocation4], 0  ;;  %v49_v42 = vmax.f32 %v47_v38, %v48_v41  ;;  %v563_v43 = vpack.c.bf16 %v78_v36, %v76_v35  ;;  %v565_v44 = vpack.c.bf16 %v83_v40, %v81_v39  ;;  %v80_v45 = vld [vmem:[%s924_s1 + $0xc0] sm:$0xff]  ;;  %v82_v46 = vld [vmem:[%s924_s1 + $0xd0] sm:$0xff]  ;;  %v108_v31 = vlaneseq  ;;  %s635_s30 = smov 68   ;;  %s636_s10 = smov 108  }
  0x16   :  { %v85_v47 = vld [vmem:[%s924_s1 + $0xe8] sm:$0xff]  ;;  %v87_v49 = vld [vmem:[%s924_s1 + $0xf8] sm:$0xff]  ;;  %v35_v50 = vld [vmem:[%s923_s0] sm:$0xff]  ;;  %v567_v53 = vpack.c.bf16 %v82_v46, %v80_v45  ;;  %s639_s14 = smov 88   ;;  %vm244_vm1 = vcmask 1043456   ;;  %vm641_vm2 = vmmov 0  }
  0x17   :  { %560 = vmatpush1.bf16.msra.mxu0 %v559_v32  ;;  %v50_v48 = vrot.slane %v49_v42, 4  ;;  %v37_v51 = vld [vmem:[%s923_s0 + $0x10] sm:$0xff]  ;;  %v569_v54 = vpack.c.bf16 %v87_v49, %v85_v47  ;;  %v84_v55 = vld [vmem:[%s924_s1 + $0xe0] sm:$0xff]  ;;  %v89_v59 = vld [vmem:[%s924_s1 + $0x108] sm:$0xff]  ;;  %v109_v32 = vshrl.u32 %v108_v31, 7  ;;  %v640_v47 = vmov 0.0  }
  0x18   :  { %562 = vmatprep.subr.bf16.mxu0 %v561_v34  ;;  %v86_v56 = vld [vmem:[%s924_s1 + $0xf0] sm:$0xff]  ;;  %v39_v58 = vmax.f32 %v35_v50, %v37_v51  ;;  %v91_v60 = vld [vmem:[%s924_s1 + $0x118] sm:$0xff]  ;;  %v88_v0 = vld [vmem:[%s924_s1 + $0x100] sm:$0xff]  ;;  %520 = vmatprep.mubr.msk.f32.mxu1 %vm641_vm2, %v640_v47  ;;  %s642_s17 = smov 8   ;;  %s643_s18 = smov 28   ;;  %vm220_vm3 = vcmask 64512  }
  0x19   :  { %v51_v52 = vmax.f32 %v49_v42, %v50_v48  ;;  %v571_v62 = vpack.c.bf16 %v86_v56, %v84_v55  ;;  %v573_v63 = vpack.c.bf16 %v91_v60, %v89_v59  ;;  %v90_v1 = vld [vmem:[%s924_s1 + $0x110] sm:$0xff]  ;;  %v93_v4 = vld [vmem:[%s924_s1 + $0x128] sm:$0xff]  ;;  %v95_v5 = vld [vmem:[%s924_s1 + $0x138] sm:$0xff]  ;;  %v110_v33 = vsub.s32 0, %v109_v32  ;;  %s644_s0 = smov 116   ;;  %s645_s19 = smov 76  }
  0x1a   :  { %v40_v3 = vrot.slane %v39_v58, 4  ;;  %v575_v7 = vpack.c.bf16 %v90_v1, %v88_v0  ;;  %v577_v8 = vpack.c.bf16 %v95_v5, %v93_v4  ;;  %v92_v9 = vld [vmem:[%s924_s1 + $0x120] sm:$0xff]  ;;  %v94_v10 = vld [vmem:[%s924_s1 + $0x130] sm:$0xff]  ;;  %v97_v12 = vld [vmem:[%s924_s1 + $0x148] sm:$0xff]  ;;  %v114_v40 = vsub.s32 1, %v109_v32  ;;  %s646_s8 = smov 96  }
  0x1b   :  { %564 = vmatpush1.bf16.msra.mxu0 %v563_v43  ;;  %v52_v57 = vrot.slane %v51_v52, 2  ;;  %v99_v13 = vld [vmem:[%s924_s1 + $0x158] sm:$0xff]  ;;  %v579_v14 = vpack.c.bf16 %v94_v10, %v92_v9  ;;  %v96_v16 = vld [vmem:[%s924_s1 + $0x140] sm:$0xff]  ;;  %v98_v17 = vld [vmem:[%s924_s1 + $0x150] sm:$0xff]  ;;  %v637_v43 = vmov 0.0|0.0   ;;  %vm240_vm4 = vcmask 162816  }
  0x1c   :  { %566 = vmatprep.subr.bf16.mxu0 %v565_v44  ;;  %v41_v11 = vmax.f32 %v39_v58, %v40_v3  ;;  %v581_v15 = vpack.c.bf16 %v99_v13, %v97_v12  ;;  %v101_v19 = vld [vmem:[%s924_s1 + $0x168] sm:$0xff]  ;;  %v103_v20 = vld [vmem:[%s924_s1 + $0x178] sm:$0xff]  ;;  %v583_v21 = vpack.c.bf16 %v98_v17, %v96_v16  ;;  %v100_v23 = vld [vmem:[%s924_s1 + $0x160] sm:$0xff]  ;;  %589 = vmatprep.subr.bf16.mxu1 %v637_v43  ;;  %s647_s11 = smov [#allocation3]   ;;  %vm479_vm5 = vcmask 0  }
  0x1d   :  { %v53_v61 = vmax.f32 %v51_v52, %v52_v57  ;;  %v585_v22 = vpack.c.bf16 %v103_v20, %v101_v19  ;;  %v102_v24 = vld [vmem:[%s924_s1 + $0x170] sm:$0xff]  ;;  %v105_v28 = vld [vmem:[%s924_s1 + $0x188] sm:$0xff]  ;;  %v104_v29 = vld [vmem:[%s924_s1 + $0x180] sm:$0xff]  ;;  %s487_s12 = sshll.u32 %s647_s11, 4  ;;  %s488_s12 = int_to_ptr.vmem [resolvable:$true] %s487_s12 }
  0x1e   :  { %v42_v18 = vrot.slane %v41_v11, 2  ;;  %v587_v26 = vpack.c.bf16 %v102_v24, %v100_v23  ;;  %v106_v34 = vld [vmem:[%s925_s2] sm:$0x3]  ;;  %v237_v42 = vld [vmem:[%s926_s3 + $0x8] sm:$0xff]  ;;  %s638_s2 = smov 48   ;;  %s615_s13 = scalar_lea.vmem %s488_s12, 32 }
  0x1f   :  { %568 = vmatpush1.bf16.msra.mxu0 %v567_v53  ;;  %v54_v2 = vrot.slane %v53_v61, 1  ;;  %v111_v35 = vrot.slane %v106_v34, %v110_v33  ;;  %v236_v41 = vld [vmem:[%s926_s3] sm:$0xff]  ;;  %v115_v45 = vrot.slane %v106_v34, %v114_v40  ;;  %v238_v48 = vld [vmem:[%s926_s3 + $0x10] sm:$0xf]  ;;  %v320_v4 = vld [vmem:[%s928_s5 + $0x8] sm:$0xff]  ;;  %p616_p1 = scmp.lt.s32.totalorder %s488_s12, %s488_s12 }
  0x20   :  { %570 = vmatprep.subr.bf16.mxu0 %v569_v54  ;;  %v43_v25 = vmax.f32 %v41_v11, %v42_v18  ;;  %v590_v44 = vpack.c.bf16 %v237_v42, %v236_v41  ;;  %v319_v3 = vld [vmem:[%s928_s5] sm:$0xff]  ;;  %v321_v9 = vld [vmem:[%s928_s5 + $0x10] sm:$0xf]  ;;  %v400_v12 = vld [vmem:[%s930_s7 + $0x8] sm:$0xff] }
  0x21   :  { %v55_v6 = vmax.f32 %v53_v61, %v54_v2  ;;  %v239_v10 = vld [vmem:[%s927_s4] sm:$0x1]  ;;  %v401_v18 = vld [vmem:[%s930_s7 + $0x10] sm:$0xf] }
  0x22   :  { %v44_v27 = vrot.slane %v43_v25, 1  ;;  %591 = vmatpush3.bf16.msra.mxu1 %v590_v44  ;;  %v399_v11 = vld [vmem:[%s930_s7] sm:$0xff]  ;;  %s611_s7 = scalar_lea.vmem %s488_s12, 16 }
  0x23   :  { %572 = vmatpush1.bf16.msra.mxu0 %v571_v62  ;;  %495 = vmatprep.mubr.msk.f32.mxu0 %vm46_vm0, %v55_v6  ;;  %v596_v16 = vpack.c.bf16 %v400_v12, %v399_v11  ;;  %v322_v19 = vld [vmem:[%s929_s6] sm:$0x1]  ;;  %p612_p0 = scmp.ne.s32.totalorder %s488_s12, %s611_s7  ;;  %p617_p2 = scmp.lt.s32.totalorder %s615_s13, %s611_s7 }
  0x24   :  { %574 = vmatprep.subr.bf16.mxu0 %v573_v63  ;;  %v45_v30 = vmax.f32 %v43_v25, %v44_v27  ;;  %518 = vmatprep.subr.mxu1 %v640_v47  ;;  %v402_v23 = vld [vmem:[#allocation2] sm:$0x1] }
  0x25   :  { %p618_p3 = por %p617_p2, %p616_p1 }
  0x26   :  { %519 = vmatpush3.msk.msra.mxu1 %vm244_vm1, %v238_v48 }
  0x27   :  { %576 = vmatpush1.bf16.msra.mxu0 %v575_v7  ;;  %592 = vmatprep.subr.bf16.mxu1 %v637_v43  ;;  %v593_v7 = vpack.c.bf16 %v320_v4, %v319_v3  ;;  %p619_p4 = pnand %p618_p3, %p612_p0 }
  0x28   :  { %578 = vmatprep.subr.bf16.mxu0 %v577_v8 }
  0x2b   :  { %580 = vmatpush1.bf16.msra.mxu0 %v579_v14 }
  0x2c   :  { %582 = vmatprep.subr.bf16.mxu0 %v581_v15 }
  0x2f   :  { %584 = vmatpush1.bf16.msra.mxu0 %v583_v21 }
  0x30   :  { %586 = vmatprep.subr.bf16.mxu0 %v585_v22 }
  0x33   :  { %588 = vmatpush1.bf16.msra.mxu0 %v587_v26 }
  0x34   :  { %169 = vmatprep.subr.mxu0 %v105_v28 }
  0x37   :  { %170 = vmatpush1.msra.mxu0 %v104_v29 }
  0x38   :  { %186 = vmatmul.mubr.f32.vlgmr.msra.gmra.mrb[0].mxu0 %v45_v30 }
 0x10b   :  { %v187_v36 = vpop.f32.mrb[0].mxu0 }
 0x10c   :  { %v188_v37 = vadd.f32 %v187_v36, %v111_v35  ;;  %v189_v38 = vpop.f32.mrb[1].mxu0 }
 0x10d   :  { %v190_v46 = vadd.f32 %v189_v38, %v115_v45 }
 0x10e   :  { %v192_v39 = vmax.f32 %v188_v37, 0.0 }
 0x10f   :  { %v193_v49 = vmax.f32 %v190_v46, 0.0 }
 0x110   :  { %203 = vrot.lane.b32.xlu1 %v192_v39, %s635_s30  ;;  %195 = vrot.lane.b32.xlu0 %v192_v39, %s636_s10 }
 0x114   :  { %207 = vrot.lane.b32.xlu1 %v192_v39, %s638_s2  ;;  %199 = vrot.lane.b32.xlu0 %v192_v39, %s639_s14 }
 0x118   :  { %216 = vrot.lane.b32.xlu1 %v192_v39, %s642_s17  ;;  %211 = vrot.lane.b32.xlu0 %v192_v39, %s643_s18 }
 0x11c   :  { %224 = vrot.lane.b32.xlu1 %v193_v49, %s644_s0  ;;  %218 = vrot.lane.b32.xlu0 %v193_v49, %s642_s17 }
 0x120   :  { %232 = vrot.lane.b32.xlu1 %v193_v49, %s645_s19  ;;  %228 = vrot.lane.b32.xlu0 %v193_v49, %s646_s8 }
 0x182   :  { %v204_v50 = vpop.permute.xlu1 %203  ;;  %v196_v51 = vpop.permute.xlu0 %195 }
 0x183   :  { %v198_v52 = vmax.f32 %v192_v39, %v196_v51 }
 0x186   :  { %v208_v53 = vpop.permute.xlu1 %207  ;;  %v200_v54 = vpop.permute.xlu0 %199 }
 0x187   :  { %v202_v55 = vmax.f32 %v198_v52, %v200_v54 }
 0x189   :  { %v206_v56 = vmax.f32 %v202_v55, %v204_v50 }
 0x18a   :  { %v217_v57 = vpop.permute.xlu1 %216  ;;  %v212_v58 = vpop.permute.xlu0 %211 }
 0x18b   :  { %v210_v59 = vmax.f32 %v206_v56, %v208_v53 }
 0x18d   :  { %v214_v60 = vmax.f32 %v210_v59, %v212_v58 }
 0x18e   :  { %v219_v61 = vpop.permute.xlu0 %218  ;;  %v225_v62 = vpop.permute.xlu1 %224 }
 0x18f   :  { %v221_v63 = vsel %vm220_vm3, %v217_v57, %v219_v61 }
 0x190   :  { %v223_v0 = vmax.f32 %v214_v60, %v221_v63 }
 0x192   :  { %v227_v1 = vmax.f32 %v223_v0, %v225_v62  ;;  %v229_v2 = vpop.permute.xlu0 %228  ;;  %v233_v6 = vpop.permute.xlu1 %232 }
 0x194   :  { %v231_v5 = vmax.f32 %v227_v1, %v229_v2 }
 0x196   :  { %v235_v8 = vmax.f32 %v231_v5, %v233_v6 }
 0x198   :  { %521 = vmatmul.mubr.msk.f32.vlgmr.msra.gmra.mrb[0].mxu1 %vm240_vm4, %v235_v8 }
 0x199   :  { %594 = vmatpush3.bf16.msra.mxu1 %v593_v7  ;;  %529 = vmatprep.mubr.msk.f32.mxu1 %vm641_vm2, %v640_v47 }
 0x19a   :  { %527 = vmatprep.subr.mxu1 %v640_v47 }
 0x19d   :  { %528 = vmatpush3.msk.msra.mxu1 %vm244_vm1, %v321_v9 }
 0x19e   :  { %595 = vmatprep.subr.bf16.mxu1 %v637_v43 }
 0x26b   :  { %v314_v13 = vpop.f32.mrb[0].mxu1 }
 0x26c   :  { %v315_v14 = vadd.f32 %v314_v13, %v239_v10  ;;  %v522_v15 = vpop.f32.mrb[1].mxu1 }
 0x26e   :  { %v318_v17 = vmax.f32 %v315_v14, 0.0 }
 0x270   :  { %530 = vmatmul.mubr.msk.f32.vlgmr.msra.gmra.mrb[2].mxu1 %vm240_vm4, %v318_v17 }
 0x271   :  { %597 = vmatpush3.bf16.msra.mxu1 %v596_v16  ;;  %538 = vmatprep.mubr.msk.f32.mxu1 %vm641_vm2, %v640_v47 }
 0x272   :  { %536 = vmatprep.subr.mxu1 %v640_v47 }
 0x275   :  { %537 = vmatpush3.msk.msra.mxu1 %vm244_vm1, %v401_v18 }
 0x343   :  { %v395_v20 = vpop.f32.mrb[2].mxu1 }
 0x344   :  { %v396_v21 = vadd.f32 %v395_v20, %v322_v19  ;;  %v531_v22 = vpop.f32.mrb[3].mxu1 }
 0x346   :  { %539 = vmatmul.mubr.msk.f32.vlgmr.msra.gmra.mrb[4].mxu1 %vm240_vm4, %v396_v21 }
 0x419   :  { %v475_v24 = vpop.f32.mrb[4].mxu1 }
 0x41a   :  { %v476_v25 = vadd.f32 %v475_v24, %v402_v23  ;;  %v540_v26 = vpop.f32.mrb[5].mxu1 }
 0x41c   :  { %480 = vst.msk [vmem:[#allocation3] sm:$0x1] %vm479_vm5, %v476_v25 }
 0x41d   :  { %622 = shalt.err (!%p619_p4)
}
 0x41e   :  { %s623_s14 = scalar_lea.hbm %s932_s9, 16 }
 0x41f   :  { %p624_p5 = scmp.ne.s32.totalorder %s932_s9, %s623_s14  ;;  %p627_p6 = scmp.lt.u32.totalorder %s623_s14, %s932_s9 }
 0x421   :  { %p629_p7 = pnand %p627_p6, %p624_p5 }
 0x423   :  { %632 = shalt.err (!%p629_p7)
}
 0x424   :  { %490 = dma.vmem_to_hbm [thread:$0]  %s488_s12, 16, %s932_s9, [#allocation4]  }
 0x425   :  { %633 = dma.done.wait [#allocation4], 16  }
 0x426   :  { %634 = vsyncadd [#allocation4], 4294967280 }
 0x427   :  { %494 = vsyncpa [#allocation4], 1 }

// kernel: gnn_forward.2
= control target key start
LH: loop header
LB: loop body
LE: loop exit
PB: predicated region body
PF: predicated region fallthrough
CT: control target
= control target key end

     0   :  { %s2470_s11 = smov 0   ;;  %s2472_s12 = smov 0   ;;  %s5058_s0 = inlined_call_operand.<no memory space> [shape: s32[1], index: 0, kind: input, shape index: {}]   ;;  %s5059_s1 = inlined_call_operand.vmem [shape: f32[1000,200], index: 1, kind: input, shape index: {}]   ;;  %s5060_s2 = inlined_call_operand.vmem [shape: f32[16,200], index: 2, kind: output, shape index: {}]  }
   0x1   :  { %7 = sst [smem:[#allocation4]] %s5058_s0  ;;  %s2474_s13 = smov 0  }
   0x2 LB: > { %s25_s0 = sadd.s32 1, %s2445_s12  ;;  %p2391_p0 = scmp.ge.s32.totalorder %s2449_s13, 1  ;;  %s2449_s13 = sphi %s2474_s13, %s13_s13   ;;  %s2445_s12 = sphi %s2472_s12, %s5936_s12   ;;  %s2441_s11 = sphi %s2470_s11, %s5935_s11  }
   0x3   : > { %p27_p1 = scmp.ge.s32.totalorder %s25_s0, 2  ;;  %p115_p2 = scmp.lt.s32.totalorder %s2449_s13, 3 }
   0x5   : > { %s5938_s0 = smov (%p27_p1, %s25_s0), 0  ;;  %p116_p3 = pnand %p2391_p0, %p115_p2 }
   0x6   : > { %p140_p4 = scmp.lt.s32.totalorder (!%p116_p3), %s2441_s11, 0  ;;  %p152_p5 = scmp.lt.s32.totalorder (!%p116_p3), %s2441_s11, 1  ;;  %vm5203_vm0 = vcmask (!%p116_p3), 588800   ;;  %v2451_v0 = vmov (!%p116_p3), -inf  }
   0x7   : > { %119 = sbr.rel (%p116_p3) target bundleno = 648 (0x288), region = 24  ;;  %162 = vst [vmem:[#allocation2] sm:$0xff] (!%p116_p3), %v2451_v0  ;;  %164 = vst.msk [vmem:[#allocation2 + $0x8] sm:$0xff] (!%p116_p3), %vm5203_vm0, %v2451_v0  ;;  %s165_s14 = sadd.s32 (!%p116_p3), 1, %s2441_s11 }
   0x8   : > { %s2494_s15 = sld [smem:[#allocation4]] (!%p116_p3)  ;;  %s2498_s20 = smul.u32 (!%p116_p3), 1000, %s165_s14 }
   0xe   : > { %s141_s16 = scalar_select %p140_p4, %s2441_s11, 0 }
   0xf   : > { %s153_s17 = scalar_select %p152_p5, %s2441_s11, 1 }
  0x10   : > { %s142_s18 = smul.u32 125, %s141_s16  ;;  %p2396_p7 = scmp.le.s32.totalorder %s2498_s20, %s2494_s15 }
  0x11   : > { %s2401_s19 = sshll.u32 %s153_s17, 4 }
  0x12   : > { %p143_p6 = scmp.lt.s32.totalorder %s142_s18, 124  ;;  %s2503_s23 = scalar_lea.vmem %s5060_s2, %s2401_s19 }
  0x13   : > { %171 = sbr.rel (%p2396_p7) target bundleno = 389 (0x185), region = 32 }
  0x14   : > { %s5940_s18 = smov (!%p143_p6, %s142_s18), 124 }
  0x15   : > { %s2400_s24 = sshll.u32 %s5940_s18, 4 }
  0x16   : > { %s2508_s27 = scalar_lea.vmem %s5059_s1, %s2400_s24 }
  0x1a   : > { %v423_v1 = vlaneseq  ;;  %s422_s28 = smul.u32 1000, %s2441_s11  ;;  %s675_s29 = sld [smem:[#allocation4]] }
  0x1c   : > { %v2513_v2 = vshrl.u32 %v423_v1, 7  ;;  %v2521_v5 = vstv %s422_s28 }
  0x1e   : > { %v2516_v3 = vadd.s32 296, %v2513_v2  ;;  %v2519_v4 = vadd.s32 304, %v2513_v2  ;;  %v2524_v6 = vadd.s32 312, %v2513_v2  ;;  %v2527_v7 = vadd.s32 320, %v2513_v2 }
  0x1f   : > { %v2530_v8 = vadd.s32 328, %v2513_v2  ;;  %v2533_v9 = vadd.s32 336, %v2513_v2  ;;  %v2536_v10 = vadd.s32 344, %v2513_v2  ;;  %v2539_v11 = vadd.s32 352, %v2513_v2 }
  0x20   : > { %v2542_v12 = vadd.s32 360, %v2513_v2  ;;  %v2545_v13 = vadd.s32 368, %v2513_v2  ;;  %v2548_v14 = vadd.s32 376, %v2513_v2  ;;  %v2551_v15 = vadd.s32 384, %v2513_v2 }
  0x21   : > { %v2554_v16 = vadd.s32 392, %v2513_v2  ;;  %v2557_v17 = vadd.s32 400, %v2513_v2  ;;  %v2560_v18 = vadd.s32 408, %v2513_v2  ;;  %v2563_v19 = vadd.s32 416, %v2513_v2 }
  0x22   : > { %v2566_v20 = vadd.s32 424, %v2513_v2  ;;  %v2569_v21 = vadd.s32 432, %v2513_v2  ;;  %v2572_v22 = vadd.s32 440, %v2513_v2  ;;  %v2575_v23 = vadd.s32 448, %v2513_v2 }
  0x23   : > { %v2578_v24 = vadd.s32 456, %v2513_v2  ;;  %v2581_v25 = vadd.s32 464, %v2513_v2  ;;  %v2584_v26 = vadd.s32 472, %v2513_v2  ;;  %v2587_v27 = vadd.s32 480, %v2513_v2 }
  0x24   : > { %v2590_v28 = vadd.s32 488, %v2513_v2  ;;  %v2593_v29 = vadd.s32 496, %v2513_v2  ;;  %v2596_v30 = vadd.s32 504, %v2513_v2  ;;  %v2599_v31 = vadd.s32 512, %v2513_v2 }
  0x25   : > { %v2602_v32 = vadd.s32 520, %v2513_v2  ;;  %v2605_v33 = vadd.s32 528, %v2513_v2  ;;  %v2608_v34 = vadd.s32 536, %v2513_v2  ;;  %v2611_v35 = vadd.s32 544, %v2513_v2 }
  0x26   : > { %v2614_v36 = vadd.s32 552, %v2513_v2  ;;  %v2617_v37 = vadd.s32 560, %v2513_v2  ;;  %v2620_v38 = vadd.s32 568, %v2513_v2  ;;  %v2623_v39 = vadd.s32 576, %v2513_v2 }
  0x27   : > { %v2626_v40 = vadd.s32 584, %v2513_v2  ;;  %v2629_v41 = vadd.s32 592, %v2513_v2  ;;  %v2632_v42 = vadd.s32 600, %v2513_v2  ;;  %v2635_v43 = vadd.s32 608, %v2513_v2 }
  0x28   : > { %v2638_v44 = vadd.s32 616, %v2513_v2  ;;  %v2641_v45 = vadd.s32 624, %v2513_v2  ;;  %v2644_v46 = vadd.s32 632, %v2513_v2  ;;  %v2647_v47 = vadd.s32 640, %v2513_v2 }
  0x29   : > { %v2650_v48 = vadd.s32 648, %v2513_v2  ;;  %v2653_v49 = vadd.s32 656, %v2513_v2  ;;  %v2656_v50 = vadd.s32 664, %v2513_v2  ;;  %v2659_v51 = vadd.s32 672, %v2513_v2 }
  0x2a   : > { %v2662_v52 = vadd.s32 680, %v2513_v2  ;;  %v2665_v53 = vadd.s32 688, %v2513_v2  ;;  %v2668_v54 = vadd.s32 696, %v2513_v2  ;;  %v2671_v55 = vadd.s32 704, %v2513_v2 }
  0x2b   : > { %v2674_v56 = vadd.s32 712, %v2513_v2  ;;  %v2677_v57 = vadd.s32 720, %v2513_v2  ;;  %v2680_v58 = vadd.s32 728, %v2513_v2  ;;  %v2683_v59 = vadd.s32 736, %v2513_v2 }
  0x2c   : > { %v2686_v60 = vadd.s32 744, %v2513_v2  ;;  %v2689_v61 = vadd.s32 752, %v2513_v2  ;;  %v2692_v62 = vadd.s32 760, %v2513_v2  ;;  %v2695_v63 = vadd.s32 768, %v2513_v2 }
  0x2d   : > { %5218 = vst [vmem:[#allocation5_spill] sm:$0xff] %v2683_v59  ;;  %v2698_v0 = vadd.s32 776, %v2513_v2  ;;  %v2701_v1 = vadd.s32 784, %v2513_v2  ;;  %v2704_v59 = vadd.s32 792, %v2513_v2 }
  0x2e   : > { %5219 = vst [vmem:[#allocation6_spill] sm:$0xff] %v2686_v60  ;;  %5220 = vst [vmem:[#allocation7_spill] sm:$0xff] %v2689_v61  ;;  %v2707_v60 = vadd.s32 800, %v2513_v2  ;;  %v2710_v61 = vadd.s32 808, %v2513_v2 }
  0x2f   : > { %5221 = vst [vmem:[#allocation8_spill] sm:$0xff] %v2692_v62  ;;  %5222 = vst [vmem:[#allocation9_spill] sm:$0xff] %v2695_v63  ;;  %v2713_v62 = vadd.s32 816, %v2513_v2  ;;  %v2716_v63 = vadd.s32 824, %v2513_v2 }
  0x30   : > { %5223 = vst [vmem:[#allocation10_spill] sm:$0xff] %v2698_v0  ;;  %5224 = vst [vmem:[#allocation11_spill] sm:$0xff] %v2701_v1  ;;  %v2719_v0 = vadd.s32 832, %v2513_v2  ;;  %v2722_v1 = vadd.s32 840, %v2513_v2 }
  0x31   : > { %5225 = vst [vmem:[#allocation12_spill] sm:$0xff] %v2704_v59  ;;  %5226 = vst [vmem:[#allocation13_spill] sm:$0xff] %v2707_v60  ;;  %v2725_v59 = vadd.s32 848, %v2513_v2  ;;  %v2728_v60 = vadd.s32 856, %v2513_v2 }
  0x32   : > { %5227 = vst [vmem:[#allocation14_spill] sm:$0xff] %v2710_v61  ;;  %5228 = vst [vmem:[#allocation15_spill] sm:$0xff] %v2713_v62  ;;  %v2731_v61 = vadd.s32 864, %v2513_v2  ;;  %v2734_v62 = vadd.s32 872, %v2513_v2 }
  0x33   : > { %5229 = vst [vmem:[#allocation16_spill] sm:$0xff] %v2716_v63  ;;  %5230 = vst [vmem:[#allocation17_spill] sm:$0xff] %v2719_v0  ;;  %v2737_v63 = vadd.s32 880, %v2513_v2  ;;  %v2740_v0 = vadd.s32 888, %v2513_v2 }
  0x34   : > { %5231 = vst [vmem:[#allocation18_spill] sm:$0xff] %v2722_v1  ;;  %5232 = vst [vmem:[#allocation19_spill] sm:$0xff] %v2725_v59  ;;  %v2743_v1 = vadd.s32 896, %v2513_v2  ;;  %v2746_v59 = vadd.s32 904, %v2513_v2 }
  0x35   : > { %5233 = vst [vmem:[#allocation20_spill] sm:$0xff] %v2728_v60  ;;  %5234 = vst [vmem:[#allocation21_spill] sm:$0xff] %v2731_v61  ;;  %v2749_v60 = vadd.s32 912, %v2513_v2  ;;  %v2752_v61 = vadd.s32 920, %v2513_v2 }
  0x36   : > { %5235 = vst [vmem:[#allocation22_spill] sm:$0xff] %v2734_v62  ;;  %5236 = vst [vmem:[#allocation23_spill] sm:$0xff] %v2737_v63  ;;  %v2755_v62 = vadd.s32 928, %v2513_v2  ;;  %v2758_v63 = vadd.s32 936, %v2513_v2 }
  0x37   : > { %5237 = vst [vmem:[#allocation24_spill] sm:$0xff] %v2740_v0  ;;  %5238 = vst [vmem:[#allocation25_spill] sm:$0xff] %v2743_v1  ;;  %v2762_v0 = vadd.s32 %v2521_v5, %v2516_v3  ;;  %v2765_v1 = vadd.s32 944, %v2513_v2  ;;  %v2784_v3 = vadd.s32 984, %v2513_v2 }
  0x38   : > { %5239 = vst [vmem:[#allocation26_spill] sm:$0xff] %v2746_v59  ;;  %5240 = vst [vmem:[#allocation27_spill] sm:$0xff] %v2749_v60  ;;  %v2768_v59 = vadd.s32 952, %v2513_v2  ;;  %v2771_v60 = vadd.s32 960, %v2513_v2 }
  0x39   : > { %5241 = vst [vmem:[#allocation28_spill] sm:$0xff] %v2752_v61  ;;  %5242 = vst [vmem:[#allocation29_spill] sm:$0xff] %v2755_v62  ;;  %v2775_v61 = vadd.s32 %v2521_v5, %v2519_v4  ;;  %v2778_v62 = vadd.s32 968, %v2513_v2  ;;  %v2795_v4 = vadd.s32 %v2521_v5, %v2527_v7  ;;  %v2815_v7 = vadd.s32 %v2521_v5, %v2542_v12 }
  0x3a   : > { %5243 = vst [vmem:[#allocation30_spill] sm:$0xff] %v2758_v63  ;;  %5244 = vst [vmem:[#allocation31_spill] sm:$0xff] %v2762_v0  ;;  %v2781_v63 = vadd.s32 976, %v2513_v2  ;;  %v2788_v0 = vadd.s32 %v2521_v5, %v2524_v6  ;;  %v2811_v6 = vadd.s32 %v2521_v5, %v2539_v11  ;;  %v2831_v11 = vadd.s32 %v2521_v5, %v2554_v16 }
  0x3b   : > { %5245 = vst [vmem:[#allocation32_spill] sm:$0xff] %v2768_v59  ;;  %5246 = vst [vmem:[#allocation33_spill] sm:$0xff] %v2775_v61  ;;  %v2791_v59 = vadd.s32 992, %v2513_v2  ;;  %v2799_v61 = vadd.s32 %v2521_v5, %v2530_v8  ;;  %v2819_v8 = vadd.s32 %v2521_v5, %v2545_v13  ;;  %v2835_v12 = vadd.s32 %v2521_v5, %v2557_v17 }
  0x3c   : > { %5247 = vst [vmem:[#allocation34_spill] sm:$0xff] %v2781_v63  ;;  %5248 = vst [vmem:[#allocation35_spill] sm:$0xff] %v2784_v3  ;;  %v2803_v63 = vadd.s32 %v2521_v5, %v2533_v9  ;;  %v2807_v3 = vadd.s32 %v2521_v5, %v2536_v10  ;;  %v2823_v9 = vadd.s32 %v2521_v5, %v2548_v14 }
  0x3d   : > { %5251 = vst [vmem:[#allocation38_spill] sm:$0xff] %v2811_v6  ;;  %5252 = vst [vmem:[#allocation39_spill] sm:$0xff] %v2815_v7  ;;  %v2827_v10 = vadd.s32 %v2521_v5, %v2551_v15  ;;  %v2839_v13 = vadd.s32 %v2521_v5, %v2560_v18  ;;  %v2843_v14 = vadd.s32 %v2521_v5, %v2563_v19 }
  0x3e   : > { %5249 = vst [vmem:[#allocation36_spill] sm:$0xff] %v2803_v63  ;;  %5250 = vst [vmem:[#allocation37_spill] sm:$0xff] %v2807_v3  ;;  %v2847_v15 = vadd.s32 %v2521_v5, %v2566_v20  ;;  %v2851_v16 = vadd.s32 %v2521_v5, %v2569_v21  ;;  %v2855_v17 = vadd.s32 %v2521_v5, %v2572_v22  ;;  %v187_v3 = vld [vmem:[%s2508_s27 + $0x78] sm:$0xff] }
  0x3f   : > { %5253 = vst [vmem:[#allocation40_spill] sm:$0xff] %v2819_v8  ;;  %5254 = vst [vmem:[#allocation41_spill] sm:$0xff] %v2823_v9  ;;  %v2859_v18 = vadd.s32 %v2521_v5, %v2575_v23  ;;  %v2863_v19 = vadd.s32 %v2521_v5, %v2578_v24  ;;  %v2867_v20 = vadd.s32 %v2521_v5, %v2581_v25  ;;  %v181_v9 = vld [vmem:[%s2508_s27 + $0x48] sm:$0xff]  ;;  %v234_v8 = vld [vmem:[%s2508_s27 + $0x1f0] sm:$0xff] }
  0x40   : > { %5255 = vst [vmem:[#allocation42_spill] sm:$0xff] %v2827_v10  ;;  %5256 = vst [vmem:[#allocation43_spill] sm:$0xff] %v2831_v11  ;;  %v2871_v21 = vadd.s32 %v2521_v5, %v2584_v26  ;;  %v2875_v22 = vadd.s32 %v2521_v5, %v2587_v27  ;;  %v2879_v23 = vadd.s32 %v2521_v5, %v2590_v28  ;;  %v179_v10 = vld [vmem:[%s2508_s27 + $0x38] sm:$0xff] }
  0x41   : > { %5257 = vst [vmem:[#allocation44_spill] sm:$0xff] %v2835_v12  ;;  %5258 = vst [vmem:[#allocation45_spill] sm:$0xff] %v2839_v13  ;;  %v2883_v24 = vadd.s32 %v2521_v5, %v2593_v29  ;;  %v2887_v25 = vadd.s32 %v2521_v5, %v2596_v30  ;;  %v2891_v26 = vadd.s32 %v2521_v5, %v2599_v31  ;;  %v228_v12 = vld [vmem:[%s2508_s27 + $0x1c0] sm:$0xff] }
  0x42   : > { %5259 = vst [vmem:[#allocation46_spill] sm:$0xff] %v2843_v14  ;;  %5260 = vst [vmem:[#allocation47_spill] sm:$0xff] %v2847_v15  ;;  %v2895_v27 = vadd.s32 %v2521_v5, %v2602_v32  ;;  %v2899_v28 = vadd.s32 %v2521_v5, %v2605_v33  ;;  %v2903_v29 = vadd.s32 %v2521_v5, %v2608_v34  ;;  %v459_v15 = vadd.s32 280, %v2513_v2 }
  0x43   : > { %5261 = vst [vmem:[#allocation48_spill] sm:$0xff] %v2851_v16  ;;  %5262 = vst [vmem:[#allocation49_spill] sm:$0xff] %v2855_v17  ;;  %v2907_v30 = vadd.s32 %v2521_v5, %v2611_v35  ;;  %v2911_v31 = vadd.s32 %v2521_v5, %v2614_v36  ;;  %v2915_v32 = vadd.s32 %v2521_v5, %v2617_v37  ;;  %v458_v17 = vadd.s32 272, %v2513_v2  ;;  %v226_v16 = vld [vmem:[%s2508_s27 + $0x1b0] sm:$0xff] }
  0x44   : > { %5263 = vst [vmem:[#allocation50_spill] sm:$0xff] %v2859_v18  ;;  %5264 = vst [vmem:[#allocation51_spill] sm:$0xff] %v2863_v19  ;;  %v2919_v33 = vadd.s32 %v2521_v5, %v2620_v38  ;;  %v2923_v34 = vadd.s32 %v2521_v5, %v2623_v39  ;;  %v2927_v35 = vadd.s32 %v2521_v5, %v2626_v40  ;;  %v457_v18 = vadd.s32 264, %v2513_v2 }
  0x45   : > { %5265 = vst [vmem:[#allocation52_spill] sm:$0xff] %v2867_v20  ;;  %5266 = vst [vmem:[#allocation53_spill] sm:$0xff] %v2871_v21  ;;  %v2931_v36 = vadd.s32 %v2521_v5, %v2629_v41  ;;  %v2935_v37 = vadd.s32 %v2521_v5, %v2632_v42  ;;  %v2939_v38 = vadd.s32 %v2521_v5, %v2635_v43  ;;  %v224_v20 = vld [vmem:[%s2508_s27 + $0x1a0] sm:$0xff] }
  0x46   : > { %5267 = vst [vmem:[#allocation54_spill] sm:$0xff] %v2875_v22  ;;  %5268 = vst [vmem:[#allocation55_spill] sm:$0xff] %v2879_v23  ;;  %v2943_v39 = vadd.s32 %v2521_v5, %v2638_v44  ;;  %v2947_v40 = vadd.s32 %v2521_v5, %v2641_v45  ;;  %v2951_v41 = vadd.s32 %v2521_v5, %v2644_v46  ;;  %v426_v23 = vadd.s32 16, %v2513_v2 }
  0x47   : > { %5269 = vst [vmem:[#allocation56_spill] sm:$0xff] %v2883_v24  ;;  %5270 = vst [vmem:[#allocation57_spill] sm:$0xff] %v2887_v25  ;;  %v2955_v42 = vadd.s32 %v2521_v5, %v2647_v47  ;;  %v2959_v43 = vadd.s32 %v2521_v5, %v2650_v48  ;;  %v2963_v44 = vadd.s32 %v2521_v5, %v2653_v49  ;;  %v425_v24 = vadd.s32 8, %v2513_v2 }
  0x48   : > { %5271 = vst [vmem:[#allocation58_spill] sm:$0xff] %v2891_v26  ;;  %5272 = vst [vmem:[#allocation59_spill] sm:$0xff] %v2895_v27  ;;  %v2967_v45 = vadd.s32 %v2521_v5, %v2656_v50  ;;  %v2971_v46 = vadd.s32 %v2521_v5, %v2659_v51  ;;  %v2975_v47 = vadd.s32 %v2521_v5, %v2662_v52 }
  0x49   : > { %5273 = vst [vmem:[#allocation60_spill] sm:$0xff] %v2899_v28  ;;  %5274 = vst [vmem:[#allocation61_spill] sm:$0xff] %v2903_v29  ;;  %v2979_v48 = vadd.s32 %v2521_v5, %v2665_v53  ;;  %v2983_v49 = vadd.s32 %v2521_v5, %v2668_v54  ;;  %v2987_v50 = vadd.s32 %v2521_v5, %v2671_v55 }
  0x4a   : > { %5275 = vst [vmem:[#allocation62_spill] sm:$0xff] %v2907_v30  ;;  %5276 = vst [vmem:[#allocation63_spill] sm:$0xff] %v2911_v31  ;;  %v2991_v51 = vadd.s32 %v2521_v5, %v2674_v56  ;;  %v2995_v52 = vadd.s32 %v2521_v5, %v2677_v57  ;;  %v2999_v53 = vadd.s32 %v2521_v5, %v2680_v58 }
  0x4b   : > { %5277 = vst [vmem:[#allocation64_spill] sm:$0xff] %v2915_v32  ;;  %5278 = vst [vmem:[#allocation65_spill] sm:$0xff] %v2919_v33  ;;  %v3547_v21 = vadd.s32 %v2521_v5, %v2513_v2  ;;  %v551_v14 = vadd.s32 %v2521_v5, %v425_v24  ;;  %v552_v13 = vadd.s32 %v2521_v5, %v426_v23 }
  0x4c   : > { %5279 = vst [vmem:[#allocation66_spill] sm:$0xff] %v2923_v34  ;;  %5280 = vst [vmem:[#allocation67_spill] sm:$0xff] %v2927_v35 }
  0x4d   : > { %5281 = vst [vmem:[#allocation68_spill] sm:$0xff] %v2931_v36  ;;  %5282 = vst [vmem:[#allocation69_spill] sm:$0xff] %v2935_v37 }
  0x4e   : > { %5283 = vst [vmem:[#allocation70_spill] sm:$0xff] %v2939_v38  ;;  %5284 = vst [vmem:[#allocation71_spill] sm:$0xff] %v2943_v39 }
  0x4f   : > { %5285 = vst [vmem:[#allocation72_spill] sm:$0xff] %v2947_v40  ;;  %5286 = vst [vmem:[#allocation73_spill] sm:$0xff] %v2951_v41  ;;  %v190_v40 = vld [vmem:[%s2508_s27 + $0x90] sm:$0xff] }
  0x50   : > { %5287 = vst [vmem:[#allocation74_spill] sm:$0xff] %v2955_v42  ;;  %5288 = vst [vmem:[#allocation75_spill] sm:$0xff] %v2959_v43  ;;  %v188_v43 = vld [vmem:[%s2508_s27 + $0x80] sm:$0xff] }
  0x51   : > { %5289 = vst [vmem:[#allocation76_spill] sm:$0xff] %v2963_v44  ;;  %5290 = vst [vmem:[#allocation77_spill] sm:$0xff] %v2967_v45 }
  0x52   : > { %5291 = vst [vmem:[#allocation78_spill] sm:$0xff] %v2971_v46  ;;  %5292 = vst [vmem:[#allocation79_spill] sm:$0xff] %v2975_v47  ;;  %v182_v46 = vld [vmem:[%s2508_s27 + $0x50] sm:$0xff] }
  0x53   : > { %5293 = vst [vmem:[#allocation80_spill] sm:$0xff] %v2979_v48  ;;  %5294 = vst [vmem:[#allocation81_spill] sm:$0xff] %v2983_v49  ;;  %v5299_v48 = vld [vmem:[#allocation5_spill] sm:$0xff]  ;;  %v5301_v49 = vld [vmem:[#allocation6_spill] sm:$0xff] }
  0x54   : > { %5295 = vst [vmem:[#allocation82_spill] sm:$0xff] %v2987_v50  ;;  %5296 = vst [vmem:[#allocation83_spill] sm:$0xff] %v2991_v51  ;;  %v3003_v54 = vadd.s32 %v2521_v5, %v5299_v48  ;;  %v3007_v55 = vadd.s32 %v2521_v5, %v5301_v49  ;;  %v5303_v50 = vld [vmem:[#allocation7_spill] sm:$0xff]  ;;  %v5305_v51 = vld [vmem:[#allocation8_spill] sm:$0xff] }
  0x55   : > { %5297 = vst [vmem:[#allocation84_spill] sm:$0xff] %v2995_v52  ;;  %5298 = vst [vmem:[#allocation85_spill] sm:$0xff] %v2999_v53  ;;  %v3011_v56 = vadd.s32 %v2521_v5, %v5303_v50  ;;  %v3015_v57 = vadd.s32 %v2521_v5, %v5305_v51  ;;  %v5307_v52 = vld [vmem:[#allocation9_spill] sm:$0xff]  ;;  %v5309_v53 = vld [vmem:[#allocation10_spill] sm:$0xff] }
  0x56   : > { %5300 = vst [vmem:[#allocation5_spill] sm:$0xff] %v3003_v54  ;;  %5302 = vst [vmem:[#allocation6_spill] sm:$0xff] %v3007_v55  ;;  %v3019_v58 = vadd.s32 %v2521_v5, %v5307_v52  ;;  %v3023_v48 = vadd.s32 %v2521_v5, %v5309_v53  ;;  %v5311_v54 = vld [vmem:[#allocation11_spill] sm:$0xff]  ;;  %v5313_v55 = vld [vmem:[#allocation12_spill] sm:$0xff] }
  0x57   : > { %5304 = vst [vmem:[#allocation7_spill] sm:$0xff] %v3011_v56  ;;  %5306 = vst [vmem:[#allocation8_spill] sm:$0xff] %v3015_v57  ;;  %v3027_v49 = vadd.s32 %v2521_v5, %v5311_v54  ;;  %v3031_v50 = vadd.s32 %v2521_v5, %v5313_v55  ;;  %v5315_v56 = vld [vmem:[#allocation13_spill] sm:$0xff]  ;;  %v5317_v57 = vld [vmem:[#allocation14_spill] sm:$0xff] }
  0x58   : > { %5308 = vst [vmem:[#allocation9_spill] sm:$0xff] %v3019_v58  ;;  %5310 = vst [vmem:[#allocation10_spill] sm:$0xff] %v3023_v48  ;;  %v3035_v51 = vadd.s32 %v2521_v5, %v5315_v56  ;;  %v3039_v52 = vadd.s32 %v2521_v5, %v5317_v57  ;;  %v5319_v58 = vld [vmem:[#allocation15_spill] sm:$0xff]  ;;  %v5321_v48 = vld [vmem:[#allocation16_spill] sm:$0xff] }
  0x59   : > { %5312 = vst [vmem:[#allocation11_spill] sm:$0xff] %v3027_v49  ;;  %5314 = vst [vmem:[#allocation12_spill] sm:$0xff] %v3031_v50  ;;  %v3043_v53 = vadd.s32 %v2521_v5, %v5319_v58  ;;  %v3047_v54 = vadd.s32 %v2521_v5, %v5321_v48  ;;  %v5323_v49 = vld [vmem:[#allocation17_spill] sm:$0xff]  ;;  %v5325_v50 = vld [vmem:[#allocation18_spill] sm:$0xff] }
  0x5a   : > { %5316 = vst [vmem:[#allocation13_spill] sm:$0xff] %v3035_v51  ;;  %5318 = vst [vmem:[#allocation14_spill] sm:$0xff] %v3039_v52  ;;  %v3051_v55 = vadd.s32 %v2521_v5, %v5323_v49  ;;  %v3055_v56 = vadd.s32 %v2521_v5, %v5325_v50  ;;  %v5327_v51 = vld [vmem:[#allocation19_spill] sm:$0xff]  ;;  %v5329_v52 = vld [vmem:[#allocation20_spill] sm:$0xff] }
  0x5b   : > { %5320 = vst [vmem:[#allocation15_spill] sm:$0xff] %v3043_v53  ;;  %5322 = vst [vmem:[#allocation16_spill] sm:$0xff] %v3047_v54  ;;  %v3059_v57 = vadd.s32 %v2521_v5, %v5327_v51  ;;  %v3063_v58 = vadd.s32 %v2521_v5, %v5329_v52  ;;  %v5331_v53 = vld [vmem:[#allocation21_spill] sm:$0xff]  ;;  %v5333_v54 = vld [vmem:[#allocation22_spill] sm:$0xff] }
  0x5c   : > { %5324 = vst [vmem:[#allocation17_spill] sm:$0xff] %v3051_v55  ;;  %5326 = vst [vmem:[#allocation18_spill] sm:$0xff] %v3055_v56  ;;  %v3067_v48 = vadd.s32 %v2521_v5, %v5331_v53  ;;  %v3071_v49 = vadd.s32 %v2521_v5, %v5333_v54  ;;  %v5335_v55 = vld [vmem:[#allocation23_spill] sm:$0xff]  ;;  %v5337_v56 = vld [vmem:[#allocation24_spill] sm:$0xff] }
  0x5d   : > { %5328 = vst [vmem:[#allocation19_spill] sm:$0xff] %v3059_v57  ;;  %5330 = vst [vmem:[#allocation20_spill] sm:$0xff] %v3063_v58  ;;  %v3075_v50 = vadd.s32 %v2521_v5, %v5335_v55  ;;  %v3079_v51 = vadd.s32 %v2521_v5, %v5337_v56  ;;  %v5339_v57 = vld [vmem:[#allocation25_spill] sm:$0xff]  ;;  %v5341_v58 = vld [vmem:[#allocation26_spill] sm:$0xff] }
  0x5e   : > { %5332 = vst [vmem:[#allocation21_spill] sm:$0xff] %v3067_v48  ;;  %5334 = vst [vmem:[#allocation22_spill] sm:$0xff] %v3071_v49  ;;  %v3083_v52 = vadd.s32 %v2521_v5, %v5339_v57  ;;  %v3087_v53 = vadd.s32 %v2521_v5, %v5341_v58  ;;  %v5343_v48 = vld [vmem:[#allocation27_spill] sm:$0xff]  ;;  %v5345_v49 = vld [vmem:[#allocation28_spill] sm:$0xff]  ;;  %v3107_v58 = vadd.s32 %v2521_v5, %v2765_v1 }
  0x5f   : > { %5336 = vst [vmem:[#allocation23_spill] sm:$0xff] %v3075_v50  ;;  %5338 = vst [vmem:[#allocation24_spill] sm:$0xff] %v3079_v51  ;;  %v3091_v54 = vadd.s32 %v2521_v5, %v5343_v48  ;;  %v3095_v55 = vadd.s32 %v2521_v5, %v5345_v49  ;;  %v5347_v50 = vld [vmem:[#allocation29_spill] sm:$0xff]  ;;  %v5349_v51 = vld [vmem:[#allocation30_spill] sm:$0xff]  ;;  %v3115_v49 = vadd.s32 %v2521_v5, %v2771_v60  ;;  %v428_v60 = vadd.s32 32, %v2513_v2 }
  0x60   : > { %5340 = vst [vmem:[#allocation25_spill] sm:$0xff] %v3083_v52  ;;  %5342 = vst [vmem:[#allocation26_spill] sm:$0xff] %v3087_v53  ;;  %v3099_v56 = vadd.s32 %v2521_v5, %v5347_v50  ;;  %v3103_v57 = vadd.s32 %v2521_v5, %v5349_v51  ;;  %v5352_v53 = vld [vmem:[#allocation32_spill] sm:$0xff]  ;;  %v3119_v50 = vadd.s32 %v2521_v5, %v2778_v62  ;;  %v430_v62 = vadd.s32 48, %v2513_v2  ;;  %v186_v47 = vld [vmem:[%s2508_s27 + $0x70] sm:$0xff] }
  0x61   : > { %5344 = vst [vmem:[#allocation27_spill] sm:$0xff] %v3091_v54  ;;  %5346 = vst [vmem:[#allocation28_spill] sm:$0xff] %v3095_v55  ;;  %v3111_v48 = vadd.s32 %v2521_v5, %v5352_v53  ;;  %v3131_v53 = vadd.s32 %v2521_v5, %v2791_v59  ;;  %v3145_v59 = vadd.s32 %v2521_v5, %v428_v60  ;;  %v5363_v60 = vld [vmem:[#allocation33_spill] sm:$0xff]  ;;  %v435_v54 = vadd.s32 88, %v2513_v2 }
  0x62   : > { %5348 = vst [vmem:[#allocation29_spill] sm:$0xff] %v3099_v56  ;;  %5350 = vst [vmem:[#allocation30_spill] sm:$0xff] %v3103_v57  ;;  %v5356_v56 = vld [vmem:[#allocation34_spill] sm:$0xff]  ;;  %v5358_v57 = vld [vmem:[#allocation35_spill] sm:$0xff] }
  0x63   : > { %5351 = vst [vmem:[#allocation86_spill] sm:$0xff] %v3107_v58  ;;  %5353 = vst [vmem:[#allocation32_spill] sm:$0xff] %v3111_v48  ;;  %v3123_v51 = vadd.s32 %v2521_v5, %v5356_v56  ;;  %v3127_v1 = vadd.s32 %v2521_v5, %v5358_v57  ;;  %v432_v56 = vadd.s32 64, %v2513_v2  ;;  %v3142_v57 = vadd.s32 80, %v2513_v2 }
  0x64   : > { %5354 = vst [vmem:[#allocation87_spill] sm:$0xff] %v3115_v49  ;;  %5355 = vst [vmem:[#allocation88_spill] sm:$0xff] %v3119_v50  ;;  %v429_v49 = vadd.s32 40, %v2513_v2  ;;  %v431_v50 = vadd.s32 56, %v2513_v2  ;;  %v3156_v58 = vstv %s675_s29  ;;  %v3377_v39 = vadd.s32 %v2521_v5, %v435_v54 }
  0x65   : > { %5357 = vst [vmem:[#allocation34_spill] sm:$0xff] %v3123_v51  ;;  %5359 = vst [vmem:[#allocation35_spill] sm:$0xff] %v3127_v1  ;;  %v3139_v51 = vadd.s32 72, %v2513_v2  ;;  %v3151_v1 = vadd.s32 %v2521_v5, %v430_v62  ;;  %v3159_v55 = vadd.s32 %v2521_v5, %v432_v56  ;;  %vm681_vm10 = vcmp.lt.s32.totalorder %v3145_v59, %v3156_v58 }
  0x66   : > { %5360 = vst [vmem:[#allocation89_spill] sm:$0xff] %v3131_v53  ;;  %v3148_v53 = vadd.s32 %v2521_v5, %v429_v49  ;;  %v3154_v48 = vadd.s32 %v2521_v5, %v431_v50  ;;  %v180_v50 = vld [vmem:[%s2508_s27 + $0x40] sm:$0xff]  ;;  %v436_v56 = vadd.s32 96, %v2513_v2  ;;  %v3364_v42 = vadd.s32 %v2521_v5, %v3142_v57 }
  0x67   : > { %5361 = vst [vmem:[#allocation90_spill] sm:$0xff] %v3139_v51  ;;  %v5362_v51 = vld [vmem:[#allocation31_spill] sm:$0xff]  ;;  %vm683_vm9 = vcmp.lt.s32.totalorder %v3151_v1, %v3156_v58  ;;  %v1060_v62 = vsel %vm681_vm10, %v180_v50, -inf  ;;  %vm685_vm15 = vcmp.lt.s32.totalorder %v3159_v55, %v3156_v58  ;;  %vm5199_vm12 = vcmp.lt.s32.totalorder %v3377_v39, %v3156_v58 }
  0x68   : > { %vm682_vm11 = vcmp.lt.s32.totalorder %v3148_v53, %v3156_v58  ;;  %v184_v49 = vld [vmem:[%s2508_s27 + $0x60] sm:$0xff]  ;;  %vm684_vm14 = vcmp.lt.s32.totalorder %v3154_v48, %v3156_v58  ;;  %vm5200_vm13 = vcmp.lt.s32.totalorder %v3364_v42, %v3156_v58  ;;  %v195_v53 = vld [vmem:[%s2508_s27 + $0xb8] sm:$0xff] }
  0x69   : > { %v1062_v52 = vsel %vm682_vm11, %v182_v46, -inf  ;;  %v1064_v41 = vsel %vm683_vm9, %v184_v49, -inf  ;;  %v1066_v50 = vsel %vm684_vm14, %v186_v47, -inf  ;;  %v437_v46 = vadd.s32 104, %v2513_v2  ;;  %v192_v49 = vld [vmem:[%s2508_s27 + $0xa0] sm:$0xff] }
  0x6a   : > { %v3387_v47 = vadd.s32 %v2521_v5, %v436_v56  ;;  %v1072_v37 = vsel %vm5200_vm13, %v192_v49, -inf }
  0x6c   : > { %vm5193_vm8 = vcmp.lt.s32.totalorder %v3387_v47, %v3156_v58 }
  0x6e   : > { %v5401_v44 = vld [vmem:[#allocation90_spill] sm:$0xff] }
  0x6f   : > { %v3350_v45 = vadd.s32 %v2521_v5, %v5401_v44  ;;  %v1304_v44 = vmax.f32 %v1062_v52, %v1060_v62  ;;  %v1068_v52 = vsel %vm685_vm15, %v188_v43, -inf  ;;  %v438_v62 = vadd.s32 112, %v2513_v2 }
  0x70   : > { %v3397_v43 = vadd.s32 %v2521_v5, %v437_v46 }
  0x71   : > { %vm5204_vm7 = vcmp.lt.s32.totalorder %v3350_v45, %v3156_v58  ;;  %v1305_v57 = vmax.f32 %v1064_v41, %v1304_v44  ;;  %v194_v41 = vld [vmem:[%s2508_s27 + $0xb0] sm:$0xff]  ;;  %v439_v44 = vadd.s32 120, %v2513_v2 }
  0x72   : > { %v1070_v38 = vsel %vm5204_vm7, %v190_v40, -inf  ;;  %v3407_v40 = vadd.s32 %v2521_v5, %v438_v62  ;;  %v1074_v36 = vsel %vm5199_vm12, %v194_v41, -inf  ;;  %vm5192_vm6 = vcmp.lt.s32.totalorder %v3397_v43, %v3156_v58 }
  0x73   : > { %v1306_v54 = vmax.f32 %v1066_v50, %v1305_v57  ;;  %v196_v50 = vld [vmem:[%s2508_s27 + $0xc0] sm:$0xff]  ;;  %v440_v57 = vadd.s32 128, %v2513_v2  ;;  %v3417_v49 = vadd.s32 %v2521_v5, %v439_v44 }
  0x74   : > { %v1076_v35 = vsel %vm5193_vm8, %v196_v50, -inf  ;;  %vm5191_vm5 = vcmp.lt.s32.totalorder %v3407_v40, %v3156_v58 }
  0x75   : > { %v1307_v56 = vmax.f32 %v1068_v52, %v1306_v54  ;;  %v198_v52 = vld [vmem:[%s2508_s27 + $0xd0] sm:$0xff]  ;;  %v441_v54 = vadd.s32 136, %v2513_v2  ;;  %v3427_v41 = vadd.s32 %v2521_v5, %v440_v57  ;;  %vm5190_vm4 = vcmp.lt.s32.totalorder %v3417_v49, %v3156_v58 }
  0x76   : > { %v1078_v34 = vsel %vm5192_vm6, %v198_v52, -inf }
  0x77   : > { %v1308_v46 = vmax.f32 %v1070_v38, %v1307_v56  ;;  %v200_v38 = vld [vmem:[%s2508_s27 + $0xe0] sm:$0xff]  ;;  %v442_v56 = vadd.s32 144, %v2513_v2  ;;  %v3437_v50 = vadd.s32 %v2521_v5, %v441_v54  ;;  %vm5140_vm3 = vcmp.lt.s32.totalorder %v3427_v41, %v3156_v58 }
  0x78   : > { %v1080_v33 = vsel %vm5191_vm5, %v200_v38, -inf  ;;  %vm679_vm5 = vcmp.lt.s32.totalorder %v552_v13, %v3156_v58 }
  0x79   : > { %v1309_v62 = vmax.f32 %v1072_v37, %v1308_v46  ;;  %v202_v37 = vld [vmem:[%s2508_s27 + $0xf0] sm:$0xff]  ;;  %v443_v46 = vadd.s32 152, %v2513_v2  ;;  %v3447_v52 = vadd.s32 %v2521_v5, %v442_v56  ;;  %vm5143_vm2 = vcmp.lt.s32.totalorder %v3437_v50, %v3156_v58 }
  0x7a   : > { %v1082_v32 = vsel %vm5190_vm4, %v202_v37, -inf  ;;  %vm678_vm4 = vcmp.lt.s32.totalorder %v551_v14, %v3156_v58 }
  0x7b   : > { %v1310_v44 = vmax.f32 %v1074_v36, %v1309_v62  ;;  %v204_v36 = vld [vmem:[%s2508_s27 + $0x100] sm:$0xff]  ;;  %v444_v62 = vadd.s32 160, %v2513_v2  ;;  %v3457_v38 = vadd.s32 %v2521_v5, %v443_v46  ;;  %vm5146_vm1 = vcmp.lt.s32.totalorder %v3447_v52, %v3156_v58 }
  0x7c   : > { %v1084_v31 = vsel %vm5140_vm3, %v204_v36, -inf }
  0x7d   : > { %v1311_v57 = vmax.f32 %v1076_v35, %v1310_v44  ;;  %v206_v35 = vld [vmem:[%s2508_s27 + $0x110] sm:$0xff]  ;;  %v445_v44 = vadd.s32 168, %v2513_v2  ;;  %v3467_v37 = vadd.s32 %v2521_v5, %v444_v62  ;;  %vm5149_vm3 = vcmp.lt.s32.totalorder %v3457_v38, %v3156_v58 }
  0x7e   : > { %v1086_v30 = vsel %vm5143_vm2, %v206_v35, -inf }
  0x7f   : > { %v1312_v54 = vmax.f32 %v1078_v34, %v1311_v57  ;;  %v208_v34 = vld [vmem:[%s2508_s27 + $0x120] sm:$0xff]  ;;  %v446_v57 = vadd.s32 176, %v2513_v2  ;;  %v3477_v36 = vadd.s32 %v2521_v5, %v445_v44  ;;  %vm5152_vm2 = vcmp.lt.s32.totalorder %v3467_v37, %v3156_v58 }
  0x80   : > { %v1088_v29 = vsel %vm5146_vm1, %v208_v34, -inf }
  0x81   : > { %v1313_v56 = vmax.f32 %v1080_v33, %v1312_v54  ;;  %v210_v33 = vld [vmem:[%s2508_s27 + $0x130] sm:$0xff]  ;;  %v447_v54 = vadd.s32 184, %v2513_v2  ;;  %v3487_v35 = vadd.s32 %v2521_v5, %v446_v57  ;;  %vm5155_vm1 = vcmp.lt.s32.totalorder %v3477_v36, %v3156_v58 }
  0x82   : > { %v1090_v28 = vsel %vm5149_vm3, %v210_v33, -inf }
  0x83   : > { %v1314_v46 = vmax.f32 %v1082_v32, %v1313_v56  ;;  %v212_v32 = vld [vmem:[%s2508_s27 + $0x140] sm:$0xff]  ;;  %v448_v56 = vadd.s32 192, %v2513_v2  ;;  %v3497_v34 = vadd.s32 %v2521_v5, %v447_v54  ;;  %vm5162_vm3 = vcmp.lt.s32.totalorder %v3487_v35, %v3156_v58 }
  0x84   : > { %v1092_v27 = vsel %vm5152_vm2, %v212_v32, -inf }
  0x85   : > { %v1315_v62 = vmax.f32 %v1084_v31, %v1314_v46  ;;  %v214_v31 = vld [vmem:[%s2508_s27 + $0x150] sm:$0xff]  ;;  %v449_v46 = vadd.s32 200, %v2513_v2  ;;  %v3507_v33 = vadd.s32 %v2521_v5, %v448_v56  ;;  %vm5169_vm2 = vcmp.lt.s32.totalorder %v3497_v34, %v3156_v58 }
  0x86   : > { %v1094_v26 = vsel %vm5155_vm1, %v214_v31, -inf }
  0x87   : > { %v1316_v44 = vmax.f32 %v1086_v30, %v1315_v62  ;;  %v216_v30 = vld [vmem:[%s2508_s27 + $0x160] sm:$0xff]  ;;  %v450_v62 = vadd.s32 208, %v2513_v2  ;;  %v3517_v32 = vadd.s32 %v2521_v5, %v449_v46  ;;  %vm5178_vm1 = vcmp.lt.s32.totalorder %v3507_v33, %v3156_v58 }
  0x88   : > { %v1096_v25 = vsel %vm5162_vm3, %v216_v30, -inf  ;;  %v222_v30 = vld [vmem:[%s2508_s27 + $0x190] sm:$0xff] }
  0x89   : > { %v1317_v57 = vmax.f32 %v1088_v29, %v1316_v44  ;;  %v218_v29 = vld [vmem:[%s2508_s27 + $0x170] sm:$0xff]  ;;  %v451_v44 = vadd.s32 216, %v2513_v2  ;;  %v3527_v31 = vadd.s32 %v2521_v5, %v450_v62  ;;  %vm5187_vm3 = vcmp.lt.s32.totalorder %v3517_v32, %v3156_v58 }
  0x8b   : > { %v1318_v54 = vmax.f32 %v1090_v28, %v1317_v57  ;;  %v220_v28 = vld [vmem:[%s2508_s27 + $0x180] sm:$0xff]  ;;  %v452_v57 = vadd.s32 224, %v2513_v2  ;;  %v3539_v22 = vadd.s32 %v2521_v5, %v451_v44  ;;  %v455_v44 = vadd.s32 248, %v2513_v2 }
  0x8d   : > { %v1319_v56 = vmax.f32 %v1092_v27, %v1318_v54  ;;  %v1098_v27 = vsel %vm5169_vm2, %v218_v29, -inf  ;;  %v453_v54 = vadd.s32 232, %v2513_v2  ;;  %5402 = vst [vmem:[#allocation31_spill] sm:$0xff] %v3539_v22  ;;  %v1100_v29 = vsel %vm5178_vm1, %v220_v28, -inf }
  0x8e   : > { %v3555_v19 = vadd.s32 %v2521_v5, %v452_v57  ;;  %vm5188_vm2 = vcmp.lt.s32.totalorder %v3527_v31, %v3156_v58  ;;  %v1102_v28 = vsel %vm5187_vm3, %v222_v30, -inf  ;;  %vm5189_vm1 = vcmp.lt.s32.totalorder %v3539_v22, %v3156_v58  ;;  %v236_v22 = vld [vmem:[%s2508_s27 + $0x200] sm:$0xff] }
  0x8f   : > { %v1320_v46 = vmax.f32 %v1094_v26, %v1319_v56  ;;  %v427_v26 = vadd.s32 24, %v2513_v2  ;;  %v454_v56 = vadd.s32 240, %v2513_v2  ;;  %v3568_v57 = vadd.s32 %v2521_v5, %v453_v54 }
  0x90   : > { %5403 = vst [vmem:[#allocation33_spill] sm:$0xff] %v3555_v19  ;;  %v1104_v30 = vsel %vm5188_vm2, %v224_v20, -inf  ;;  %vm5198_vm3 = vcmp.lt.s32.totalorder %v3555_v19, %v3156_v58  ;;  %v3586_v24 = vadd.s32 %v2521_v5, %v455_v44  ;;  %v3592_v20 = vadd.s32 %v2521_v5, %v457_v18 }
  0x91   : > { %v1321_v62 = vmax.f32 %v1096_v25, %v1320_v46  ;;  %v456_v46 = vadd.s32 256, %v2513_v2  ;;  %5404 = vst [vmem:[#allocation90_spill] sm:$0xff] %v3568_v57  ;;  %v553_v54 = vadd.s32 %v2521_v5, %v427_v26  ;;  %v3581_v11 = vadd.s32 %v2521_v5, %v454_v56  ;;  %v172_v56 = vld [vmem:[%s2508_s27] sm:$0xff] }
  0x92   : > { %v1106_v26 = vsel %vm5189_vm1, %v226_v16, -inf  ;;  %v3603_v44 = vadd.s32 %v2521_v5, %v459_v15  ;;  %vm5217_vm2 = vcmp.lt.s32.totalorder %v3568_v57, %v3156_v58  ;;  %vm677_vm1 = vcmp.lt.s32.totalorder %v3547_v21, %v3156_v58  ;;  %v189_v57 = vld [vmem:[%s2508_s27 + $0x88] sm:$0xff] }
  0x93   : > { %v1322_v25 = vmax.f32 %v1098_v27, %v1321_v62  ;;  %v460_v62 = vadd.s32 288, %v2513_v2  ;;  %v3589_v23 = vadd.s32 %v2521_v5, %v456_v46  ;;  %v173_v46 = vld [vmem:[%s2508_s27 + $0x8] sm:$0xff]  ;;  %v1108_v15 = vsel %vm5198_vm3, %v228_v12, -inf }
  0x94   : > { %vm680_vm6 = vcmp.lt.s32.totalorder %v553_v54, %v3156_v58  ;;  %vm707_vm8 = vcmp.lt.s32.totalorder %v3581_v11, %v3156_v58  ;;  %vm708_vm3 = vcmp.lt.s32.totalorder %v3586_v24, %v3156_v58  ;;  %vm710_vm13 = vcmp.lt.s32.totalorder %v3592_v20, %v3156_v58  ;;  %v197_v54 = vld [vmem:[%s2508_s27 + $0xc8] sm:$0xff] }
  0x95   : > { %v1323_v27 = vmax.f32 %v1100_v29, %v1322_v25  ;;  %v230_v29 = vld [vmem:[%s2508_s27 + $0x1d0] sm:$0xff]  ;;  %v3600_v25 = vadd.s32 %v2521_v5, %v458_v17  ;;  %v3611_v16 = vadd.s32 %v2521_v5, %v460_v62  ;;  %v176_v17 = vld [vmem:[%s2508_s27 + $0x20] sm:$0xff]  ;;  %vm709_vm12 = vcmp.lt.s32.totalorder %v3589_v23, %v3156_v58 }
  0x96   : > { %v178_v62 = vld [vmem:[%s2508_s27 + $0x30] sm:$0xff]  ;;  %v1110_v12 = vsel %vm5217_vm2, %v230_v29, -inf  ;;  %vm712_vm7 = vcmp.lt.s32.totalorder %v3603_v44, %v3156_v58  ;;  %v3648_v7 = vsel %vm677_vm1, %v172_v56, -inf  ;;  %v1053_v29 = vsel %vm677_vm1, %v173_v46, -inf }
  0x97   : > { %v1324_v2 = vmax.f32 %v1102_v28, %v1323_v27  ;;  %v174_v28 = vld [vmem:[%s2508_s27 + $0x10] sm:$0xff]  ;;  %v175_v27 = vld [vmem:[%s2508_s27 + $0x18] sm:$0xff]  ;;  %vm711_vm0 = vcmp.lt.s32.totalorder %v3600_v25, %v3156_v58  ;;  %5405 = vst [vmem:[#allocation91_spill] sm:$0xff] %v3648_v7  ;;  %vm713_vm2 = vcmp.lt.s32.totalorder %v3611_v16, %v3156_v58  ;;  %v3670_v21 = vsel %vm679_vm5, %v176_v17, -inf }
  0x98   : > { %v3657_v63 = vsel %vm678_vm4, %v174_v28, -inf  ;;  %v1055_v19 = vsel %vm678_vm4, %v175_v27, -inf  ;;  %v191_v7 = vld [vmem:[%s2508_s27 + $0x98] sm:$0xff]  ;;  %v3676_v14 = vsel %vm680_vm6, %v178_v62, -inf  ;;  %v193_v27 = vld [vmem:[%s2508_s27 + $0xa8] sm:$0xff]  ;;  %v1114_v17 = vsel %vm708_vm3, %v234_v8, -inf }
  0x99   : > { %v1325_v18 = vmax.f32 %v1104_v30, %v1324_v2  ;;  %v177_v30 = vld [vmem:[%s2508_s27 + $0x28] sm:$0xff]  ;;  %v232_v2 = vld [vmem:[%s2508_s27 + $0x1e0] sm:$0xff]  ;;  %vm5406_vm1 = vcmp.lt.s32.totalorder %v3350_v45, %v3156_v58  ;;  %v1116_v1 = vsel %vm709_vm12, %v236_v22, -inf  ;;  %vm5407_vm4 = vcmask 588800   ;;  %v199_v62 = vld [vmem:[%s2508_s27 + $0xd8] sm:$0xff] }
  0x9a   : > { %v1112_v56 = vsel %vm707_vm8, %v232_v2, -inf  ;;  %v1057_v46 = vsel %vm679_vm5, %v177_v30, -inf  ;;  %v1059_v2 = vsel %vm680_vm6, %v179_v10, -inf  ;;  %v1067_v10 = vsel %vm684_vm14, %v187_v3, -inf  ;;  %vm5408_vm5 = vmmov %vm5407_vm4  ;;  %v240_v30 = vld [vmem:[%s2508_s27 + $0x220] sm:$0xff] }
  0x9b   : > { %v1326_v5 = vmax.f32 %v1106_v26, %v1325_v18  ;;  %v183_v26 = vld [vmem:[%s2508_s27 + $0x58] sm:$0xff]  ;;  %v185_v18 = vld [vmem:[%s2508_s27 + $0x68] sm:$0xff]  ;;  %v1071_v8 = vsel %vm5406_vm1, %v191_v7, -inf  ;;  %v1427_v48 = vsel %vm5407_vm4, %v1053_v29, -inf  ;;  %v1428_v3 = vsel %vm5408_vm5, %v1055_v19, -inf  ;;  %vm5413_vm14 = vmmov %vm5407_vm4 }
  0x9c   : > { %v1063_v13 = vsel %vm682_vm11, %v183_v26, -inf  ;;  %vm5409_vm6 = vcmp.lt.s32.totalorder %v3364_v42, %v3156_v58  ;;  %vm5412_vm11 = vmmov %vm5407_vm4  ;;  %v201_v42 = vld [vmem:[%s2508_s27 + $0xe8] sm:$0xff]  ;;  %vm5415_vm1 = vcmp.lt.s32.totalorder %v3387_v47, %v3156_v58 }
  0x9d   : > { %v1327_v6 = vmax.f32 %v1108_v15, %v1326_v5  ;;  %v238_v15 = vld [vmem:[%s2508_s27 + $0x210] sm:$0xff]  ;;  %v1061_v5 = vsel %vm681_vm10, %v181_v9, -inf  ;;  %v1069_v9 = vsel %vm685_vm15, %v189_v57, -inf  ;;  %v1073_v55 = vsel %vm5409_vm6, %v193_v27, -inf  ;;  %vm5411_vm10 = vmmov %vm5407_vm4  ;;  %v203_v27 = vld [vmem:[%s2508_s27 + $0xf8] sm:$0xff] }
  0x9e   : > { %v1118_v45 = vsel %vm710_vm13, %v238_v15, -inf  ;;  %v1433_v19 = vsel %vm5412_vm11, %v1061_v5, -inf  ;;  %v1435_v26 = vsel %vm5413_vm14, %v1063_v13, -inf  ;;  %vm5414_vm15 = vcmp.lt.s32.totalorder %v3377_v39, %v3156_v58  ;;  %vm5416_vm5 = vmmov %vm5407_vm4  ;;  %v205_v13 = vld [vmem:[%s2508_s27 + $0x108] sm:$0xff] }
  0x9f   : > { %v1328_v28 = vmax.f32 %v1110_v12, %v1327_v6  ;;  %v1065_v6 = vsel %vm683_vm9, %v185_v18, -inf  ;;  %vm5410_vm9 = vmmov %vm5407_vm4  ;;  %v1431_v12 = vsel %vm5411_vm10, %v1059_v2, -inf  ;;  %v242_v18 = vld [vmem:[%s2508_s27 + $0x230] sm:$0xff]  ;;  %v1075_v29 = vsel %vm5414_vm15, %v195_v53, -inf }
  0xa0   : > { %v1429_v7 = vsel %vm5410_vm9, %v1057_v46, -inf  ;;  %v1120_v15 = vsel %vm711_vm0, %v240_v30, -inf  ;;  %v1437_v5 = vsel %vm5407_vm4, %v1065_v6, -inf  ;;  %v1439_v39 = vsel %vm5416_vm5, %v1067_v10, -inf  ;;  %vm5418_vm9 = vmmov %vm5407_vm4  ;;  %v246_v30 = vld [vmem:[%s2508_s27 + $0x250] sm:$0xff] }
  0xa1   : > { %v1329_v59 = vmax.f32 %v1112_v56, %v1328_v28  ;;  %v1430_v22 = vmax.f32 %v1427_v48, %v1429_v7  ;;  %v1077_v56 = vsel %vm5415_vm1, %v197_v54, -inf  ;;  %v1432_v28 = vmax.f32 %v1428_v3, %v1431_v12  ;;  %vm5420_vm11 = vmmov %vm5407_vm4  ;;  %v209_v3 = vld [vmem:[%s2508_s27 + $0x128] sm:$0xff]  ;;  %v211_v7 = vld [vmem:[%s2508_s27 + $0x138] sm:$0xff] }
  0xa2   : > { %vm5417_vm6 = vcmp.lt.s32.totalorder %v3397_v43, %v3156_v58  ;;  %v1441_v54 = vsel %vm5418_vm9, %v1069_v9, -inf  ;;  %vm5419_vm10 = vcmp.lt.s32.totalorder %v3407_v40, %v3156_v58  ;;  %v1122_v6 = vsel %vm712_vm7, %v242_v18, -inf  ;;  %vm5422_vm15 = vmmov %vm5407_vm4  ;;  %v213_v12 = vld [vmem:[%s2508_s27 + $0x148] sm:$0xff]  ;;  %v215_v18 = vld [vmem:[%s2508_s27 + $0x158] sm:$0xff] }
  0xa3   : > { %v1330_v57 = vmax.f32 %v1114_v17, %v1329_v59  ;;  %v1434_v2 = vmax.f32 %v1430_v22, %v1433_v19  ;;  %v244_v17 = vld [vmem:[%s2508_s27 + $0x240] sm:$0xff]  ;;  %v1079_v47 = vsel %vm5417_vm6, %v199_v62, -inf  ;;  %v1436_v53 = vmax.f32 %v1432_v28, %v1435_v26  ;;  %vm5425_vm6 = vmmov %vm5407_vm4 }
  0xa4   : > { %v1081_v48 = vsel %vm5419_vm10, %v201_v42, -inf  ;;  %v1443_v43 = vsel %vm5420_vm11, %v1071_v8, -inf  ;;  %vm5421_vm14 = vcmp.lt.s32.totalorder %v3417_v49, %v3156_v58  ;;  %v1445_v40 = vsel %vm5422_vm15, %v1073_v55, -inf  ;;  %v248_v19 = vld [vmem:[%s2508_s27 + $0x260] sm:$0xff]  ;;  %vm5428_vm11 = vmmov %vm5407_vm4 }
  0xa5   : > { %v1331_v46 = vmax.f32 %v1116_v1, %v1330_v57  ;;  %v207_v1 = vld [vmem:[%s2508_s27 + $0x118] sm:$0xff]  ;;  %v1438_v10 = vmax.f32 %v1434_v2, %v1437_v5  ;;  %v1083_v9 = vsel %vm5421_vm14, %v203_v27, -inf  ;;  %vm5423_vm1 = vcmp.lt.s32.totalorder %v3427_v41, %v3156_v58  ;;  %v217_v27 = vld [vmem:[%s2508_s27 + $0x168] sm:$0xff]  ;;  %vm5430_vm15 = vmmov %vm5407_vm4 }
  0xa6   : > { %v1085_v62 = vsel %vm5423_vm1, %v205_v13, -inf  ;;  %v1124_v8 = vsel %vm713_vm2, %v244_v17, -inf  ;;  %v1447_v49 = vsel %vm5407_vm4, %v1075_v29, -inf  ;;  %vm5424_vm5 = vcmp.lt.s32.totalorder %v3437_v50, %v3156_v58 }
  0xa7   : > { %v1332_v59 = vmax.f32 %v1118_v45, %v1331_v46  ;;  %v1440_v45 = vmax.f32 %v1436_v53, %v1439_v39  ;;  %v1442_v22 = vmax.f32 %v1438_v10, %v1441_v54  ;;  %v1087_v55 = vsel %vm5424_vm5, %v207_v1, -inf  ;;  %v219_v39 = vld [vmem:[%s2508_s27 + $0x178] sm:$0xff]  ;;  %vm5433_vm5 = vmmov %vm5425_vm6  ;;  %v252_v53 = vld [vmem:[%s2508_s27 + $0x280] sm:$0xff] }
  0xa8   : > { %v1449_v41 = vsel %vm5425_vm6, %v1077_v56, -inf  ;;  %vm5426_vm9 = vcmp.lt.s32.totalorder %v3447_v52, %v3156_v58  ;;  %vm5427_vm10 = vcmp.lt.s32.totalorder %v5362_v51, %v3156_v58  ;;  %v1451_v50 = vsel %vm5428_vm11, %v1079_v47, -inf }
  0xa9   : > { %v1333_v57 = vmax.f32 %v1120_v15, %v1332_v59  ;;  %v1444_v42 = vmax.f32 %v1440_v45, %v1443_v43  ;;  %v1089_v46 = vsel %vm5426_vm9, %v209_v3, -inf  ;;  %v1126_v29 = vsel %vm5427_vm10, %v246_v30, -inf  ;;  %v250_v15 = vld [vmem:[%s2508_s27 + $0x270] sm:$0xff]  ;;  %v221_v59 = vld [vmem:[%s2508_s27 + $0x188] sm:$0xff]  ;;  %vm5435_vm9 = vmmov %vm5433_vm5 }
  0xaa   : > { %v1446_v28 = vmax.f32 %v1442_v22, %v1445_v40  ;;  %vm5429_vm14 = vcmp.lt.s32.totalorder %v3457_v38, %v3156_v58  ;;  %v1453_v52 = vsel %vm5430_vm15, %v1081_v48, -inf  ;;  %vm5431_vm1 = vcmp.lt.s32.totalorder %v3467_v37, %v3156_v58  ;;  %v225_v30 = vld [vmem:[%s2508_s27 + $0x1a8] sm:$0xff] }
  0xab   : > { %v1334_v26 = vmax.f32 %v1122_v6, %v1333_v57  ;;  %v1091_v56 = vsel %vm5429_vm14, %v211_v7, -inf  ;;  %v1448_v5 = vmax.f32 %v1444_v42, %v1447_v49  ;;  %v1093_v13 = vsel %vm5431_vm1, %v213_v12, -inf  ;;  %v223_v6 = vld [vmem:[%s2508_s27 + $0x198] sm:$0xff]  ;;  %vm5438_vm14 = vmmov %vm5433_vm5  ;;  %v229_v49 = vld [vmem:[%s2508_s27 + $0x1c8] sm:$0xff] }
  0xac   : > { %vm5432_vm4 = vcmp.lt.s32.totalorder %v5363_v60, %v3156_v58  ;;  %v1450_v47 = vmax.f32 %v1446_v28, %v1449_v41  ;;  %v1455_v38 = vsel %vm5433_vm5, %v1083_v9, -inf  ;;  %vm5434_vm6 = vcmp.lt.s32.totalorder %v3477_v36, %v3156_v58  ;;  %v254_v9 = vld [vmem:[%s2508_s27 + $0x290] sm:$0xff]  ;;  %vm5440_vm1 = vmmov %vm5433_vm5  ;;  %v227_v7 = vld [vmem:[%s2508_s27 + $0x1b8] sm:$0xff] }
  0xad   : > { %v1335_v2 = vmax.f32 %v1124_v8, %v1334_v26  ;;  %v1128_v17 = vsel %vm5432_vm4, %v248_v19, -inf  ;;  %v1095_v54 = vsel %vm5434_vm6, %v215_v18, -inf  ;;  %v1452_v48 = vmax.f32 %v1448_v5, %v1451_v50  ;;  %vm5443_vm6 = vmmov %vm5440_vm1  ;;  %v256_v12 = vld [vmem:[%s2508_s27 + $0x2a0] sm:$0xff]  ;;  %v231_v42 = vld [vmem:[%s2508_s27 + $0x1d8] sm:$0xff] }
  0xae   : > { %v1457_v37 = vsel %vm5435_vm9, %v1085_v62, -inf  ;;  %vm5436_vm10 = vcmp.lt.s32.totalorder %v3487_v35, %v3156_v58  ;;  %vm5437_vm11 = vcmp.lt.s32.totalorder %v2788_v0, %v3156_v58  ;;  %v1454_v3 = vmax.f32 %v1450_v47, %v1453_v52  ;;  %v258_v28 = vld [vmem:[%s2508_s27 + $0x2b0] sm:$0xff]  ;;  %v5449_v50 = vld [vmem:[#allocation31_spill] sm:$0xff] }
  0xaf   : > { %v1336_v1 = vmax.f32 %v1126_v29, %v1335_v2  ;;  %v1097_v10 = vsel %vm5436_vm10, %v217_v27, -inf  ;;  %v1130_v43 = vsel %vm5437_vm11, %v250_v15, -inf  ;;  %v1459_v36 = vsel %vm5438_vm14, %v1087_v55, -inf  ;;  %vm5445_vm10 = vmmov %vm5440_vm1  ;;  %v233_v29 = vld [vmem:[%s2508_s27 + $0x1e8] sm:$0xff]  ;;  %v235_v2 = vld [vmem:[%s2508_s27 + $0x1f8] sm:$0xff] }
  0xb0   : > { %vm5439_vm15 = vcmp.lt.s32.totalorder %v3497_v34, %v3156_v58  ;;  %v1456_v40 = vmax.f32 %v1452_v48, %v1455_v38  ;;  %v1461_v35 = vsel %vm5440_vm1, %v1089_v46, -inf  ;;  %vm5441_vm4 = vcmp.lt.s32.totalorder %v3507_v33, %v3156_v58  ;;  %v5452_v5 = vld [vmem:[#allocation33_spill] sm:$0xff]  ;;  %v237_v38 = vld [vmem:[%s2508_s27 + $0x208] sm:$0xff] }
  0xb1   : > { %v1099_v57 = vsel %vm5439_vm15, %v219_v39, -inf  ;;  %v1337_v45 = vmax.f32 %v1128_v17, %v1336_v1  ;;  %v1101_v62 = vsel %vm5441_vm4, %v221_v59, -inf  ;;  %vm5442_vm5 = vcmp.lt.s32.totalorder %v2795_v4, %v3156_v58  ;;  %vm5448_vm15 = vmmov %vm5440_vm1  ;;  %v5454_v39 = vld [vmem:[#allocation36_spill] sm:$0xff]  ;;  %v260_v59 = vld [vmem:[%s2508_s27 + $0x2c0] sm:$0xff] }
  0xb2   : > { %v1132_v8 = vsel %vm5442_vm5, %v252_v53, -inf  ;;  %v1458_v22 = vmax.f32 %v1454_v3, %v1457_v37  ;;  %v1463_v34 = vsel %vm5443_vm6, %v1091_v56, -inf  ;;  %vm5444_vm9 = vcmp.lt.s32.totalorder %v3517_v32, %v3156_v58  ;;  %vm5451_vm4 = vmmov %vm5443_vm6  ;;  %v5457_v53 = vld [vmem:[#allocation90_spill] sm:$0xff] }
  0xb3   : > { %v1103_v19 = vsel %vm5444_vm9, %v223_v6, -inf  ;;  %v1338_v55 = vmax.f32 %v1130_v43, %v1337_v45  ;;  %v1460_v26 = vmax.f32 %v1456_v40, %v1459_v36  ;;  %v1465_v33 = vsel %vm5445_vm10, %v1093_v13, -inf  ;;  %vm5456_vm9 = vmmov %vm5451_vm4  ;;  %v239_v6 = vld [vmem:[%s2508_s27 + $0x218] sm:$0xff]  ;;  %v5460_v43 = vld [vmem:[#allocation37_spill] sm:$0xff] }
  0xb4   : > { %vm5446_vm11 = vcmp.lt.s32.totalorder %v3527_v31, %v3156_v58  ;;  %vm5447_vm14 = vcmp.lt.s32.totalorder %v2799_v61, %v3156_v58  ;;  %v1462_v46 = vmax.f32 %v1458_v22, %v1461_v35  ;;  %v1467_v32 = vsel %vm5448_vm15, %v1095_v54, -inf  ;;  %vm5462_vm15 = vmmov %vm5451_vm4 }
  0xb5   : > { %v1105_v41 = vsel %vm5446_vm11, %v225_v30, -inf  ;;  %v1134_v18 = vsel %vm5447_vm14, %v254_v9, -inf  ;;  %vm5450_vm1 = vcmp.lt.s32.totalorder %v5449_v50, %v3156_v58  ;;  %v1339_v15 = vmax.f32 %v1132_v8, %v1338_v55  ;;  %vm5459_vm11 = vmmov %vm5451_vm4  ;;  %v241_v9 = vld [vmem:[%s2508_s27 + $0x228] sm:$0xff]  ;;  %v5464_v8 = vld [vmem:[#allocation38_spill] sm:$0xff] }
  0xb6   : > { %v1107_v27 = vsel %vm5450_vm1, %v227_v7, -inf  ;;  %v1464_v56 = vmax.f32 %v1460_v26, %v1463_v34  ;;  %v1469_v31 = vsel %vm5451_vm4, %v1097_v10, -inf  ;;  %vm5453_vm5 = vcmp.lt.s32.totalorder %v5452_v5, %v3156_v58  ;;  %vm5463_vm1 = vmmov %vm5451_vm4  ;;  %v243_v7 = vld [vmem:[%s2508_s27 + $0x238] sm:$0xff] }
  0xb7   : > { %v1109_v52 = vsel %vm5453_vm5, %v229_v49, -inf  ;;  %vm5455_vm6 = vcmp.lt.s32.totalorder %v5454_v39, %v3156_v58  ;;  %v1466_v17 = vmax.f32 %v1462_v46, %v1465_v33  ;;  %v1471_v47 = vsel %vm5456_vm9, %v1099_v57, -inf  ;;  %v262_v57 = vld [vmem:[%s2508_s27 + $0x2d0] sm:$0xff]  ;;  %vm5466_vm4 = vmmov %vm5463_vm1  ;;  %v245_v49 = vld [vmem:[%s2508_s27 + $0x248] sm:$0xff] }
  0xb8   : > { %v1136_v13 = vsel %vm5455_vm6, %v256_v12, -inf  ;;  %vm5458_vm10 = vcmp.lt.s32.totalorder %v5457_v53, %v3156_v58  ;;  %v1340_v1 = vmax.f32 %v1134_v18, %v1339_v15  ;;  %v1468_v48 = vmax.f32 %v1464_v56, %v1467_v32  ;;  %v264_v12 = vld [vmem:[%s2508_s27 + $0x2e0] sm:$0xff]  ;;  %v247_v33 = vld [vmem:[%s2508_s27 + $0x258] sm:$0xff]  ;;  %vm5470_vm5 = vmmov %vm5463_vm1 }
  0xb9   : > { %v1111_v54 = vsel %vm5458_vm10, %v231_v42, -inf  ;;  %v1473_v37 = vsel %vm5459_vm11, %v1101_v62, -inf  ;;  %v1113_v10 = vsel %vm707_vm8, %v233_v29, -inf  ;;  %vm5461_vm14 = vcmp.lt.s32.totalorder %v5460_v43, %v3156_v58  ;;  %v249_v32 = vld [vmem:[%s2508_s27 + $0x268] sm:$0xff]  ;;  %v266_v29 = vld [vmem:[%s2508_s27 + $0x2f0] sm:$0xff]  ;;  %v251_v15 = vld [vmem:[%s2508_s27 + $0x278] sm:$0xff] }
  0xba   : > { %v1138_v3 = vsel %vm5461_vm14, %v258_v28, -inf  ;;  %v1470_v36 = vmax.f32 %v1466_v17, %v1469_v31  ;;  %v1475_v30 = vsel %vm5462_vm15, %v1103_v19, -inf  ;;  %v1115_v45 = vsel %vm708_vm3, %v235_v2, -inf  ;;  %vm5467_vm3 = vmmov %vm5463_vm1  ;;  %v5472_v31 = vld [vmem:[#allocation40_spill] sm:$0xff] }
  0xbb   : > { %v1341_v40 = vmax.f32 %v1136_v13, %v1340_v1  ;;  %v1472_v35 = vmax.f32 %v1468_v48, %v1471_v47  ;;  %v1477_v11 = vsel %vm5463_vm1, %v1105_v41, -inf  ;;  %v1117_v62 = vsel %vm709_vm12, %v237_v38, -inf  ;;  %v5468_v41 = vld [vmem:[#allocation39_spill] sm:$0xff]  ;;  %vm5474_vm6 = vmmov %vm5463_vm1 }
  0xbc   : > { %vm5465_vm8 = vcmp.lt.s32.totalorder %v5464_v8, %v3156_v58  ;;  %v1474_v34 = vmax.f32 %v1470_v36, %v1473_v37  ;;  %v1479_v24 = vsel %vm5466_vm4, %v1107_v27, -inf  ;;  %v1119_v19 = vsel %vm710_vm13, %v239_v6, -inf  ;;  %vm5471_vm13 = vmmov %vm5463_vm1  ;;  %v268_v13 = vld [vmem:[%s2508_s27 + $0x300] sm:$0xff]  ;;  %v257_v37 = vld [vmem:[%s2508_s27 + $0x2a8] sm:$0xff] }
  0xbd   : > { %v1140_v22 = vsel %vm5465_vm8, %v260_v59, -inf  ;;  %v1342_v55 = vmax.f32 %v1138_v3, %v1341_v40  ;;  %v1476_v26 = vmax.f32 %v1472_v35, %v1475_v30  ;;  %v1481_v23 = vsel %vm5467_vm3, %v1109_v52, -inf  ;;  %v253_v52 = vld [vmem:[%s2508_s27 + $0x288] sm:$0xff]  ;;  %vm5476_vm9 = vmmov %vm5463_vm1  ;;  %v255_v59 = vld [vmem:[%s2508_s27 + $0x298] sm:$0xff] }
  0xbe   : > { %v1121_v42 = vsel %vm711_vm0, %v241_v9, -inf  ;;  %vm5469_vm12 = vcmp.lt.s32.totalorder %v5468_v41, %v3156_v58  ;;  %v1478_v46 = vmax.f32 %v1474_v34, %v1477_v11  ;;  %v1483_v20 = vsel %vm5470_vm5, %v1111_v54, -inf  ;;  %v5478_v54 = vld [vmem:[#allocation41_spill] sm:$0xff]  ;;  %vm5480_vm11 = vmmov %vm5463_vm1  ;;  %v259_v30 = vld [vmem:[%s2508_s27 + $0x2b8] sm:$0xff] }
  0xbf   : > { %v1142_v18 = vsel %vm5469_vm12, %v262_v57, -inf  ;;  %v1123_v28 = vsel %vm712_vm7, %v243_v7, -inf  ;;  %v1343_v50 = vmax.f32 %v1140_v22, %v1342_v55  ;;  %v1480_v27 = vmax.f32 %v1476_v26, %v1479_v24  ;;  %v270_v6 = vld [vmem:[%s2508_s27 + $0x310] sm:$0xff]  ;;  %vm5482_vm15 = vmmov %vm5463_vm1  ;;  %v5484_v57 = vld [vmem:[#allocation42_spill] sm:$0xff] }
  0xc0   : > { %v1485_v25 = vsel %vm5471_vm13, %v1113_v10, -inf  ;;  %v1125_v56 = vsel %vm713_vm2, %v245_v49, -inf  ;;  %vm5473_vm0 = vcmp.lt.s32.totalorder %v5472_v31, %v3156_v58  ;;  %v1482_v5 = vmax.f32 %v1478_v46, %v1481_v23  ;;  %vm5486_vm4 = vmmov %vm5467_vm3  ;;  %v261_v35 = vld [vmem:[%s2508_s27 + $0x2c8] sm:$0xff]  ;;  %v272_v11 = vld [vmem:[%s2508_s27 + $0x320] sm:$0xff] }
  0xc1   : > { %v1144_v2 = vsel %vm5473_vm0, %v264_v12, -inf  ;;  %v1487_v44 = vsel %vm5474_vm6, %v1115_v45, -inf  ;;  %vm5475_vm7 = vcmp.lt.s32.totalorder %v5362_v51, %v3156_v58  ;;  %v1344_v47 = vmax.f32 %v1142_v18, %v1343_v50  ;;  %vm5488_vm12 = vmmov %vm5486_vm4  ;;  %v263_v34 = vld [vmem:[%s2508_s27 + $0x2d8] sm:$0xff]  ;;  %v5490_v49 = vld [vmem:[#allocation43_spill] sm:$0xff] }
  0xc2   : > { %v1127_v17 = vsel %vm5475_vm7, %v247_v33, -inf  ;;  %v1484_v38 = vmax.f32 %v1480_v27, %v1483_v20  ;;  %v1489_v16 = vsel %vm5476_vm9, %v1117_v62, -inf  ;;  %vm5477_vm2 = vcmp.lt.s32.totalorder %v5363_v60, %v3156_v58  ;;  %vm5492_vm0 = vmmov %vm5486_vm4  ;;  %v265_v55 = vld [vmem:[%s2508_s27 + $0x2e8] sm:$0xff]  ;;  %v274_v26 = vld [vmem:[%s2508_s27 + $0x330] sm:$0xff] }
  0xc3   : > { %v1129_v53 = vsel %vm5477_vm2, %v249_v32, -inf  ;;  %vm5479_vm10 = vcmp.lt.s32.totalorder %v5478_v54, %v3156_v58  ;;  %v1486_v48 = vmax.f32 %v1482_v5, %v1485_v25  ;;  %v1491_v51 = vsel %vm5480_vm11, %v1119_v19, -inf  ;;  %vm5494_vm7 = vmmov %vm5492_vm0  ;;  %v267_v18 = vld [vmem:[%s2508_s27 + $0x2f8] sm:$0xff]  ;;  %v5496_v20 = vld [vmem:[#allocation44_spill] sm:$0xff] }
  0xc4   : > { %v1146_v1 = vsel %vm5479_vm10, %v266_v29, -inf  ;;  %vm5481_vm14 = vcmp.lt.s32.totalorder %v2788_v0, %v3156_v58  ;;  %v1345_v3 = vmax.f32 %v1144_v2, %v1344_v47  ;;  %v1488_v36 = vmax.f32 %v1484_v38, %v1487_v44  ;;  %vm5498_vm10 = vmmov %vm5492_vm0  ;;  %v276_v50 = vld [vmem:[%s2508_s27 + $0x340] sm:$0xff]  ;;  %v5502_v5 = vld [vmem:[#allocation45_spill] sm:$0xff] }
  0xc5   : > { %v1131_v10 = vsel %vm5481_vm14, %v251_v15, -inf  ;;  %v1493_v60 = vsel %vm5482_vm15, %v1121_v42, -inf  ;;  %vm5483_vm1 = vcmp.lt.s32.totalorder %v2795_v4, %v3156_v58  ;;  %vm5485_vm8 = vcmp.lt.s32.totalorder %v5484_v57, %v3156_v58  ;;  %vm5500_vm14 = vmmov %vm5492_vm0 }
  0xc6   : > { %v1133_v9 = vsel %vm5483_vm1, %v253_v52, -inf  ;;  %v1148_v45 = vsel %vm5485_vm8, %v268_v13, -inf  ;;  %v1490_v40 = vmax.f32 %v1486_v48, %v1489_v16  ;;  %v1495_v0 = vsel %vm5486_vm4, %v1123_v28, -inf  ;;  %v269_v28 = vld [vmem:[%s2508_s27 + $0x308] sm:$0xff]  ;;  %vm5504_vm8 = vmmov %vm5492_vm0 }
  0xc7   : > { %vm5487_vm3 = vcmp.lt.s32.totalorder %v2799_v61, %v3156_v58  ;;  %v1346_v62 = vmax.f32 %v1146_v1, %v1345_v3  ;;  %v1492_v22 = vmax.f32 %v1488_v36, %v1491_v51  ;;  %v1497_v4 = vsel %vm5488_vm12, %v1125_v56, -inf  ;;  %v271_v56 = vld [vmem:[%s2508_s27 + $0x318] sm:$0xff]  ;;  %v273_v13 = vld [vmem:[%s2508_s27 + $0x328] sm:$0xff] }
  0xc8   : > { %v1135_v7 = vsel %vm5487_vm3, %v255_v59, -inf  ;;  %vm5489_vm5 = vcmp.lt.s32.totalorder %v5454_v39, %v3156_v58  ;;  %vm5491_vm13 = vcmp.lt.s32.totalorder %v5490_v49, %v3156_v58  ;;  %v1494_v19 = vmax.f32 %v1490_v40, %v1493_v60  ;;  %vm5506_vm3 = vmmov %vm5492_vm0  ;;  %v275_v59 = vld [vmem:[%s2508_s27 + $0x338] sm:$0xff] }
  0xc9   : > { %v1137_v24 = vsel %vm5489_vm5, %v257_v37, -inf  ;;  %v1150_v12 = vsel %vm5491_vm13, %v270_v6, -inf  ;;  %v1499_v61 = vsel %vm5492_vm0, %v1127_v17, -inf  ;;  %vm5493_vm6 = vcmp.lt.s32.totalorder %v5460_v43, %v3156_v58  ;;  %v278_v17 = vld [vmem:[%s2508_s27 + $0x350] sm:$0xff]  ;;  %v5508_v1 = vld [vmem:[#allocation46_spill] sm:$0xff]  ;;  %vm5510_vm13 = vmmov %vm5492_vm0 }
  0xca   : > { %v1139_v23 = vsel %vm5493_vm6, %v259_v30, -inf  ;;  %v1347_v33 = vmax.f32 %v1148_v45, %v1346_v62  ;;  %v1496_v42 = vmax.f32 %v1492_v22, %v1495_v0  ;;  %v1501_v39 = vsel %vm5494_vm7, %v1129_v53, -inf  ;;  %v277_v37 = vld [vmem:[%s2508_s27 + $0x348] sm:$0xff]  ;;  %v280_v6 = vld [vmem:[%s2508_s27 + $0x360] sm:$0xff]  ;;  %vm5512_vm6 = vmmov %vm5506_vm3 }
  0xcb   : > { %vm5495_vm9 = vcmp.lt.s32.totalorder %v5464_v8, %v3156_v58  ;;  %vm5497_vm2 = vcmp.lt.s32.totalorder %v5496_v20, %v3156_v58  ;;  %v1498_v29 = vmax.f32 %v1494_v19, %v1497_v4  ;;  %v1503_v43 = vsel %vm5498_vm10, %v1131_v10, -inf  ;;  %v279_v30 = vld [vmem:[%s2508_s27 + $0x358] sm:$0xff]  ;;  %v5526_v20 = vld [vmem:[#allocation49_spill] sm:$0xff] }
  0xcc   : > { %v1141_v46 = vsel %vm5495_vm9, %v261_v35, -inf  ;;  %v1152_v32 = vsel %vm5497_vm2, %v272_v11, -inf  ;;  %vm5499_vm11 = vcmp.lt.s32.totalorder %v5468_v41, %v3156_v58  ;;  %v1348_v25 = vmax.f32 %v1150_v12, %v1347_v33  ;;  %vm5513_vm7 = vmmov %vm5497_vm2  ;;  %v281_v35 = vld [vmem:[%s2508_s27 + $0x368] sm:$0xff]  ;;  %v282_v11 = vld [vmem:[%s2508_s27 + $0x370] sm:$0xff] }
  0xcd   : > { %v1143_v27 = vsel %vm5499_vm11, %v263_v34, -inf  ;;  %v1500_v15 = vmax.f32 %v1496_v42, %v1499_v61  ;;  %v1505_v8 = vsel %vm5500_vm14, %v1133_v9, -inf  ;;  %vm5501_vm15 = vcmp.lt.s32.totalorder %v5472_v31, %v3156_v58  ;;  %vm5516_vm2 = vmmov %vm5506_vm3  ;;  %v283_v34 = vld [vmem:[%s2508_s27 + $0x378] sm:$0xff] }
  0xce   : > { %v1145_v2 = vsel %vm5501_vm15, %v265_v55, -inf  ;;  %vm5503_vm1 = vcmp.lt.s32.totalorder %v5502_v5, %v3156_v58  ;;  %v1502_v52 = vmax.f32 %v1498_v29, %v1501_v39  ;;  %v1507_v41 = vsel %vm5504_vm8, %v1135_v7, -inf  ;;  %vm5518_vm11 = vmmov %vm5516_vm2  ;;  %v284_v55 = vld [vmem:[%s2508_s27 + $0x380] sm:$0xff] }
  0xcf   : > { %v1154_v44 = vsel %vm5503_vm1, %v274_v26, -inf  ;;  %vm5505_vm4 = vcmp.lt.s32.totalorder %v5478_v54, %v3156_v58  ;;  %v1349_v38 = vmax.f32 %v1152_v32, %v1348_v25  ;;  %v1504_v16 = vmax.f32 %v1500_v15, %v1503_v43  ;;  %vm5517_vm10 = vmmov %vm5503_vm1  ;;  %v285_v26 = vld [vmem:[%s2508_s27 + $0x388] sm:$0xff] }
  0xd0   : > { %v1147_v47 = vsel %vm5505_vm4, %v267_v18, -inf  ;;  %v1509_v31 = vsel %vm5506_vm3, %v1137_v24, -inf  ;;  %vm5507_vm12 = vcmp.lt.s32.totalorder %v5484_v57, %v3156_v58  ;;  %vm5509_vm5 = vcmp.lt.s32.totalorder %v5508_v1, %v3156_v58  ;;  %v5514_v57 = vld [vmem:[#allocation47_spill] sm:$0xff]  ;;  %vm5522_vm1 = vmmov %vm5516_vm2  ;;  %v286_v18 = vld [vmem:[%s2508_s27 + $0x390] sm:$0xff] }
  0xd1   : > { %v1149_v53 = vsel %vm5507_vm12, %v269_v28, -inf  ;;  %v1156_v48 = vsel %vm5509_vm5, %v276_v50, -inf  ;;  %v1506_v51 = vmax.f32 %v1502_v52, %v1505_v8  ;;  %v1511_v54 = vsel %vm5510_vm13, %v1139_v23, -inf  ;;  %vm5519_vm14 = vmmov %vm5509_vm5  ;;  %v287_v28 = vld [vmem:[%s2508_s27 + $0x398] sm:$0xff]  ;;  %v288_v50 = vld [vmem:[%s2508_s27 + $0x3a0] sm:$0xff] }
  0xd2   : > { %vm5511_vm0 = vcmp.lt.s32.totalorder %v5490_v49, %v3156_v58  ;;  %v1350_v3 = vmax.f32 %v1154_v44, %v1349_v38  ;;  %v1508_v36 = vmax.f32 %v1504_v16, %v1507_v41  ;;  %v1513_v60 = vsel %vm5512_vm6, %v1141_v46, -inf  ;;  %v5520_v49 = vld [vmem:[#allocation48_spill] sm:$0xff]  ;;  %vm5524_vm4 = vmmov %vm5522_vm1  ;;  %v5535_v38 = vld [vmem:[#allocation51_spill] sm:$0xff] }
  0xd3   : > { %v1151_v10 = vsel %vm5511_vm0, %v271_v56, -inf  ;;  %v1153_v9 = vsel %vm5513_vm7, %v273_v13, -inf  ;;  %vm5515_vm9 = vcmp.lt.s32.totalorder %v5514_v57, %v3156_v58  ;;  %v1510_v40 = vmax.f32 %v1506_v51, %v1509_v31  ;;  %vm5528_vm5 = vmmov %vm5522_vm1  ;;  %v289_v56 = vld [vmem:[%s2508_s27 + $0x3a8] sm:$0xff]  ;;  %v290_v13 = vld [vmem:[%s2508_s27 + $0x3b0] sm:$0xff] }
  0xd4   : > { %v1158_v45 = vsel %vm5515_vm9, %v278_v17, -inf  ;;  %v1515_v0 = vsel %vm5516_vm2, %v1143_v27, -inf  ;;  %v1155_v7 = vsel %vm5517_vm10, %v275_v59, -inf  ;;  %v1351_v62 = vmax.f32 %v1156_v48, %v1350_v3  ;;  %vm5523_vm8 = vmmov %vm5515_vm9  ;;  %v291_v17 = vld [vmem:[%s2508_s27 + $0x3b8] sm:$0xff]  ;;  %v5539_v48 = vld [vmem:[#allocation52_spill] sm:$0xff] }
  0xd5   : > { %v1512_v22 = vmax.f32 %v1508_v36, %v1511_v54  ;;  %v1517_v4 = vsel %vm5518_vm11, %v1145_v2, -inf  ;;  %v1157_v24 = vsel %vm5519_vm14, %v277_v37, -inf  ;;  %vm5521_vm15 = vcmp.lt.s32.totalorder %v5520_v49, %v3156_v58  ;;  %vm5530_vm0 = vmmov %vm5522_vm1  ;;  %v5531_v2 = vld [vmem:[#allocation50_spill] sm:$0xff]  ;;  %v5544_v57 = vld [vmem:[#allocation53_spill] sm:$0xff] }
  0xd6   : > { %v1160_v12 = vsel %vm5521_vm15, %v280_v6, -inf  ;;  %v1514_v19 = vmax.f32 %v1510_v40, %v1513_v60  ;;  %v1519_v61 = vsel %vm5522_vm1, %v1147_v47, -inf  ;;  %v1352_v23 = vmax.f32 %v1158_v45, %v1351_v62  ;;  %vm5525_vm3 = vmmov %vm5521_vm15  ;;  %v293_v6 = vld [vmem:[%s2508_s27 + $0x3c8] sm:$0xff]  ;;  %v299_v49 = vld [vmem:[%s2508_s27 + $0x3f8] sm:$0xff] }
  0xd7   : > { %v1159_v33 = vsel %vm5523_vm8, %v279_v30, -inf  ;;  %v1516_v42 = vmax.f32 %v1512_v22, %v1515_v0  ;;  %v1521_v39 = vsel %vm5524_vm4, %v1149_v53, -inf  ;;  %v1161_v46 = vsel %vm5525_vm3, %v281_v35, -inf  ;;  %vm5534_vm9 = vmmov %vm5530_vm0  ;;  %v292_v53 = vld [vmem:[%s2508_s27 + $0x3c0] sm:$0xff]  ;;  %v5548_v22 = vld [vmem:[#allocation54_spill] sm:$0xff] }
  0xd8   : > { %vm5527_vm12 = vcmp.lt.s32.totalorder %v5526_v20, %v3156_v58  ;;  %v1518_v29 = vmax.f32 %v1514_v19, %v1517_v4  ;;  %v1523_v43 = vsel %vm5528_vm5, %v1151_v10, -inf  ;;  %v1353_v27 = vmax.f32 %v1160_v12, %v1352_v23  ;;  %vm5537_vm10 = vmmov %vm5530_vm0  ;;  %v294_v10 = vld [vmem:[%s2508_s27 + $0x3d0] sm:$0xff]  ;;  %v5552_v19 = vld [vmem:[#allocation55_spill] sm:$0xff] }
  0xd9   : > { %v1162_v32 = vsel %vm5527_vm12, %v282_v11, -inf  ;;  %vm5529_vm13 = vmmov %vm5527_vm12  ;;  %v1520_v15 = vmax.f32 %v1516_v42, %v1519_v61  ;;  %v1525_v8 = vsel %vm5530_vm0, %v1153_v9, -inf  ;;  %vm5532_vm6 = vcmp.lt.s32.totalorder %v5531_v2, %v3156_v58  ;;  %v295_v9 = vld [vmem:[%s2508_s27 + $0x3d8] sm:$0xff]  ;;  %v296_v11 = vld [vmem:[%s2508_s27 + $0x3e0] sm:$0xff] }
  0xda   : > { %v1163_v25 = vsel %vm5529_vm13, %v283_v34, -inf  ;;  %v1164_v5 = vsel %vm5532_vm6, %v284_v55, -inf  ;;  %vm5533_vm7 = vmmov %vm5532_vm6  ;;  %v1522_v52 = vmax.f32 %v1518_v29, %v1521_v39  ;;  %v1527_v41 = vsel %vm5534_vm9, %v1155_v7, -inf  ;;  %v297_v7 = vld [vmem:[%s2508_s27 + $0x3e8] sm:$0xff] }
  0xdb   : > { %v1165_v44 = vsel %vm5533_vm7, %v285_v26, -inf  ;;  %v1354_v47 = vmax.f32 %v1162_v32, %v1353_v27  ;;  %vm5536_vm2 = vcmp.lt.s32.totalorder %v5535_v38, %v3156_v58  ;;  %v1524_v31 = vmax.f32 %v1520_v15, %v1523_v43  ;;  %vm5541_vm15 = vmmov %vm5530_vm0  ;;  %v301_v23 = vld [vmem:[%s2508_s27 + $0x408] sm:$0xff]  ;;  %v307_v27 = vld [vmem:[%s2508_s27 + $0x438] sm:$0xff] }
  0xdc   : > { %v1166_v16 = vsel %vm5536_vm2, %v286_v18, -inf  ;;  %v1529_v59 = vsel %vm5537_vm10, %v1157_v24, -inf  ;;  %vm5538_vm11 = vmmov %vm5536_vm2  ;;  %vm5540_vm14 = vcmp.lt.s32.totalorder %v5539_v48, %v3156_v58  ;;  %v1526_v54 = vmax.f32 %v1522_v52, %v1525_v8  ;;  %v5557_v20 = vld [vmem:[#allocation56_spill] sm:$0xff]  ;;  %v5561_v15 = vld [vmem:[#allocation57_spill] sm:$0xff] }
  0xdd   : > { %v1167_v1 = vsel %vm5538_vm11, %v287_v28, -inf  ;;  %v1168_v51 = vsel %vm5540_vm14, %v288_v50, -inf  ;;  %v1531_v37 = vsel %vm5541_vm15, %v1159_v33, -inf  ;;  %v1355_v3 = vmax.f32 %v1164_v5, %v1354_v47  ;;  %vm5542_vm1 = vmmov %vm5540_vm14  ;;  %v303_v33 = vld [vmem:[%s2508_s27 + $0x418] sm:$0xff]  ;;  %v305_v50 = vld [vmem:[%s2508_s27 + $0x428] sm:$0xff] }
  0xde   : > { %v1169_v36 = vsel %vm5542_vm1, %v289_v56, -inf  ;;  %v1528_v60 = vmax.f32 %v1524_v31, %v1527_v41  ;;  %vm5543_vm8 = vmmov %vm5530_vm0  ;;  %vm5545_vm4 = vcmp.lt.s32.totalorder %v5544_v57, %v3156_v58  ;;  %v1530_v0 = vmax.f32 %v1526_v54, %v1529_v59  ;;  %v5564_v5 = vld [vmem:[#allocation58_spill] sm:$0xff]  ;;  %v5566_v52 = vld [vmem:[#allocation59_spill] sm:$0xff] }
  0xdf   : > { %v1533_v30 = vsel %vm5543_vm8, %v1161_v46, -inf  ;;  %v1170_v45 = vsel %vm5545_vm4, %v290_v13, -inf  ;;  %vm5546_vm3 = vmmov %vm5545_vm4  ;;  %v1356_v62 = vmax.f32 %v1166_v16, %v1355_v3  ;;  %vm5549_vm5 = vcmp.lt.s32.totalorder %v5548_v22, %v3156_v58  ;;  %v298_v47 = vld [vmem:[%s2508_s27 + $0x3f0] sm:$0xff]  ;;  %v309_v38 = vld [vmem:[%s2508_s27 + $0x448] sm:$0xff] }
  0xe0   : > { %v1171_v40 = vsel %vm5546_vm3, %v291_v17, -inf  ;;  %vm5547_vm12 = vmmov %vm5530_vm0  ;;  %v1172_v4 = vsel %vm5549_vm5, %v292_v53, -inf  ;;  %v1532_v34 = vmax.f32 %v1528_v60, %v1531_v37  ;;  %vm5553_vm6 = vcmp.lt.s32.totalorder %v5552_v19, %v3156_v58  ;;  %v5569_v31 = vld [vmem:[#allocation91_spill] sm:$0xff]  ;;  %v311_v48 = vld [vmem:[%s2508_s27 + $0x458] sm:$0xff] }
  0xe1   : > { %v1535_v35 = vsel %vm5547_vm12, %v1163_v25, -inf  ;;  %vm5550_vm13 = vmmov %vm5530_vm0  ;;  %v1174_v61 = vsel %vm5553_vm6, %v294_v10, -inf  ;;  %v1534_v55 = vmax.f32 %v1530_v0, %v1533_v30  ;;  %v1357_v42 = vmax.f32 %v1168_v51, %v1356_v62  ;;  %v5571_v51 = vld [vmem:[#allocation60_spill] sm:$0xff]  ;;  %v5573_v37 = vld [vmem:[#allocation61_spill] sm:$0xff] }
  0xe2   : > { %v1537_v24 = vsel %vm5550_vm13, %v1165_v44, -inf  ;;  %vm5551_vm0 = vmmov %vm5549_vm5  ;;  %v1536_v18 = vmax.f32 %v1532_v34, %v1535_v35  ;;  %vm5558_vm10 = vcmp.lt.s32.totalorder %v5557_v20, %v3156_v58  ;;  %vm5562_vm15 = vcmp.lt.s32.totalorder %v5561_v15, %v3156_v58  ;;  %v313_v60 = vld [vmem:[%s2508_s27 + $0x468] sm:$0xff]  ;;  %v5578_v35 = vld [vmem:[#allocation62_spill] sm:$0xff] }
  0xe3   : > { %v1173_v12 = vsel %vm5551_vm0, %v293_v6, -inf  ;;  %vm5554_vm7 = vmmov %vm5543_vm8  ;;  %v1176_v32 = vsel %vm5558_vm10, %v296_v11, -inf  ;;  %v1538_v43 = vmax.f32 %v1534_v55, %v1537_v24  ;;  %v1358_v25 = vmax.f32 %v1170_v45, %v1357_v42  ;;  %v302_v22 = vld [vmem:[%s2508_s27 + $0x410] sm:$0xff]  ;;  %v5581_v24 = vld [vmem:[#allocation63_spill] sm:$0xff] }
  0xe4   : > { %v1539_v26 = vsel %vm5554_vm7, %v1167_v1, -inf  ;;  %vm5555_vm9 = vmmov %vm5553_vm6  ;;  %v1179_v8 = vsel %vm5562_vm15, %v299_v49, -inf  ;;  %vm5565_vm8 = vcmp.lt.s32.totalorder %v5564_v5, %v3156_v58  ;;  %vm5567_vm4 = vcmp.lt.s32.totalorder %v5566_v52, %v3156_v58  ;;  %v5588_v20 = vld [vmem:[#allocation65_spill] sm:$0xff] }
  0xe5   : > { %v1175_v39 = vsel %vm5555_vm9, %v295_v9, -inf  ;;  %vm5556_vm2 = vmmov %vm5554_vm7  ;;  %v1540_v56 = vmax.f32 %v1536_v18, %v1539_v26  ;;  %v1181_v44 = vsel %vm5565_vm8, %v301_v23, -inf  ;;  %v1183_v41 = vsel %vm5567_vm4, %v303_v33, -inf  ;;  %v5585_v26 = vld [vmem:[#allocation64_spill] sm:$0xff] }
  0xe6   : > { %v1541_v46 = vsel %vm5556_vm2, %v1169_v36, -inf  ;;  %vm5559_vm11 = vmmov %vm5558_vm10  ;;  %v1359_v16 = vmax.f32 %v1172_v4, %v1358_v25  ;;  %vm5572_vm5 = vcmp.lt.s32.totalorder %v5571_v51, %v3156_v58  ;;  %vm5574_vm13 = vcmp.lt.s32.totalorder %v5573_v37, %v3156_v58  ;;  %v300_v36 = vld [vmem:[%s2508_s27 + $0x400] sm:$0xff]  ;;  %v317_v4 = vld [vmem:[%s2508_s27 + $0x488] sm:$0xff] }
  0xe7   : > { %v1177_v29 = vsel %vm5559_vm11, %v297_v7, -inf  ;;  %vm5560_vm14 = vmmov %vm5556_vm2  ;;  %v1542_v13 = vmax.f32 %v1538_v43, %v1541_v46  ;;  %v1185_v54 = vsel %vm5572_vm5, %v305_v50, -inf  ;;  %v1187_v6 = vsel %vm5574_vm13, %v307_v27, -inf  ;;  %v321_v18 = vld [vmem:[%s2508_s27 + $0x4a8] sm:$0xff]  ;;  %v5592_v27 = vld [vmem:[#allocation66_spill] sm:$0xff] }
  0xe8   : > { %v1543_v28 = vsel %vm5560_vm14, %v1171_v40, -inf  ;;  %vm5563_vm1 = vmmov %vm5556_vm2  ;;  %v1360_v30 = vmax.f32 %v1174_v61, %v1359_v16  ;;  %v315_v40 = vld [vmem:[%s2508_s27 + $0x478] sm:$0xff]  ;;  %vm5579_vm9 = vcmp.lt.s32.totalorder %v5578_v35, %v3156_v58  ;;  %vm5582_vm10 = vcmp.lt.s32.totalorder %v5581_v24, %v3156_v58 }
  0xe9   : > { %v1545_v2 = vsel %vm5563_vm1, %v1173_v12, -inf  ;;  %vm5568_vm3 = vmmov %vm5563_vm1  ;;  %v1544_v53 = vmax.f32 %v1540_v56, %v1543_v28  ;;  %v1189_v11 = vsel %vm5579_vm9, %v309_v38, -inf  ;;  %v1191_v49 = vsel %vm5582_vm10, %v311_v48, -inf  ;;  %v319_v61 = vld [vmem:[%s2508_s27 + $0x498] sm:$0xff]  ;;  %v306_v56 = vld [vmem:[%s2508_s27 + $0x430] sm:$0xff] }
  0xea   : > { %v1547_v17 = vsel %vm5568_vm3, %v1175_v39, -inf  ;;  %vm5570_vm12 = vmmov %vm5563_vm1  ;;  %v1546_v10 = vmax.f32 %v1542_v13, %v1545_v2  ;;  %v1361_v34 = vmax.f32 %v1176_v32, %v1360_v30  ;;  %v304_v39 = vld [vmem:[%s2508_s27 + $0x420] sm:$0xff]  ;;  %v323_v28 = vld [vmem:[%s2508_s27 + $0x4b8] sm:$0xff]  ;;  %vm5591_vm3 = vcmp.lt.s32.totalorder %v5566_v52, %v3156_v58 }
  0xeb   : > { %v1549_v1 = vsel %vm5570_vm12, %v1177_v29, -inf  ;;  %vm5575_vm0 = vmmov %vm5563_vm1  ;;  %v1548_v57 = vmax.f32 %v1544_v53, %v1547_v17  ;;  %v1182_v50 = vsel %vm5591_vm3, %v302_v22, -inf  ;;  %vm5593_vm12 = vcmp.lt.s32.totalorder %v5592_v27, %v3156_v58  ;;  %v325_v2 = vld [vmem:[%s2508_s27 + $0x4c8] sm:$0xff]  ;;  %v327_v17 = vld [vmem:[%s2508_s27 + $0x4d8] sm:$0xff] }
  0xec   : > { %v1551_v3 = vsel %vm5575_vm0, %v1179_v8, -inf  ;;  %vm5576_vm6 = vmmov %vm5575_vm0  ;;  %v1550_v7 = vmax.f32 %v1546_v10, %v1549_v1  ;;  %v1197_v25 = vsel %vm5593_vm12, %v317_v4, -inf  ;;  %v5598_v38 = vld [vmem:[#allocation68_spill] sm:$0xff]  ;;  %v308_v48 = vld [vmem:[%s2508_s27 + $0x440] sm:$0xff] }
  0xed   : > { %v1553_v45 = vsel %vm5576_vm6, %v1181_v44, -inf  ;;  %vm5577_vm7 = vmmov %vm5562_vm15  ;;  %v1552_v12 = vmax.f32 %v1548_v57, %v1551_v3  ;;  %vm5586_vm15 = vcmp.lt.s32.totalorder %v5585_v26, %v3156_v58  ;;  %v5595_v44 = vld [vmem:[#allocation67_spill] sm:$0xff]  ;;  %vm5597_vm6 = vcmp.lt.s32.totalorder %v5571_v51, %v3156_v58  ;;  %v5601_v10 = vld [vmem:[#allocation69_spill] sm:$0xff] }
  0xee   : > { %v1178_v0 = vsel %vm5577_vm7, %v298_v47, -inf  ;;  %vm5580_vm2 = vmmov %vm5575_vm0  ;;  %v1193_v23 = vsel %vm5586_vm15, %v313_v60, -inf  ;;  %v1554_v33 = vmax.f32 %v1550_v7, %v1553_v45  ;;  %vm5596_vm13 = vcmp.lt.s32.totalorder %v5595_v44, %v3156_v58  ;;  %v331_v60 = vld [vmem:[%s2508_s27 + $0x4f8] sm:$0xff]  ;;  %v333_v7 = vld [vmem:[%s2508_s27 + $0x508] sm:$0xff] }
  0xef   : > { %v1555_v62 = vsel %vm5580_vm2, %v1183_v41, -inf  ;;  %vm5583_vm11 = vmmov %vm5575_vm0  ;;  %v1362_v46 = vmax.f32 %v1178_v0, %v1361_v34  ;;  %v1199_v41 = vsel %vm5596_vm13, %v319_v61, -inf  ;;  %v1565_v52 = vsel %vm5575_vm0, %v1193_v23, -inf  ;;  %v5605_v57 = vld [vmem:[#allocation70_spill] sm:$0xff]  ;;  %v5608_v22 = vld [vmem:[#allocation71_spill] sm:$0xff] }
  0xf0   : > { %v1557_v19 = vsel %vm5583_vm11, %v1185_v54, -inf  ;;  %vm5584_vm14 = vmmov %vm5565_vm8  ;;  %vm5589_vm8 = vcmp.lt.s32.totalorder %v5588_v20, %v3156_v58  ;;  %v1556_v29 = vmax.f32 %v1552_v12, %v1555_v62  ;;  %v1184_v47 = vsel %vm5597_vm6, %v304_v39, -inf  ;;  %v329_v54 = vld [vmem:[%s2508_s27 + $0x4e8] sm:$0xff] }
  0xf1   : > { %v1180_v55 = vsel %vm5584_vm14, %v300_v36, -inf  ;;  %vm5587_vm1 = vmmov %vm5575_vm0  ;;  %v1195_v32 = vsel %vm5589_vm8, %v315_v40, -inf  ;;  %v1558_v15 = vmax.f32 %v1554_v33, %v1557_v19  ;;  %vm5599_vm7 = vcmp.lt.s32.totalorder %v5598_v38, %v3156_v58  ;;  %v5612_v19 = vld [vmem:[#allocation72_spill] sm:$0xff]  ;;  %v312_v33 = vld [vmem:[%s2508_s27 + $0x460] sm:$0xff] }
  0xf2   : > { %v1559_v42 = vsel %vm5587_vm1, %v1187_v6, -inf  ;;  %vm5590_vm4 = vmmov %vm5575_vm0  ;;  %v1363_v5 = vmax.f32 %v1180_v55, %v1362_v46  ;;  %v1201_v16 = vsel %vm5599_vm7, %v321_v18, -inf  ;;  %vm5602_vm2 = vcmp.lt.s32.totalorder %v5601_v10, %v3156_v58  ;;  %v5615_v18 = vld [vmem:[#allocation73_spill] sm:$0xff] }
  0xf3   : > { %v1561_v43 = vsel %vm5590_vm4, %v1189_v11, -inf  ;;  %vm5594_vm5 = vmmov %vm5575_vm0  ;;  %v1560_v13 = vmax.f32 %v1556_v29, %v1559_v42  ;;  %v1203_v3 = vsel %vm5602_vm2, %v323_v28, -inf  ;;  %vm5604_vm11 = vcmp.lt.s32.totalorder %v5573_v37, %v3156_v58  ;;  %v310_v11 = vld [vmem:[%s2508_s27 + $0x450] sm:$0xff]  ;;  %v337_v42 = vld [vmem:[%s2508_s27 + $0x528] sm:$0xff] }
  0xf4   : > { %v1563_v8 = vsel %vm5594_vm5, %v1191_v49, -inf  ;;  %v1562_v53 = vmax.f32 %v1558_v15, %v1561_v43  ;;  %vm5600_vm9 = vmmov %vm5575_vm0  ;;  %v1364_v6 = vmax.f32 %v1182_v50, %v1363_v5  ;;  %v1186_v30 = vsel %vm5604_vm11, %v306_v56, -inf  ;;  %v335_v49 = vld [vmem:[%s2508_s27 + $0x518] sm:$0xff]  ;;  %v341_v56 = vld [vmem:[%s2508_s27 + $0x548] sm:$0xff] }
  0xf5   : > { %v1567_v1 = vsel %vm5600_vm9, %v1195_v32, -inf  ;;  %v1564_v36 = vmax.f32 %v1560_v13, %v1563_v8  ;;  %vm5603_vm10 = vmmov %vm5575_vm0  ;;  %vm5606_vm14 = vcmp.lt.s32.totalorder %v5605_v57, %v3156_v58  ;;  %vm5609_vm1 = vcmp.lt.s32.totalorder %v5608_v22, %v3156_v58  ;;  %v339_v29 = vld [vmem:[%s2508_s27 + $0x538] sm:$0xff]  ;;  %v314_v8 = vld [vmem:[%s2508_s27 + $0x470] sm:$0xff] }
  0xf6   : > { %v1569_v51 = vsel %vm5603_vm10, %v1197_v25, -inf  ;;  %v1205_v45 = vsel %vm5606_vm14, %v325_v2, -inf  ;;  %v1566_v40 = vmax.f32 %v1562_v53, %v1565_v52  ;;  %vm5607_vm15 = vmmov %vm5575_vm0  ;;  %v1365_v62 = vmax.f32 %v1184_v47, %v1364_v6  ;;  %v5619_v28 = vld [vmem:[#allocation74_spill] sm:$0xff]  ;;  %v5622_v5 = vld [vmem:[#allocation75_spill] sm:$0xff] }
  0xf7   : > { %v1571_v0 = vsel %vm5607_vm15, %v1199_v41, -inf  ;;  %v1207_v4 = vsel %vm5609_vm1, %v327_v17, -inf  ;;  %v1568_v34 = vmax.f32 %v1564_v36, %v1567_v1  ;;  %vm5610_vm8 = vmmov %vm5575_vm0  ;;  %vm5611_vm4 = vcmp.lt.s32.totalorder %v5578_v35, %v3156_v58  ;;  %v343_v52 = vld [vmem:[%s2508_s27 + $0x558] sm:$0xff]  ;;  %v5626_v47 = vld [vmem:[#allocation76_spill] sm:$0xff] }
  0xf8   : > { %v1573_v37 = vsel %vm5610_vm8, %v1201_v16, -inf  ;;  %v1188_v12 = vsel %vm5611_vm4, %v308_v48, -inf  ;;  %vm5613_vm3 = vcmp.lt.s32.totalorder %v5612_v19, %v3156_v58  ;;  %v1570_v55 = vmax.f32 %v1566_v40, %v1569_v51  ;;  %vm5614_vm12 = vmmov %vm5575_vm0  ;;  %v316_v48 = vld [vmem:[%s2508_s27 + $0x480] sm:$0xff] }
  0xf9   : > { %v1209_v61 = vsel %vm5613_vm3, %v329_v54, -inf  ;;  %v1575_v23 = vsel %vm5614_vm12, %v1203_v3, -inf  ;;  %v1366_v39 = vmax.f32 %v1186_v30, %v1365_v62  ;;  %vm5616_vm5 = vcmp.lt.s32.totalorder %v5615_v18, %v3156_v58  ;;  %vm5617_vm13 = vmmov %vm5575_vm0  ;;  %v345_v54 = vld [vmem:[%s2508_s27 + $0x568] sm:$0xff]  ;;  %v5629_v3 = vld [vmem:[#allocation77_spill] sm:$0xff] }
  0xfa   : > { %v1211_v46 = vsel %vm5616_vm5, %v331_v60, -inf  ;;  %v1572_v32 = vmax.f32 %v1568_v34, %v1571_v0  ;;  %v1577_v35 = vsel %vm5617_vm13, %v1205_v45, -inf  ;;  %vm5618_vm0 = vcmp.lt.s32.totalorder %v5581_v24, %v3156_v58  ;;  %vm5621_vm7 = vmmov %vm5610_vm8  ;;  %v347_v60 = vld [vmem:[%s2508_s27 + $0x578] sm:$0xff]  ;;  %v349_v62 = vld [vmem:[%s2508_s27 + $0x588] sm:$0xff] }
  0xfb   : > { %v1190_v43 = vsel %vm5618_vm0, %v310_v11, -inf  ;;  %vm5620_vm6 = vcmp.lt.s32.totalorder %v5619_v28, %v3156_v58  ;;  %v1574_v25 = vmax.f32 %v1570_v55, %v1573_v37  ;;  %v1579_v15 = vsel %vm5621_vm7, %v1207_v4, -inf  ;;  %vm5624_vm2 = vmmov %vm5621_vm7  ;;  %v5633_v45 = vld [vmem:[#allocation78_spill] sm:$0xff]  ;;  %v5636_v34 = vld [vmem:[#allocation79_spill] sm:$0xff] }
  0xfc   : > { %v1213_v50 = vsel %vm5620_vm6, %v333_v7, -inf  ;;  %v1367_v2 = vmax.f32 %v1188_v12, %v1366_v39  ;;  %vm5623_vm9 = vcmp.lt.s32.totalorder %v5622_v5, %v3156_v58  ;;  %v1576_v13 = vmax.f32 %v1572_v32, %v1575_v23  ;;  %vm5628_vm14 = vmmov %vm5624_vm2  ;;  %v318_v7 = vld [vmem:[%s2508_s27 + $0x490] sm:$0xff]  ;;  %v351_v12 = vld [vmem:[%s2508_s27 + $0x598] sm:$0xff] }
  0xfd   : > { %v1215_v41 = vsel %vm5623_vm9, %v335_v49, -inf  ;;  %v1581_v24 = vsel %vm5624_vm2, %v1209_v61, -inf  ;;  %vm5625_vm10 = vcmp.lt.s32.totalorder %v5585_v26, %v3156_v58  ;;  %vm5627_vm11 = vcmp.lt.s32.totalorder %v5626_v47, %v3156_v58  ;;  %vm5631_vm1 = vmmov %vm5624_vm2  ;;  %v5640_v55 = vld [vmem:[#allocation80_spill] sm:$0xff]  ;;  %v320_v39 = vld [vmem:[%s2508_s27 + $0x4a0] sm:$0xff] }
  0xfe   : > { %v1192_v17 = vsel %vm5625_vm10, %v312_v33, -inf  ;;  %v1217_v16 = vsel %vm5627_vm11, %v337_v42, -inf  ;;  %v1578_v53 = vmax.f32 %v1574_v25, %v1577_v35  ;;  %v1583_v1 = vsel %vm5628_vm14, %v1211_v46, -inf  ;;  %vm5635_vm3 = vmmov %vm5631_vm1  ;;  %v353_v46 = vld [vmem:[%s2508_s27 + $0x5a8] sm:$0xff]  ;;  %v5643_v35 = vld [vmem:[#allocation81_spill] sm:$0xff] }
  0xff   : > { %v1368_v6 = vmax.f32 %v1190_v43, %v1367_v2  ;;  %vm5630_vm15 = vcmp.lt.s32.totalorder %v5629_v3, %v3156_v58  ;;  %v1580_v51 = vmax.f32 %v1576_v13, %v1579_v15  ;;  %v1585_v26 = vsel %vm5631_vm1, %v1213_v50, -inf  ;;  %vm5638_vm5 = vmmov %vm5631_vm1  ;;  %v355_v50 = vld [vmem:[%s2508_s27 + $0x5b8] sm:$0xff]  ;;  %v357_v13 = vld [vmem:[%s2508_s27 + $0x5c8] sm:$0xff] }
 0x100   : > { %v1219_v36 = vsel %vm5630_vm15, %v339_v29, -inf  ;;  %vm5632_vm8 = vcmp.lt.s32.totalorder %v5588_v20, %v3156_v58  ;;  %vm5634_vm4 = vcmp.lt.s32.totalorder %v5633_v45, %v3156_v58  ;;  %v1582_v0 = vmax.f32 %v1578_v53, %v1581_v24  ;;  %vm5642_vm6 = vmmov %vm5631_vm1  ;;  %v5647_v15 = vld [vmem:[#allocation82_spill] sm:$0xff] }
 0x101   : > { %v1194_v30 = vsel %vm5632_vm8, %v314_v8, -inf  ;;  %v1221_v40 = vsel %vm5634_vm4, %v341_v56, -inf  ;;  %v1587_v11 = vsel %vm5635_vm3, %v1215_v41, -inf  ;;  %v1369_v4 = vmax.f32 %v1192_v17, %v1368_v6  ;;  %vm5645_vm9 = vmmov %vm5631_vm1  ;;  %v322_v41 = vld [vmem:[%s2508_s27 + $0x4b0] sm:$0xff]  ;;  %v359_v53 = vld [vmem:[%s2508_s27 + $0x5d8] sm:$0xff] }
 0x102   : > { %vm5637_vm12 = vcmp.lt.s32.totalorder %v5636_v34, %v3156_v58  ;;  %v1584_v49 = vmax.f32 %v1580_v51, %v1583_v1  ;;  %v1589_v20 = vsel %vm5638_vm5, %v1217_v16, -inf  ;;  %vm5639_vm13 = vcmp.lt.s32.totalorder %v5592_v27, %v3156_v58  ;;  %vm5649_vm11 = vmmov %vm5631_vm1  ;;  %v324_v51 = vld [vmem:[%s2508_s27 + $0x4c0] sm:$0xff] }
 0x103   : > { %v1223_v37 = vsel %vm5637_vm12, %v343_v52, -inf  ;;  %v1196_v61 = vsel %vm5639_vm13, %v316_v48, -inf  ;;  %vm5641_vm0 = vcmp.lt.s32.totalorder %v5640_v55, %v3156_v58  ;;  %v1586_v33 = vmax.f32 %v1582_v0, %v1585_v26  ;;  %v5650_v52 = vld [vmem:[#allocation83_spill] sm:$0xff]  ;;  %vm5652_vm15 = vmmov %vm5631_vm1  ;;  %v5654_v48 = vld [vmem:[#allocation84_spill] sm:$0xff] }
 0x104   : > { %v1225_v23 = vsel %vm5641_vm0, %v345_v54, -inf  ;;  %v1591_v42 = vsel %vm5642_vm6, %v1219_v36, -inf  ;;  %v1370_v32 = vmax.f32 %v1194_v30, %v1369_v4  ;;  %vm5644_vm7 = vcmp.lt.s32.totalorder %v5643_v35, %v3156_v58  ;;  %vm5656_vm4 = vmmov %vm5635_vm3  ;;  %v361_v26 = vld [vmem:[%s2508_s27 + $0x5e8] sm:$0xff]  ;;  %v5657_v30 = vld [vmem:[#allocation85_spill] sm:$0xff] }
 0x105   : > { %v1227_v29 = vsel %vm5644_vm7, %v347_v60, -inf  ;;  %v1588_v43 = vmax.f32 %v1584_v49, %v1587_v11  ;;  %v1593_v27 = vsel %vm5645_vm9, %v1221_v40, -inf  ;;  %vm5646_vm2 = vcmp.lt.s32.totalorder %v5595_v44, %v3156_v58  ;;  %vm5659_vm12 = vmmov %vm5656_vm4  ;;  %v363_v11 = vld [vmem:[%s2508_s27 + $0x5f8] sm:$0xff] }
 0x106   : > { %v1198_v25 = vsel %vm5646_vm2, %v318_v7, -inf  ;;  %vm5648_vm10 = vcmp.lt.s32.totalorder %v5647_v15, %v3156_v58  ;;  %v1590_v56 = vmax.f32 %v1586_v33, %v1589_v20  ;;  %v1595_v2 = vsel %vm5649_vm11, %v1223_v37, -inf  ;;  %vm5663_vm0 = vmmov %vm5656_vm4  ;;  %v326_v20 = vld [vmem:[%s2508_s27 + $0x4d0] sm:$0xff] }
 0x107   : > { %v1229_v8 = vsel %vm5648_vm10, %v349_v62, -inf  ;;  %v1371_v24 = vmax.f32 %v1196_v61, %v1370_v32  ;;  %vm5651_vm14 = vcmp.lt.s32.totalorder %v5650_v52, %v3156_v58  ;;  %v1592_v16 = vmax.f32 %v1588_v43, %v1591_v42  ;;  %v5661_v62 = vld [vmem:[#allocation5_spill] sm:$0xff]  ;;  %vm5666_vm7 = vmmov %vm5663_vm0  ;;  %v5668_v32 = vld [vmem:[#allocation7_spill] sm:$0xff] }
 0x108   : > { %v1231_v17 = vsel %vm5651_vm14, %v351_v12, -inf  ;;  %v1597_v44 = vsel %vm5652_vm15, %v1225_v23, -inf  ;;  %vm5653_vm1 = vcmp.lt.s32.totalorder %v5598_v38, %v3156_v58  ;;  %vm5655_vm8 = vcmp.lt.s32.totalorder %v5654_v48, %v3156_v58  ;;  %v365_v12 = vld [vmem:[%s2508_s27 + $0x608] sm:$0xff]  ;;  %v5664_v23 = vld [vmem:[#allocation6_spill] sm:$0xff]  ;;  %vm5670_vm10 = vmmov %vm5663_vm0 }
 0x109   : > { %v1200_v1 = vsel %vm5653_vm1, %v320_v39, -inf  ;;  %v1233_v54 = vsel %vm5655_vm8, %v353_v46, -inf  ;;  %v1594_v6 = vmax.f32 %v1590_v56, %v1593_v27  ;;  %v1599_v36 = vsel %vm5656_vm4, %v1227_v29, -inf  ;;  %v367_v39 = vld [vmem:[%s2508_s27 + $0x618] sm:$0xff]  ;;  %v5671_v56 = vld [vmem:[#allocation8_spill] sm:$0xff]  ;;  %vm5673_vm14 = vmmov %vm5663_vm0 }
 0x10a   : > { %v1372_v60 = vmax.f32 %v1198_v25, %v1371_v24  ;;  %vm5658_vm3 = vcmp.lt.s32.totalorder %v5657_v30, %v3156_v58  ;;  %v1596_v0 = vmax.f32 %v1592_v16, %v1595_v2  ;;  %v1601_v38 = vsel %vm5659_vm12, %v1229_v8, -inf  ;;  %v369_v25 = vld [vmem:[%s2508_s27 + $0x628] sm:$0xff]  ;;  %vm5677_vm8 = vmmov %vm5663_vm0 }
 0x10b   : > { %v1235_v40 = vsel %vm5658_vm3, %v355_v50, -inf  ;;  %vm5660_vm5 = vcmp.lt.s32.totalorder %v5601_v10, %v3156_v58  ;;  %vm5662_vm13 = vcmp.lt.s32.totalorder %v5661_v62, %v3156_v58  ;;  %v1598_v37 = vmax.f32 %v1594_v6, %v1597_v44  ;;  %v328_v50 = vld [vmem:[%s2508_s27 + $0x4e0] sm:$0xff]  ;;  %vm5680_vm3 = vmmov %vm5663_vm0 }
 0x10c   : > { %v1202_v7 = vsel %vm5660_vm5, %v322_v41, -inf  ;;  %v1237_v4 = vsel %vm5662_vm13, %v357_v13, -inf  ;;  %v1603_v49 = vsel %vm5663_vm0, %v1231_v17, -inf  ;;  %v1373_v61 = vmax.f32 %v1200_v1, %v1372_v60  ;;  %v371_v13 = vld [vmem:[%s2508_s27 + $0x638] sm:$0xff]  ;;  %v5675_v17 = vld [vmem:[#allocation9_spill] sm:$0xff]  ;;  %vm5684_vm13 = vmmov %vm5663_vm0 }
 0x10d   : > { %vm5665_vm6 = vcmp.lt.s32.totalorder %v5664_v23, %v3156_v58  ;;  %v1600_v42 = vmax.f32 %v1596_v0, %v1599_v36  ;;  %v1605_v10 = vsel %vm5666_vm7, %v1233_v54, -inf  ;;  %vm5667_vm9 = vcmp.lt.s32.totalorder %v5605_v57, %v3156_v58  ;;  %v330_v1 = vld [vmem:[%s2508_s27 + $0x4f0] sm:$0xff]  ;;  %v373_v54 = vld [vmem:[%s2508_s27 + $0x648] sm:$0xff]  ;;  %v5678_v36 = vld [vmem:[#allocation10_spill] sm:$0xff] }
 0x10e   : > { %v1239_v33 = vsel %vm5665_vm6, %v359_v53, -inf  ;;  %v1204_v46 = vsel %vm5667_vm9, %v324_v51, -inf  ;;  %vm5669_vm2 = vcmp.lt.s32.totalorder %v5668_v32, %v3156_v58  ;;  %v1602_v43 = vmax.f32 %v1598_v37, %v1601_v38  ;;  %v375_v60 = vld [vmem:[%s2508_s27 + $0x658] sm:$0xff]  ;;  %v5682_v0 = vld [vmem:[#allocation11_spill] sm:$0xff]  ;;  %v377_v37 = vld [vmem:[%s2508_s27 + $0x668] sm:$0xff] }
 0x10f   : > { %v1241_v29 = vsel %vm5669_vm2, %v361_v26, -inf  ;;  %v1607_v27 = vsel %vm5670_vm10, %v1235_v40, -inf  ;;  %v1374_v8 = vmax.f32 %v1202_v7, %v1373_v61  ;;  %vm5672_vm11 = vcmp.lt.s32.totalorder %v5671_v56, %v3156_v58  ;;  %vm5687_vm6 = vmmov %vm5680_vm3 }
 0x110   : > { %v1243_v2 = vsel %vm5672_vm11, %v363_v11, -inf  ;;  %v1604_v41 = vmax.f32 %v1600_v42, %v1603_v49  ;;  %v1609_v57 = vsel %vm5673_vm14, %v1237_v4, -inf  ;;  %vm5674_vm15 = vcmp.lt.s32.totalorder %v5608_v22, %v3156_v58  ;;  %v332_v4 = vld [vmem:[%s2508_s27 + $0x500] sm:$0xff]  ;;  %vm5691_vm2 = vmmov %vm5680_vm3 }
 0x111   : > { %v1206_v24 = vsel %vm5674_vm15, %v326_v20, -inf  ;;  %vm5676_vm1 = vcmp.lt.s32.totalorder %v5675_v17, %v3156_v58  ;;  %v1606_v44 = vmax.f32 %v1602_v43, %v1605_v10  ;;  %v1611_v53 = vsel %vm5677_vm8, %v1239_v33, -inf  ;;  %v5685_v20 = vld [vmem:[#allocation12_spill] sm:$0xff]  ;;  %v379_v33 = vld [vmem:[%s2508_s27 + $0x678] sm:$0xff]  ;;  %v5689_v10 = vld [vmem:[#allocation13_spill] sm:$0xff] }
 0x112   : > { %v1245_v16 = vsel %vm5676_vm1, %v365_v12, -inf  ;;  %v1375_v6 = vmax.f32 %v1204_v46, %v1374_v8  ;;  %vm5679_vm4 = vcmp.lt.s32.totalorder %v5678_v36, %v3156_v58  ;;  %v1608_v26 = vmax.f32 %v1604_v41, %v1607_v27  ;;  %v334_v43 = vld [vmem:[%s2508_s27 + $0x510] sm:$0xff]  ;;  %v381_v27 = vld [vmem:[%s2508_s27 + $0x688] sm:$0xff]  ;;  %vm5694_vm11 = vmmov %vm5691_vm2 }
 0x113   : > { %v1247_v51 = vsel %vm5679_vm4, %v367_v39, -inf  ;;  %v1613_v22 = vsel %vm5680_vm3, %v1241_v29, -inf  ;;  %vm5681_vm12 = vcmp.lt.s32.totalorder %v5612_v19, %v3156_v58  ;;  %vm5683_vm5 = vcmp.lt.s32.totalorder %v5682_v0, %v3156_v58  ;;  %v383_v41 = vld [vmem:[%s2508_s27 + $0x698] sm:$0xff]  ;;  %vm5698_vm1 = vmmov %vm5691_vm2 }
 0x114   : > { %v1208_v40 = vsel %vm5681_vm12, %v328_v50, -inf  ;;  %v1249_v38 = vsel %vm5683_vm5, %v369_v25, -inf  ;;  %v1610_v11 = vmax.f32 %v1606_v44, %v1609_v57  ;;  %v1615_v7 = vsel %vm5684_vm13, %v1243_v2, -inf  ;;  %v5692_v25 = vld [vmem:[#allocation14_spill] sm:$0xff]  ;;  %vm5701_vm4 = vmmov %vm5698_vm1 }
 0x115   : > { %v1376_v49 = vmax.f32 %v1206_v24, %v1375_v6  ;;  %vm5686_vm0 = vcmp.lt.s32.totalorder %v5685_v20, %v3156_v58  ;;  %v1612_v61 = vmax.f32 %v1608_v26, %v1611_v53  ;;  %v1617_v19 = vsel %vm5687_vm6, %v1245_v16, -inf  ;;  %v336_v53 = vld [vmem:[%s2508_s27 + $0x520] sm:$0xff]  ;;  %v5699_v6 = vld [vmem:[#allocation16_spill] sm:$0xff]  ;;  %vm5705_vm5 = vmmov %vm5698_vm1 }
 0x116   : > { %v1251_v12 = vsel %vm5686_vm0, %v371_v13, -inf  ;;  %vm5688_vm7 = vcmp.lt.s32.totalorder %v5615_v18, %v3156_v58  ;;  %vm5690_vm9 = vcmp.lt.s32.totalorder %v5689_v10, %v3156_v58  ;;  %v1614_v46 = vmax.f32 %v1610_v11, %v1613_v22  ;;  %v5696_v13 = vld [vmem:[#allocation15_spill] sm:$0xff]  ;;  %v387_v22 = vld [vmem:[%s2508_s27 + $0x6b8] sm:$0xff]  ;;  %vm5708_vm0 = vmmov %vm5698_vm1 }
 0x117   : > { %v1210_v42 = vsel %vm5688_vm7, %v330_v1, -inf  ;;  %v1253_v39 = vsel %vm5690_vm9, %v373_v54, -inf  ;;  %v1619_v29 = vsel %vm5691_vm2, %v1247_v51, -inf  ;;  %v1377_v50 = vmax.f32 %v1208_v40, %v1376_v49  ;;  %v385_v1 = vld [vmem:[%s2508_s27 + $0x6a8] sm:$0xff]  ;;  %v5703_v40 = vld [vmem:[#allocation17_spill] sm:$0xff]  ;;  %vm5712_vm9 = vmmov %vm5708_vm0 }
 0x118   : > { %vm5693_vm10 = vcmp.lt.s32.totalorder %v5692_v25, %v3156_v58  ;;  %v1616_v2 = vmax.f32 %v1612_v61, %v1615_v7  ;;  %v1621_v18 = vsel %vm5694_vm11, %v1249_v38, -inf  ;;  %vm5695_vm14 = vcmp.lt.s32.totalorder %v5619_v28, %v3156_v58 }
 0x119   : > { %v1255_v8 = vsel %vm5693_vm10, %v375_v60, -inf  ;;  %v1212_v57 = vsel %vm5695_vm14, %v332_v4, -inf  ;;  %vm5697_vm15 = vcmp.lt.s32.totalorder %v5696_v13, %v3156_v58  ;;  %v1618_v16 = vmax.f32 %v1614_v46, %v1617_v19  ;;  %v338_v4 = vld [vmem:[%s2508_s27 + $0x530] sm:$0xff]  ;;  %vm5715_vm10 = vmmov %vm5708_vm0 }
 0x11a   : > { %v1257_v24 = vsel %vm5697_vm15, %v377_v37, -inf  ;;  %v1623_v44 = vsel %vm5698_vm1, %v1251_v12, -inf  ;;  %v1378_v54 = vmax.f32 %v1210_v42, %v1377_v50  ;;  %vm5700_vm8 = vcmp.lt.s32.totalorder %v5699_v6, %v3156_v58  ;;  %v389_v37 = vld [vmem:[%s2508_s27 + $0x6c8] sm:$0xff]  ;;  %v5706_v12 = vld [vmem:[#allocation18_spill] sm:$0xff]  ;;  %vm5719_vm15 = vmmov %vm5708_vm0 }
 0x11b   : > { %v1259_v51 = vsel %vm5700_vm8, %v379_v33, -inf  ;;  %v1620_v26 = vmax.f32 %v1616_v2, %v1619_v29  ;;  %v1625_v28 = vsel %vm5701_vm4, %v1253_v39, -inf  ;;  %vm5702_vm3 = vcmp.lt.s32.totalorder %v5622_v5, %v3156_v58  ;;  %v391_v33 = vld [vmem:[%s2508_s27 + $0x6d8] sm:$0xff]  ;;  %v5710_v39 = vld [vmem:[#allocation19_spill] sm:$0xff]  ;;  %v393_v50 = vld [vmem:[%s2508_s27 + $0x6e8] sm:$0xff] }
 0x11c   : > { %v1214_v60 = vsel %vm5702_vm3, %v334_v43, -inf  ;;  %vm5704_vm12 = vcmp.lt.s32.totalorder %v5703_v40, %v3156_v58  ;;  %v1622_v11 = vmax.f32 %v1618_v16, %v1621_v18  ;;  %v1627_v7 = vsel %vm5705_vm5, %v1255_v8, -inf  ;;  %v5713_v2 = vld [vmem:[#allocation20_spill] sm:$0xff]  ;;  %v5717_v16 = vld [vmem:[#allocation21_spill] sm:$0xff]  ;;  %vm5722_vm8 = vmmov %vm5708_vm0 }
 0x11d   : > { %v1261_v38 = vsel %vm5704_vm12, %v381_v27, -inf  ;;  %v1379_v49 = vmax.f32 %v1212_v57, %v1378_v54  ;;  %vm5707_vm13 = vcmp.lt.s32.totalorder %v5706_v12, %v3156_v58  ;;  %v1624_v19 = vmax.f32 %v1620_v26, %v1623_v44  ;;  %v340_v27 = vld [vmem:[%s2508_s27 + $0x540] sm:$0xff]  ;;  %v395_v57 = vld [vmem:[%s2508_s27 + $0x6f8] sm:$0xff]  ;;  %v342_v54 = vld [vmem:[%s2508_s27 + $0x550] sm:$0xff] }
 0x11e   : > { %v1263_v61 = vsel %vm5707_vm13, %v383_v41, -inf  ;;  %v1629_v5 = vsel %vm5708_vm0, %v1257_v24, -inf  ;;  %vm5709_vm6 = vcmp.lt.s32.totalorder %v5626_v47, %v3156_v58  ;;  %vm5711_vm7 = vcmp.lt.s32.totalorder %v5710_v39, %v3156_v58  ;;  %vm5726_vm12 = vmmov %vm5708_vm0 }
 0x11f   : > { %v1216_v42 = vsel %vm5709_vm6, %v336_v53, -inf  ;;  %v1265_v46 = vsel %vm5711_vm7, %v385_v1, -inf  ;;  %v1626_v29 = vmax.f32 %v1622_v11, %v1625_v28  ;;  %v1631_v43 = vsel %vm5712_vm9, %v1259_v51, -inf  ;;  %v397_v51 = vld [vmem:[%s2508_s27 + $0x708] sm:$0xff]  ;;  %v5720_v28 = vld [vmem:[#allocation22_spill] sm:$0xff]  ;;  %vm5729_vm13 = vmmov %vm5708_vm0 }
 0x120   : > { %v1380_v8 = vmax.f32 %v1214_v60, %v1379_v49  ;;  %vm5714_vm2 = vcmp.lt.s32.totalorder %v5713_v2, %v3156_v58  ;;  %v1628_v41 = vmax.f32 %v1624_v19, %v1627_v7  ;;  %v1633_v47 = vsel %vm5715_vm10, %v1261_v38, -inf  ;;  %v399_v38 = vld [vmem:[%s2508_s27 + $0x718] sm:$0xff]  ;;  %v5724_v7 = vld [vmem:[#allocation23_spill] sm:$0xff]  ;;  %v401_v19 = vld [vmem:[%s2508_s27 + $0x728] sm:$0xff] }
 0x121   : > { %v1267_v18 = vsel %vm5714_vm2, %v387_v22, -inf  ;;  %vm5716_vm11 = vcmp.lt.s32.totalorder %v5629_v3, %v3156_v58  ;;  %vm5718_vm14 = vcmp.lt.s32.totalorder %v5717_v16, %v3156_v58  ;;  %v1630_v53 = vmax.f32 %v1626_v29, %v1629_v5  ;;  %v403_v29 = vld [vmem:[%s2508_s27 + $0x738] sm:$0xff]  ;;  %vm5733_vm7 = vmmov %vm5722_vm8 }
 0x122   : > { %v1218_v24 = vsel %vm5716_vm11, %v338_v4, -inf  ;;  %v1269_v44 = vsel %vm5718_vm14, %v389_v37, -inf  ;;  %v1635_v1 = vsel %vm5719_vm15, %v1263_v61, -inf  ;;  %v1381_v26 = vmax.f32 %v1216_v42, %v1380_v8  ;;  %v344_v61 = vld [vmem:[%s2508_s27 + $0x560] sm:$0xff]  ;;  %vm5736_vm2 = vmmov %vm5733_vm7 }
 0x123   : > { %vm5721_vm1 = vcmp.lt.s32.totalorder %v5720_v28, %v3156_v58  ;;  %v1632_v60 = vmax.f32 %v1628_v41, %v1631_v43  ;;  %v1637_v3 = vsel %vm5722_vm8, %v1265_v46, -inf  ;;  %vm5723_vm4 = vcmp.lt.s32.totalorder %v5633_v45, %v3156_v58  ;;  %v346_v41 = vld [vmem:[%s2508_s27 + $0x570] sm:$0xff]  ;;  %vm5740_vm14 = vmmov %vm5736_vm2 }
 0x124   : > { %v1271_v22 = vsel %vm5721_vm1, %v391_v33, -inf  ;;  %v1220_v11 = vsel %vm5723_vm4, %v340_v27, -inf  ;;  %vm5725_vm3 = vcmp.lt.s32.totalorder %v5724_v7, %v3156_v58  ;;  %v1634_v37 = vmax.f32 %v1630_v53, %v1633_v47  ;;  %v5727_v33 = vld [vmem:[#allocation24_spill] sm:$0xff]  ;;  %v5731_v27 = vld [vmem:[#allocation25_spill] sm:$0xff]  ;;  %vm5743_vm1 = vmmov %vm5736_vm2 }
 0x125   : > { %v1273_v4 = vsel %vm5725_vm3, %v393_v50, -inf  ;;  %v1639_v49 = vsel %vm5726_vm12, %v1267_v18, -inf  ;;  %v1382_v5 = vmax.f32 %v1218_v24, %v1381_v26  ;;  %vm5728_vm5 = vcmp.lt.s32.totalorder %v5727_v33, %v3156_v58  ;;  %v405_v47 = vld [vmem:[%s2508_s27 + $0x748] sm:$0xff]  ;;  %v5734_v24 = vld [vmem:[#allocation26_spill] sm:$0xff]  ;;  %vm5747_vm3 = vmmov %vm5743_vm1 }
 0x126   : > { %v1275_v42 = vsel %vm5728_vm5, %v395_v57, -inf  ;;  %v1636_v46 = vmax.f32 %v1632_v60, %v1635_v1  ;;  %v1641_v45 = vsel %vm5729_vm13, %v1269_v44, -inf  ;;  %vm5730_vm0 = vcmp.lt.s32.totalorder %v5636_v34, %v3156_v58  ;;  %v407_v1 = vld [vmem:[%s2508_s27 + $0x758] sm:$0xff]  ;;  %vm5750_vm5 = vmmov %vm5743_vm1 }
 0x127   : > { %v1222_v43 = vsel %vm5730_vm0, %v342_v54, -inf  ;;  %vm5732_vm6 = vcmp.lt.s32.totalorder %v5731_v27, %v3156_v58  ;;  %v1638_v8 = vmax.f32 %v1634_v37, %v1637_v3  ;;  %v1643_v18 = vsel %vm5733_vm7, %v1271_v22, -inf  ;;  %v348_v3 = vld [vmem:[%s2508_s27 + $0x580] sm:$0xff]  ;;  %v5741_v37 = vld [vmem:[#allocation28_spill] sm:$0xff] }
 0x128   : > { %v1277_v50 = vsel %vm5732_vm6, %v397_v51, -inf  ;;  %v1383_v57 = vmax.f32 %v1220_v11, %v1382_v5  ;;  %vm5735_vm9 = vcmp.lt.s32.totalorder %v5734_v24, %v3156_v58  ;;  %v1640_v53 = vmax.f32 %v1636_v46, %v1639_v49  ;;  %v5738_v51 = vld [vmem:[#allocation27_spill] sm:$0xff]  ;;  %v409_v11 = vld [vmem:[%s2508_s27 + $0x768] sm:$0xff]  ;;  %v5745_v5 = vld [vmem:[#allocation29_spill] sm:$0xff] }
 0x129   : > { %v1279_v44 = vsel %vm5735_vm9, %v399_v38, -inf  ;;  %v1645_v34 = vsel %vm5736_vm2, %v1273_v4, -inf  ;;  %vm5737_vm10 = vcmp.lt.s32.totalorder %v5640_v55, %v3156_v58  ;;  %vm5739_vm11 = vcmp.lt.s32.totalorder %v5738_v51, %v3156_v58  ;;  %vm5754_vm6 = vmmov %vm5743_vm1 }
 0x12a   : > { %v1224_v54 = vsel %vm5737_vm10, %v344_v61, -inf  ;;  %v1281_v26 = vsel %vm5739_vm11, %v401_v19, -inf  ;;  %v1642_v22 = vmax.f32 %v1638_v8, %v1641_v45  ;;  %v1647_v60 = vsel %vm5740_vm14, %v1275_v42, -inf  ;;  %v411_v61 = vld [vmem:[%s2508_s27 + $0x778] sm:$0xff]  ;;  %v413_v8 = vld [vmem:[%s2508_s27 + $0x788] sm:$0xff]  ;;  %vm5757_vm9 = vmmov %vm5743_vm1 }
 0x12b   : > { %v1384_v38 = vmax.f32 %v1222_v43, %v1383_v57  ;;  %vm5742_vm15 = vcmp.lt.s32.totalorder %v5741_v37, %v3156_v58  ;;  %v1644_v49 = vmax.f32 %v1640_v53, %v1643_v18  ;;  %v1649_v55 = vsel %vm5743_vm1, %v1277_v50, -inf  ;;  %v350_v43 = vld [vmem:[%s2508_s27 + $0x590] sm:$0xff]  ;;  %v5748_v18 = vld [vmem:[#allocation30_spill] sm:$0xff]  ;;  %vm5761_vm11 = vmmov %vm5743_vm1 }
 0x12c   : > { %v1283_v4 = vsel %vm5742_vm15, %v403_v29, -inf  ;;  %vm5744_vm8 = vcmp.lt.s32.totalorder %v5643_v35, %v3156_v58  ;;  %vm5746_vm4 = vcmp.lt.s32.totalorder %v5745_v5, %v3156_v58  ;;  %v1646_v46 = vmax.f32 %v1642_v22, %v1645_v34  ;;  %v5752_v53 = vld [vmem:[#allocation86_spill] sm:$0xff]  ;;  %v352_v22 = vld [vmem:[%s2508_s27 + $0x5a0] sm:$0xff]  ;;  %vm5764_vm15 = vmmov %vm5743_vm1 }
 0x12d   : > { %v1226_v19 = vsel %vm5744_vm8, %v346_v41, -inf  ;;  %v1285_v42 = vsel %vm5746_vm4, %v405_v47, -inf  ;;  %v1651_v45 = vsel %vm5747_vm3, %v1279_v44, -inf  ;;  %v1385_v29 = vmax.f32 %v1224_v54, %v1384_v38  ;;  %v415_v41 = vld [vmem:[%s2508_s27 + $0x798] sm:$0xff]  ;;  %v417_v38 = vld [vmem:[%s2508_s27 + $0x7a8] sm:$0xff]  ;;  %vm5768_vm4 = vmmov %vm5747_vm3 }
 0x12e   : > { %vm5749_vm12 = vcmp.lt.s32.totalorder %v5748_v18, %v3156_v58  ;;  %v1648_v57 = vmax.f32 %v1644_v49, %v1647_v60  ;;  %v1653_v35 = vsel %vm5750_vm5, %v1281_v26, -inf  ;;  %vm5751_vm13 = vcmp.lt.s32.totalorder %v5647_v15, %v3156_v58  ;;  %v5755_v60 = vld [vmem:[#allocation32_spill] sm:$0xff] }
 0x12f   : > { %v1287_v50 = vsel %vm5749_vm12, %v407_v1, -inf  ;;  %v1228_v47 = vsel %vm5751_vm13, %v348_v3, -inf  ;;  %vm5753_vm0 = vcmp.lt.s32.totalorder %v5752_v53, %v3156_v58  ;;  %v1650_v34 = vmax.f32 %v1646_v46, %v1649_v55  ;;  %v419_v3 = vld [vmem:[%s2508_s27 + $0x7b8] sm:$0xff]  ;;  %v354_v46 = vld [vmem:[%s2508_s27 + $0x5b0] sm:$0xff]  ;;  %vm5771_vm12 = vmmov %vm5768_vm4 }
 0x130   : > { %v1289_v44 = vsel %vm5753_vm0, %v409_v11, -inf  ;;  %v1655_v54 = vsel %vm5754_vm6, %v1283_v4, -inf  ;;  %v1386_v1 = vmax.f32 %v1226_v19, %v1385_v29  ;;  %vm5756_vm7 = vcmp.lt.s32.totalorder %v5755_v60, %v3156_v58  ;;  %v5759_v11 = vld [vmem:[#allocation87_spill] sm:$0xff]  ;;  %v421_v29 = vld [vmem:[%s2508_s27 + $0x7c8] sm:$0xff]  ;;  %vm5775_vm0 = vmmov %vm5768_vm4 }
 0x131   : > { %v1291_v26 = vsel %vm5756_vm7, %v411_v61, -inf  ;;  %v1652_v49 = vmax.f32 %v1648_v57, %v1651_v45  ;;  %v1657_v15 = vsel %vm5757_vm9, %v1285_v42, -inf  ;;  %vm5758_vm2 = vcmp.lt.s32.totalorder %v5650_v52, %v3156_v58  ;;  %v5762_v61 = vld [vmem:[#allocation88_spill] sm:$0xff]  ;;  %vm5776_vm6 = vmmov %vm5775_vm0 }
 0x132   : > { %v1230_v9 = vsel %vm5758_vm2, %v350_v43, -inf  ;;  %vm5760_vm10 = vcmp.lt.s32.totalorder %v5759_v11, %v3156_v58  ;;  %v1654_v55 = vmax.f32 %v1650_v34, %v1653_v35  ;;  %v1659_v19 = vsel %vm5761_vm11, %v1287_v50, -inf  ;;  %v5766_v43 = vld [vmem:[#allocation34_spill] sm:$0xff]  ;;  %vm5778_vm9 = vmmov %vm5775_vm0 }
 0x133   : > { %v1293_v4 = vsel %vm5760_vm10, %v413_v8, -inf  ;;  %v1387_v59 = vmax.f32 %v1228_v47, %v1386_v1  ;;  %vm5763_vm14 = vcmp.lt.s32.totalorder %v5762_v61, %v3156_v58  ;;  %v1656_v45 = vmax.f32 %v1652_v49, %v1655_v54  ;;  %v356_v47 = vld [vmem:[%s2508_s27 + $0x5c0] sm:$0xff]  ;;  %vm5779_vm2 = vmmov %vm5775_vm0 }
 0x134   : > { %v1295_v42 = vsel %vm5763_vm14, %v415_v41, -inf  ;;  %v1661_v57 = vsel %vm5764_vm15, %v1289_v44, -inf  ;;  %vm5765_vm1 = vcmp.lt.s32.totalorder %v5654_v48, %v3156_v58  ;;  %vm5767_vm8 = vcmp.lt.s32.totalorder %v5766_v43, %v3156_v58  ;;  %v5769_v1 = vld [vmem:[#allocation35_spill] sm:$0xff] }
 0x135   : > { %v1232_v52 = vsel %vm5765_vm1, %v352_v22, -inf  ;;  %v1297_v8 = vsel %vm5767_vm8, %v417_v38, -inf  ;;  %v1658_v50 = vmax.f32 %v1654_v55, %v1657_v15  ;;  %v1663_v35 = vsel %vm5768_vm4, %v1291_v26, -inf  ;;  %v5773_v22 = vld [vmem:[#allocation89_spill] sm:$0xff]  ;;  %vm5785_vm8 = vmmov %vm5775_vm0 }
 0x136   : > { %v1388_v34 = vmax.f32 %v1230_v9, %v1387_v59  ;;  %vm5770_vm3 = vcmp.lt.s32.totalorder %v5769_v1, %v3156_v58  ;;  %v1660_v54 = vmax.f32 %v1656_v45, %v1659_v19  ;;  %v1665_v44 = vsel %vm5771_vm12, %v1293_v4, -inf  ;;  %v358_v59 = vld [vmem:[%s2508_s27 + $0x5d0] sm:$0xff]  ;;  %v360_v19 = vld [vmem:[%s2508_s27 + $0x5e0] sm:$0xff] }
 0x137   : > { %v1299_v41 = vsel %vm5770_vm3, %v419_v3, -inf  ;;  %vm5772_vm5 = vcmp.lt.s32.totalorder %v5657_v30, %v3156_v58  ;;  %vm5774_vm13 = vcmp.lt.s32.totalorder %v5773_v22, %v3156_v58  ;;  %v1662_v26 = vmax.f32 %v1658_v50, %v1661_v57 }
 0x138   : > { %v1234_v48 = vsel %vm5772_vm5, %v354_v46, -inf  ;;  %v1301_v38 = vsel %vm5774_vm13, %v421_v29, -inf  ;;  %v1667_v49 = vsel %vm5775_vm0, %v1295_v42, -inf  ;;  %v1389_v9 = vmax.f32 %v1232_v52, %v1388_v34  ;;  %v362_v52 = vld [vmem:[%s2508_s27 + $0x5f0] sm:$0xff] }
 0x139   : > { %v1664_v15 = vmax.f32 %v1660_v54, %v1663_v35  ;;  %v1669_v3 = vsel %vm5776_vm6, %v1297_v8, -inf  ;;  %vm5777_vm7 = vcmp.lt.s32.totalorder %v5661_v62, %v3156_v58  ;;  %v1666_v30 = vmax.f32 %v1662_v26, %v1665_v44  ;;  %v366_v44 = vld [vmem:[%s2508_s27 + $0x610] sm:$0xff]  ;;  %v368_v26 = vld [vmem:[%s2508_s27 + $0x620] sm:$0xff] }
 0x13a   : > { %v1236_v4 = vsel %vm5777_vm7, %v356_v47, -inf  ;;  %v1671_v55 = vsel %vm5778_vm9, %v1299_v41, -inf  ;;  %v1390_v46 = vmax.f32 %v1234_v48, %v1389_v9  ;;  %v1673_v45 = vsel %vm5779_vm2, %v1301_v38, -inf  ;;  %v364_v47 = vld [vmem:[%s2508_s27 + $0x600] sm:$0xff]  ;;  %v1677_v41 = vld [vmem:[#allocation2 + $0x8] sm:$0xff] }
 0x13b   : > { %v1668_v29 = vmax.f32 %v1664_v15, %v1667_v49  ;;  %vm5780_vm10 = vcmp.lt.s32.totalorder %v5664_v23, %v3156_v58  ;;  %v1670_v57 = vmax.f32 %v1666_v30, %v1669_v3  ;;  %vm5781_vm11 = vcmp.lt.s32.totalorder %v5668_v32, %v3156_v58  ;;  %v374_v30 = vld [vmem:[%s2508_s27 + $0x650] sm:$0xff] }
 0x13c   : > { %v1238_v42 = vsel %vm5780_vm10, %v358_v59, -inf  ;;  %v1391_v8 = vmax.f32 %v1236_v4, %v1390_v46  ;;  %v1240_v62 = vsel %vm5781_vm11, %v360_v19, -inf  ;;  %vm5782_vm14 = vcmp.lt.s32.totalorder %v5671_v56, %v3156_v58  ;;  %v370_v56 = vld [vmem:[%s2508_s27 + $0x630] sm:$0xff]  ;;  %v376_v19 = vld [vmem:[%s2508_s27 + $0x660] sm:$0xff] }
 0x13d   : > { %v1672_v50 = vmax.f32 %v1668_v29, %v1671_v55  ;;  %v1674_v35 = vmax.f32 %v1670_v57, %v1673_v45  ;;  %v1242_v23 = vsel %vm5782_vm14, %v362_v52, -inf  ;;  %vm5783_vm15 = vcmp.lt.s32.totalorder %v5675_v17, %v3156_v58  ;;  %v372_v17 = vld [vmem:[%s2508_s27 + $0x640] sm:$0xff]  ;;  %v378_v29 = vld [vmem:[%s2508_s27 + $0x670] sm:$0xff] }
 0x13e   : > { %v1392_v34 = vmax.f32 %v1238_v42, %v1391_v8  ;;  %v1244_v32 = vsel %vm5783_vm15, %v364_v47, -inf  ;;  %vm5784_vm1 = vcmp.lt.s32.totalorder %v5678_v36, %v3156_v58  ;;  %vm5786_vm4 = vcmp.lt.s32.totalorder %v5682_v0, %v3156_v58  ;;  %v380_v42 = vld [vmem:[%s2508_s27 + $0x680] sm:$0xff]  ;;  %v382_v52 = vld [vmem:[%s2508_s27 + $0x690] sm:$0xff] }
 0x13f   : > { %v1675_v54 = vmax.f32 %v1674_v35, %v1672_v50  ;;  %v1246_v59 = vsel %vm5784_vm1, %v366_v44, -inf  ;;  %v1248_v15 = vsel %vm5786_vm4, %v368_v26, -inf  ;;  %vm5787_vm3 = vcmp.lt.s32.totalorder %v5685_v20, %v3156_v58  ;;  %v384_v50 = vld [vmem:[%s2508_s27 + $0x6a0] sm:$0xff]  ;;  %v386_v35 = vld [vmem:[%s2508_s27 + $0x6b0] sm:$0xff] }
 0x140   : > { %v1393_v48 = vmax.f32 %v1240_v62, %v1392_v34  ;;  %v1250_v4 = vsel %vm5787_vm3, %v370_v56, -inf  ;;  %vm5788_vm12 = vcmp.lt.s32.totalorder %v5689_v10, %v3156_v58  ;;  %vm5789_vm5 = vcmp.lt.s32.totalorder %v5692_v25, %v3156_v58  ;;  %v388_v34 = vld [vmem:[%s2508_s27 + $0x6c0] sm:$0xff] }
 0x141   : > { %v1679_v38 = vmax.f32 %v1677_v41, %v1675_v54  ;;  %v1252_v55 = vsel %vm5788_vm12, %v372_v17, -inf  ;;  %v1254_v0 = vsel %vm5789_vm5, %v374_v30, -inf  ;;  %vm5790_vm13 = vcmp.lt.s32.totalorder %v5696_v13, %v3156_v58  ;;  %v392_v44 = vld [vmem:[%s2508_s27 + $0x6e0] sm:$0xff]  ;;  %v402_v17 = vld [vmem:[%s2508_s27 + $0x730] sm:$0xff] }
 0x142   : > { %v1394_v49 = vmax.f32 %v1242_v23, %v1393_v48  ;;  %v1256_v20 = vsel %vm5790_vm13, %v376_v19, -inf  ;;  %vm5791_vm0 = vcmp.lt.s32.totalorder %v5699_v6, %v3156_v58  ;;  %vm5792_vm6 = vcmp.lt.s32.totalorder %v5703_v40, %v3156_v58  ;;  %v390_v23 = vld [vmem:[%s2508_s27 + $0x6d0] sm:$0xff]  ;;  %v396_v26 = vld [vmem:[%s2508_s27 + $0x700] sm:$0xff] }
 0x143   : > { %1681 = vst.msk [vmem:[#allocation2 + $0x8] sm:$0xff] %vm5785_vm8, %v1679_v38  ;;  %v1258_v10 = vsel %vm5791_vm0, %v378_v29, -inf  ;;  %v1260_v25 = vsel %vm5792_vm6, %v380_v42, -inf  ;;  %vm5793_vm7 = vcmp.lt.s32.totalorder %v5706_v12, %v3156_v58  ;;  %vm5794_vm9 = vcmp.lt.s32.totalorder %v5710_v39, %v3156_v58  ;;  %v408_v19 = vld [vmem:[%s2508_s27 + $0x760] sm:$0xff]  ;;  %v414_v42 = vld [vmem:[%s2508_s27 + $0x790] sm:$0xff] }
 0x144   : > { %v1395_v9 = vmax.f32 %v1244_v32, %v1394_v49  ;;  %v1262_v13 = vsel %vm5793_vm7, %v382_v52, -inf  ;;  %v1264_v6 = vsel %vm5794_vm9, %v384_v50, -inf  ;;  %vm5795_vm2 = vcmp.lt.s32.totalorder %v5713_v2, %v3156_v58  ;;  %v394_v32 = vld [vmem:[%s2508_s27 + $0x6f0] sm:$0xff] }
 0x145   : > { %v1266_v40 = vsel %vm5795_vm2, %v386_v35, -inf  ;;  %vm5796_vm10 = vcmp.lt.s32.totalorder %v5717_v16, %v3156_v58  ;;  %vm5797_vm11 = vcmp.lt.s32.totalorder %v5720_v28, %v3156_v58  ;;  %vm5798_vm14 = vcmp.lt.s32.totalorder %v5724_v7, %v3156_v58 }
 0x146   : > { %v1396_v3 = vmax.f32 %v1246_v59, %v1395_v9  ;;  %v1268_v12 = vsel %vm5796_vm10, %v388_v34, -inf  ;;  %v1270_v39 = vsel %vm5797_vm11, %v390_v23, -inf  ;;  %v1272_v2 = vsel %vm5798_vm14, %v392_v44, -inf  ;;  %v398_v59 = vld [vmem:[%s2508_s27 + $0x710] sm:$0xff]  ;;  %v400_v9 = vld [vmem:[%s2508_s27 + $0x720] sm:$0xff] }
 0x147   : > { %vm5799_vm15 = vcmp.lt.s32.totalorder %v5727_v33, %v3156_v58  ;;  %vm5800_vm1 = vcmp.lt.s32.totalorder %v5731_v27, %v3156_v58  ;;  %vm5801_vm8 = vcmp.lt.s32.totalorder %v5734_v24, %v3156_v58  ;;  %vm5802_vm4 = vcmp.lt.s32.totalorder %v5738_v51, %v3156_v58 }
 0x148   : > { %v1397_v36 = vmax.f32 %v1248_v15, %v1396_v3  ;;  %v1274_v16 = vsel %vm5799_vm15, %v394_v32, -inf  ;;  %v1276_v28 = vsel %vm5800_vm1, %v396_v26, -inf  ;;  %v1278_v7 = vsel %vm5801_vm8, %v398_v59, -inf }
 0x149   : > { %v1280_v33 = vsel %vm5802_vm4, %v400_v9, -inf  ;;  %vm5803_vm3 = vcmp.lt.s32.totalorder %v5741_v37, %v3156_v58  ;;  %vm5804_vm12 = vcmp.lt.s32.totalorder %v5745_v5, %v3156_v58  ;;  %vm5805_vm5 = vcmp.lt.s32.totalorder %v5748_v18, %v3156_v58 }
 0x14a   : > { %v1398_v46 = vmax.f32 %v1250_v4, %v1397_v36  ;;  %v404_v4 = vld [vmem:[%s2508_s27 + $0x740] sm:$0xff]  ;;  %v1282_v27 = vsel %vm5803_vm3, %v402_v17, -inf  ;;  %v406_v36 = vld [vmem:[%s2508_s27 + $0x750] sm:$0xff]  ;;  %vm5806_vm13 = vcmp.lt.s32.totalorder %v5752_v53, %v3156_v58  ;;  %vm5807_vm0 = vcmp.lt.s32.totalorder %v5755_v60, %v3156_v58 }
 0x14b   : > { %v1284_v24 = vsel %vm5804_vm12, %v404_v4, -inf  ;;  %v1286_v51 = vsel %vm5805_vm5, %v406_v36, -inf  ;;  %v1288_v37 = vsel %vm5806_vm13, %v408_v19, -inf  ;;  %vm5808_vm6 = vcmp.lt.s32.totalorder %v5759_v11, %v3156_v58  ;;  %v418_v53 = vld [vmem:[%s2508_s27 + $0x7b0] sm:$0xff]  ;;  %v420_v60 = vld [vmem:[%s2508_s27 + $0x7c0] sm:$0xff] }
 0x14c   : > { %v1399_v45 = vmax.f32 %v1252_v55, %v1398_v46  ;;  %vm5809_vm7 = vcmp.lt.s32.totalorder %v5762_v61, %v3156_v58  ;;  %vm5810_vm9 = vcmp.lt.s32.totalorder %v5766_v43, %v3156_v58  ;;  %vm5811_vm2 = vcmp.lt.s32.totalorder %v5769_v1, %v3156_v58 }
 0x14d   : > { %vm5812_vm10 = vcmp.lt.s32.totalorder %v5773_v22, %v3156_v58  ;;  %v5814_v43 = vmax.f32 %v3657_v63, %v3676_v14 }
 0x14e   : > { %v1400_v57 = vmax.f32 %v1254_v0, %v1399_v45  ;;  %v410_v0 = vld [vmem:[%s2508_s27 + $0x770] sm:$0xff]  ;;  %v412_v45 = vld [vmem:[%s2508_s27 + $0x780] sm:$0xff]  ;;  %v1300_v35 = vsel %vm5812_vm10, %v420_v60, -inf }
 0x14f   : > { %v1290_v5 = vsel %vm5807_vm0, %v410_v0, -inf  ;;  %v1292_v18 = vsel %vm5808_vm6, %v412_v45, -inf }
 0x150   : > { %v1401_v8 = vmax.f32 %v1256_v20, %v1400_v57 }
 0x152   : > { %v1402_v62 = vmax.f32 %v1258_v10, %v1401_v8  ;;  %v416_v10 = vld [vmem:[%s2508_s27 + $0x7a0] sm:$0xff]  ;;  %v1294_v8 = vsel %vm5809_vm7, %v414_v42, -inf }
 0x153   : > { %v1296_v50 = vsel %vm5810_vm9, %v416_v10, -inf }
 0x154   : > { %v1403_v47 = vmax.f32 %v1260_v25, %v1402_v62 }
 0x156   : > { %v1404_v41 = vmax.f32 %v1262_v13, %v1403_v47  ;;  %v1298_v13 = vsel %vm5811_vm2, %v418_v53, -inf }
 0x158   : > { %v1405_v54 = vmax.f32 %v1264_v6, %v1404_v41  ;;  %v5813_v6 = vmax.f32 %v5569_v31, %v3670_v21  ;;  %v1676_v41 = vld [vmem:[#allocation2] sm:$0xff] }
 0x15a   : > { %v1406_v48 = vmax.f32 %v1266_v40, %v1405_v54 }
 0x15c   : > { %v1407_v38 = vmax.f32 %v1268_v12, %v1406_v48 }
 0x15e   : > { %v1408_v49 = vmax.f32 %v1270_v39, %v1407_v38 }
 0x160   : > { %v1409_v56 = vmax.f32 %v1272_v2, %v1408_v49 }
 0x162   : > { %v1410_v15 = vmax.f32 %v1274_v16, %v1409_v56 }
 0x164   : > { %v1411_v3 = vmax.f32 %v1276_v28, %v1410_v15 }
 0x166   : > { %v1412_v30 = vmax.f32 %v1278_v7, %v1411_v3 }
 0x168   : > { %v1413_v55 = vmax.f32 %v1280_v33, %v1412_v30 }
 0x16a   : > { %v1414_v46 = vmax.f32 %v1282_v27, %v1413_v55 }
 0x16c   : > { %v1415_v29 = vmax.f32 %v1284_v24, %v1414_v46 }
 0x16e   : > { %v1416_v20 = vmax.f32 %v1286_v51, %v1415_v29 }
 0x170   : > { %v1417_v57 = vmax.f32 %v1288_v37, %v1416_v20 }
 0x172   : > { %v1418_v52 = vmax.f32 %v1290_v5, %v1417_v57 }
 0x174   : > { %v1419_v25 = vmax.f32 %v1292_v18, %v1418_v52 }
 0x176   : > { %v1420_v62 = vmax.f32 %v1294_v8, %v1419_v25 }
 0x178   : > { %v1421_v11 = vmax.f32 %v1296_v50, %v1420_v62 }
 0x17a   : > { %v1422_v47 = vmax.f32 %v1298_v13, %v1421_v11 }
 0x17c   : > { %v1423_v61 = vmax.f32 %v1300_v35, %v1422_v47 }
 0x17e   : > { %v1424_v34 = vmax.f32 %v5813_v6, %v1423_v61 }
 0x180   : > { %v1425_v40 = vmax.f32 %v1424_v34, %v5814_v43 }
 0x182   : > { %v1678_v23 = vmax.f32 %v1676_v41, %v1425_v40 }
 0x184   : > { %1680 = vst [vmem:[#allocation2] sm:$0xff] %v1678_v23 }
 0x185 PF: > { %p2397_p8 = scmp.gt.s32.totalorder %s2498_s20, %s2494_s15 }
 0x186   : > { %v1687_v58 = vld [vmem:[%s2508_s27 + $0x8] sm:$0xff] (!%p2397_p8)  ;;  %v1689_v63 = vld [vmem:[%s2508_s27 + $0x18] sm:$0xff] (!%p2397_p8)  ;;  %vm5815_vm11 = vcmask (!%p2397_p8), 588800   ;;  %v1694_v1 = vld [vmem:[%s2508_s27 + $0x40] sm:$0xff] (!%p2397_p8) }
 0x187   : > { %1685 = sbr.rel (%p2397_p8) target bundleno = 640 (0x280), region = 36  ;;  %v1691_v21 = vld [vmem:[%s2508_s27 + $0x28] sm:$0xff] (!%p2397_p8)  ;;  %v2061_v14 = vsel (!%p2397_p8), %vm5815_vm11, %v1687_v58, -inf  ;;  %v1693_v31 = vld [vmem:[%s2508_s27 + $0x38] sm:$0xff] (!%p2397_p8)  ;;  %vm5816_vm14 = vmmov (!%p2397_p8), %vm5815_vm11 }
 0x188   : > { %v2062_v22 = vsel (!%p2397_p8), %vm5816_vm14, %v1689_v63, -inf  ;;  %vm5817_vm15 = vmmov (!%p2397_p8), %vm5815_vm11  ;;  %v1695_v12 = vld [vmem:[%s2508_s27 + $0x48] sm:$0xff] (!%p2397_p8)  ;;  %v1696_v44 = vld [vmem:[%s2508_s27 + $0x50] sm:$0xff] (!%p2397_p8) }
 0x189   : > { %v2063_v54 = vsel (!%p2397_p8), %vm5817_vm15, %v1691_v21, -inf  ;;  %v1697_v48 = vld [vmem:[%s2508_s27 + $0x58] sm:$0xff] (!%p2397_p8)  ;;  %vm5818_vm1 = vmmov (!%p2397_p8), %vm5815_vm11  ;;  %v1938_v38 = vmax.f32 (!%p2397_p8), %v1696_v44, %v1694_v1  ;;  %v1698_v2 = vld [vmem:[%s2508_s27 + $0x60] sm:$0xff] (!%p2397_p8) }
 0x18a   : > { %v2064_v39 = vmax.f32 (!%p2397_p8), %v2061_v14, %v2063_v54  ;;  %v2065_v32 = vsel (!%p2397_p8), %vm5818_vm1, %v1693_v31, -inf  ;;  %v1699_v26 = vld [vmem:[%s2508_s27 + $0x68] sm:$0xff] (!%p2397_p8)  ;;  %vm5819_vm8 = vmmov (!%p2397_p8), %vm5818_vm1  ;;  %v1700_v56 = vld [vmem:[%s2508_s27 + $0x70] sm:$0xff] (!%p2397_p8) }
 0x18b   : > { %v2066_v49 = vmax.f32 (!%p2397_p8), %v2062_v22, %v2065_v32  ;;  %v2067_v16 = vsel (!%p2397_p8), %vm5819_vm8, %v1695_v12, -inf  ;;  %vm5820_vm4 = vmmov (!%p2397_p8), %vm5818_vm1  ;;  %v1701_v28 = vld [vmem:[%s2508_s27 + $0x78] sm:$0xff] (!%p2397_p8)  ;;  %v1703_v9 = vld [vmem:[%s2508_s27 + $0x88] sm:$0xff] (!%p2397_p8)  ;;  %v1939_v17 = vmax.f32 (!%p2397_p8), %v1698_v2, %v1938_v38 }
 0x18c   : > { %v2069_v59 = vsel (!%p2397_p8), %vm5820_vm4, %v1697_v48, -inf  ;;  %v2068_v15 = vmax.f32 (!%p2397_p8), %v2064_v39, %v2067_v16  ;;  %vm5821_vm3 = vmmov (!%p2397_p8), %vm5818_vm1  ;;  %v1705_v3 = vld [vmem:[%s2508_s27 + $0x98] sm:$0xff] (!%p2397_p8)  ;;  %v1702_v27 = vld [vmem:[%s2508_s27 + $0x80] sm:$0xff] (!%p2397_p8) }
 0x18d   : > { %v2071_v7 = vsel (!%p2397_p8), %vm5821_vm3, %v1699_v26, -inf  ;;  %v2070_v33 = vmax.f32 (!%p2397_p8), %v2066_v49, %v2069_v59  ;;  %vm5822_vm12 = vmmov (!%p2397_p8), %vm5818_vm1  ;;  %v1707_v36 = vld [vmem:[%s2508_s27 + $0xa8] sm:$0xff] (!%p2397_p8)  ;;  %v1709_v55 = vld [vmem:[%s2508_s27 + $0xb8] sm:$0xff] (!%p2397_p8)  ;;  %v1940_v46 = vmax.f32 (!%p2397_p8), %v1700_v56, %v1939_v17 }
 0x18e   : > { %v2073_v4 = vsel %vm5822_vm12, %v1701_v28, -inf  ;;  %vm5823_vm5 = vmmov %vm5818_vm1  ;;  %v2072_v24 = vmax.f32 %v2068_v15, %v2071_v7  ;;  %v1711_v51 = vld [vmem:[%s2508_s27 + $0xc8] sm:$0xff]  ;;  %v1704_v37 = vld [vmem:[%s2508_s27 + $0x90] sm:$0xff] }
 0x18f   : > { %v2075_v30 = vsel %vm5823_vm5, %v1703_v9, -inf  ;;  %vm5824_vm13 = vmmov %vm5818_vm1  ;;  %v2074_v0 = vmax.f32 %v2070_v33, %v2073_v4  ;;  %v1713_v45 = vld [vmem:[%s2508_s27 + $0xd8] sm:$0xff]  ;;  %v1715_v20 = vld [vmem:[%s2508_s27 + $0xe8] sm:$0xff]  ;;  %v1941_v57 = vmax.f32 %v1702_v27, %v1940_v46 }
 0x190   : > { %v2077_v19 = vsel %vm5824_vm13, %v1705_v3, -inf  ;;  %vm5825_vm0 = vmmov %vm5818_vm1  ;;  %v2076_v5 = vmax.f32 %v2072_v24, %v2075_v30  ;;  %v1717_v18 = vld [vmem:[%s2508_s27 + $0xf8] sm:$0xff]  ;;  %v1706_v8 = vld [vmem:[%s2508_s27 + $0xa0] sm:$0xff] }
 0x191   : > { %v2079_v29 = vsel %vm5825_vm0, %v1707_v36, -inf  ;;  %vm5826_vm6 = vmmov %vm5825_vm0  ;;  %v2078_v10 = vmax.f32 %v2074_v0, %v2077_v19  ;;  %v1719_v53 = vld [vmem:[%s2508_s27 + $0x108] sm:$0xff]  ;;  %v1942_v60 = vmax.f32 %v1704_v37, %v1941_v57  ;;  %v1721_v62 = vld [vmem:[%s2508_s27 + $0x118] sm:$0xff] }
 0x192   : > { %v2081_v42 = vsel %vm5826_vm6, %v1709_v55, -inf  ;;  %vm5827_vm7 = vmmov %vm5825_vm0  ;;  %v2080_v25 = vmax.f32 %v2076_v5, %v2079_v29  ;;  %v1708_v35 = vld [vmem:[%s2508_s27 + $0xb0] sm:$0xff]  ;;  %v1723_v47 = vld [vmem:[%s2508_s27 + $0x128] sm:$0xff] }
 0x193   : > { %v2083_v52 = vsel %vm5827_vm7, %v1711_v51, -inf  ;;  %vm5828_vm9 = vmmov %vm5825_vm0  ;;  %v2082_v13 = vmax.f32 %v2078_v10, %v2081_v42  ;;  %v1943_v34 = vmax.f32 %v1706_v8, %v1942_v60  ;;  %v1725_v41 = vld [vmem:[%s2508_s27 + $0x138] sm:$0xff]  ;;  %v1710_v23 = vld [vmem:[%s2508_s27 + $0xc0] sm:$0xff] }
 0x194   : > { %v2085_v50 = vsel %vm5828_vm9, %v1713_v45, -inf  ;;  %vm5829_vm2 = vmmov %vm5825_vm0  ;;  %v2084_v61 = vmax.f32 %v2080_v25, %v2083_v52  ;;  %v1727_v58 = vld [vmem:[%s2508_s27 + $0x148] sm:$0xff]  ;;  %v1729_v31 = vld [vmem:[%s2508_s27 + $0x158] sm:$0xff] }
 0x195   : > { %v2087_v11 = vsel %vm5829_vm2, %v1715_v20, -inf  ;;  %vm5830_vm10 = vmmov %vm5825_vm0  ;;  %v2086_v43 = vmax.f32 %v2082_v13, %v2085_v50  ;;  %v1944_v14 = vmax.f32 %v1708_v35, %v1943_v34  ;;  %v1712_v54 = vld [vmem:[%s2508_s27 + $0xd0] sm:$0xff]  ;;  %v1731_v12 = vld [vmem:[%s2508_s27 + $0x168] sm:$0xff] }
 0x196   : > { %v2089_v6 = vsel %vm5830_vm10, %v1717_v18, -inf  ;;  %vm5831_vm11 = vmmov %vm5825_vm0  ;;  %v2088_v63 = vmax.f32 %v2084_v61, %v2087_v11  ;;  %v1733_v32 = vld [vmem:[%s2508_s27 + $0x178] sm:$0xff]  ;;  %v1714_v26 = vld [vmem:[%s2508_s27 + $0xe0] sm:$0xff] }
 0x197   : > { %v2091_v40 = vsel %vm5831_vm11, %v1719_v53, -inf  ;;  %vm5832_vm14 = vmmov %vm5825_vm0  ;;  %v2090_v1 = vmax.f32 %v2086_v43, %v2089_v6  ;;  %v1945_v39 = vmax.f32 %v1710_v23, %v1944_v14  ;;  %v1735_v49 = vld [vmem:[%s2508_s27 + $0x188] sm:$0xff]  ;;  %v1737_v28 = vld [vmem:[%s2508_s27 + $0x198] sm:$0xff] }
 0x198   : > { %v2093_v21 = vsel %vm5832_vm14, %v1721_v62, -inf  ;;  %vm5833_vm15 = vmmov %vm5825_vm0  ;;  %v2092_v44 = vmax.f32 %v2088_v63, %v2091_v40  ;;  %v1716_v7 = vld [vmem:[%s2508_s27 + $0xf0] sm:$0xff]  ;;  %v1739_v17 = vld [vmem:[%s2508_s27 + $0x1a8] sm:$0xff] }
 0x199   : > { %v2095_v22 = vsel %vm5833_vm15, %v1723_v47, -inf  ;;  %vm5834_vm1 = vmmov %vm5825_vm0  ;;  %v2094_v38 = vmax.f32 %v2090_v1, %v2093_v21  ;;  %v1946_v56 = vmax.f32 %v1712_v54, %v1945_v39  ;;  %v1741_v30 = vld [vmem:[%s2508_s27 + $0x1b8] sm:$0xff]  ;;  %v1718_v55 = vld [vmem:[%s2508_s27 + $0x100] sm:$0xff]  ;;  %v2111_v37 = vsel %vm5825_vm0, %v1739_v17, -inf }
 0x19a   : > { %v2097_v48 = vsel %vm5834_vm1, %v1725_v41, -inf  ;;  %vm5835_vm8 = vmmov %vm5825_vm0  ;;  %v2096_v16 = vmax.f32 %v2092_v44, %v2095_v22  ;;  %v1743_v24 = vld [vmem:[%s2508_s27 + $0x1c8] sm:$0xff]  ;;  %v1745_v0 = vld [vmem:[%s2508_s27 + $0x1d8] sm:$0xff] }
 0x19b   : > { %v2099_v2 = vsel %vm5835_vm8, %v1727_v58, -inf  ;;  %vm5836_vm4 = vmmov %vm5825_vm0  ;;  %v2098_v9 = vmax.f32 %v2094_v38, %v2097_v48  ;;  %v1947_v4 = vmax.f32 %v1714_v26, %v1946_v56  ;;  %v1720_v45 = vld [vmem:[%s2508_s27 + $0x110] sm:$0xff]  ;;  %v1747_v20 = vld [vmem:[%s2508_s27 + $0x1e8] sm:$0xff] }
 0x19c   : > { %v2101_v59 = vsel %vm5836_vm4, %v1729_v31, -inf  ;;  %vm5837_vm3 = vmmov %vm5825_vm0  ;;  %v2100_v3 = vmax.f32 %v2096_v16, %v2099_v2  ;;  %v1749_v18 = vld [vmem:[%s2508_s27 + $0x1f8] sm:$0xff]  ;;  %v1722_v8 = vld [vmem:[%s2508_s27 + $0x120] sm:$0xff] }
 0x19d   : > { %v2103_v15 = vsel %vm5837_vm3, %v1731_v12, -inf  ;;  %vm5838_vm12 = vmmov %vm5825_vm0  ;;  %v2102_v27 = vmax.f32 %v2098_v9, %v2101_v59  ;;  %v1948_v51 = vmax.f32 %v1716_v7, %v1947_v4  ;;  %v1751_v53 = vld [vmem:[%s2508_s27 + $0x208] sm:$0xff]  ;;  %v1753_v62 = vld [vmem:[%s2508_s27 + $0x218] sm:$0xff] }
 0x19e   : > { %v2105_v33 = vsel %vm5838_vm12, %v1733_v32, -inf  ;;  %vm5839_vm5 = vmmov %vm5825_vm0  ;;  %v2104_v19 = vmax.f32 %v2100_v3, %v2103_v15  ;;  %v1724_v35 = vld [vmem:[%s2508_s27 + $0x130] sm:$0xff]  ;;  %v1755_v47 = vld [vmem:[%s2508_s27 + $0x228] sm:$0xff] }
 0x19f   : > { %v2107_v36 = vsel %vm5839_vm5, %v1735_v49, -inf  ;;  %vm5840_vm13 = vmmov %vm5825_vm0  ;;  %v2106_v29 = vmax.f32 %v2102_v27, %v2105_v33  ;;  %v1949_v57 = vmax.f32 %v1718_v55, %v1948_v51  ;;  %v1757_v41 = vld [vmem:[%s2508_s27 + $0x238] sm:$0xff]  ;;  %v1726_v23 = vld [vmem:[%s2508_s27 + $0x140] sm:$0xff] }
 0x1a0   : > { %v2109_v46 = vsel %vm5840_vm13, %v1737_v28, -inf  ;;  %v2108_v5 = vmax.f32 %v2104_v19, %v2107_v36  ;;  %vm5841_vm6 = vmmov %vm5825_vm0  ;;  %v1759_v58 = vld [vmem:[%s2508_s27 + $0x248] sm:$0xff]  ;;  %v1761_v31 = vld [vmem:[%s2508_s27 + $0x258] sm:$0xff] }
 0x1a1   : > { %v2113_v42 = vsel %vm5841_vm6, %v1741_v30, -inf  ;;  %v2110_v10 = vmax.f32 %v2106_v29, %v2109_v46  ;;  %vm5842_vm7 = vmmov %vm5825_vm0  ;;  %v1950_v60 = vmax.f32 %v1720_v45, %v1949_v57  ;;  %v1728_v54 = vld [vmem:[%s2508_s27 + $0x150] sm:$0xff]  ;;  %v1763_v12 = vld [vmem:[%s2508_s27 + $0x268] sm:$0xff] }
 0x1a2   : > { %v2115_v52 = vsel %vm5842_vm7, %v1743_v24, -inf  ;;  %v2112_v25 = vmax.f32 %v2108_v5, %v2111_v37  ;;  %vm5843_vm9 = vmmov %vm5825_vm0  ;;  %v1765_v32 = vld [vmem:[%s2508_s27 + $0x278] sm:$0xff]  ;;  %v1730_v26 = vld [vmem:[%s2508_s27 + $0x160] sm:$0xff] }
 0x1a3   : > { %v2117_v50 = vsel %vm5843_vm9, %v1745_v0, -inf  ;;  %v2114_v13 = vmax.f32 %v2110_v10, %v2113_v42  ;;  %vm5844_vm2 = vmmov %vm5825_vm0  ;;  %v1951_v34 = vmax.f32 %v1722_v8, %v1950_v60  ;;  %v1767_v49 = vld [vmem:[%s2508_s27 + $0x288] sm:$0xff]  ;;  %v1769_v28 = vld [vmem:[%s2508_s27 + $0x298] sm:$0xff] }
 0x1a4   : > { %v2119_v11 = vsel %vm5844_vm2, %v1747_v20, -inf  ;;  %v2116_v61 = vmax.f32 %v2112_v25, %v2115_v52  ;;  %vm5845_vm10 = vmmov %vm5825_vm0  ;;  %v1732_v7 = vld [vmem:[%s2508_s27 + $0x170] sm:$0xff]  ;;  %v1771_v17 = vld [vmem:[%s2508_s27 + $0x2a8] sm:$0xff] }
 0x1a5   : > { %v2121_v6 = vsel %vm5845_vm10, %v1749_v18, -inf  ;;  %v2118_v43 = vmax.f32 %v2114_v13, %v2117_v50  ;;  %vm5846_vm11 = vmmov %vm5825_vm0  ;;  %v1952_v14 = vmax.f32 %v1724_v35, %v1951_v34  ;;  %v1773_v30 = vld [vmem:[%s2508_s27 + $0x2b8] sm:$0xff]  ;;  %v1734_v55 = vld [vmem:[%s2508_s27 + $0x180] sm:$0xff]  ;;  %v2143_v37 = vsel %vm5825_vm0, %v1771_v17, -inf }
 0x1a6   : > { %v2123_v40 = vsel %vm5846_vm11, %v1751_v53, -inf  ;;  %v2120_v63 = vmax.f32 %v2116_v61, %v2119_v11  ;;  %vm5847_vm14 = vmmov %vm5825_vm0  ;;  %v1775_v24 = vld [vmem:[%s2508_s27 + $0x2c8] sm:$0xff]  ;;  %v1777_v0 = vld [vmem:[%s2508_s27 + $0x2d8] sm:$0xff] }
 0x1a7   : > { %v2125_v21 = vsel %vm5847_vm14, %v1753_v62, -inf  ;;  %v2122_v1 = vmax.f32 %v2118_v43, %v2121_v6  ;;  %vm5848_vm15 = vmmov %vm5825_vm0  ;;  %v1953_v39 = vmax.f32 %v1726_v23, %v1952_v14  ;;  %v1736_v45 = vld [vmem:[%s2508_s27 + $0x190] sm:$0xff]  ;;  %v1779_v20 = vld [vmem:[%s2508_s27 + $0x2e8] sm:$0xff] }
 0x1a8   : > { %v2127_v22 = vsel %vm5848_vm15, %v1755_v47, -inf  ;;  %v2124_v44 = vmax.f32 %v2120_v63, %v2123_v40  ;;  %vm5849_vm1 = vmmov %vm5825_vm0  ;;  %v1781_v18 = vld [vmem:[%s2508_s27 + $0x2f8] sm:$0xff]  ;;  %v1738_v8 = vld [vmem:[%s2508_s27 + $0x1a0] sm:$0xff] }
 0x1a9   : > { %v2129_v48 = vsel %vm5849_vm1, %v1757_v41, -inf  ;;  %v2126_v38 = vmax.f32 %v2122_v1, %v2125_v21  ;;  %vm5850_vm8 = vmmov %vm5825_vm0  ;;  %v1954_v56 = vmax.f32 %v1728_v54, %v1953_v39  ;;  %v1783_v53 = vld [vmem:[%s2508_s27 + $0x308] sm:$0xff]  ;;  %v1785_v62 = vld [vmem:[%s2508_s27 + $0x318] sm:$0xff] }
 0x1aa   : > { %v2131_v2 = vsel %vm5850_vm8, %v1759_v58, -inf  ;;  %v2128_v16 = vmax.f32 %v2124_v44, %v2127_v22  ;;  %vm5851_vm4 = vmmov %vm5825_vm0  ;;  %v1740_v35 = vld [vmem:[%s2508_s27 + $0x1b0] sm:$0xff]  ;;  %v1787_v47 = vld [vmem:[%s2508_s27 + $0x328] sm:$0xff] }
 0x1ab   : > { %v2133_v59 = vsel %vm5851_vm4, %v1761_v31, -inf  ;;  %v2130_v9 = vmax.f32 %v2126_v38, %v2129_v48  ;;  %vm5852_vm3 = vmmov %vm5825_vm0  ;;  %v1955_v4 = vmax.f32 %v1730_v26, %v1954_v56  ;;  %v1789_v41 = vld [vmem:[%s2508_s27 + $0x338] sm:$0xff]  ;;  %v1742_v23 = vld [vmem:[%s2508_s27 + $0x1c0] sm:$0xff] }
 0x1ac   : > { %v2135_v15 = vsel %vm5852_vm3, %v1763_v12, -inf  ;;  %v2132_v3 = vmax.f32 %v2128_v16, %v2131_v2  ;;  %vm5853_vm12 = vmmov %vm5825_vm0  ;;  %v1791_v58 = vld [vmem:[%s2508_s27 + $0x348] sm:$0xff]  ;;  %v1793_v31 = vld [vmem:[%s2508_s27 + $0x358] sm:$0xff] }
 0x1ad   : > { %v2137_v33 = vsel %vm5853_vm12, %v1765_v32, -inf  ;;  %v2134_v27 = vmax.f32 %v2130_v9, %v2133_v59  ;;  %vm5854_vm5 = vmmov %vm5825_vm0  ;;  %v1956_v51 = vmax.f32 %v1732_v7, %v1955_v4  ;;  %v1744_v54 = vld [vmem:[%s2508_s27 + $0x1d0] sm:$0xff]  ;;  %v1795_v12 = vld [vmem:[%s2508_s27 + $0x368] sm:$0xff] }
 0x1ae   : > { %v2139_v36 = vsel %vm5854_vm5, %v1767_v49, -inf  ;;  %v2136_v19 = vmax.f32 %v2132_v3, %v2135_v15  ;;  %vm5855_vm13 = vmmov %vm5825_vm0  ;;  %v1797_v32 = vld [vmem:[%s2508_s27 + $0x378] sm:$0xff]  ;;  %v1746_v26 = vld [vmem:[%s2508_s27 + $0x1e0] sm:$0xff] }
 0x1af   : > { %v2141_v46 = vsel %vm5855_vm13, %v1769_v28, -inf  ;;  %v2138_v29 = vmax.f32 %v2134_v27, %v2137_v33  ;;  %vm5856_vm6 = vmmov %vm5825_vm0  ;;  %v1957_v57 = vmax.f32 %v1734_v55, %v1956_v51  ;;  %v1799_v49 = vld [vmem:[%s2508_s27 + $0x388] sm:$0xff]  ;;  %v1801_v28 = vld [vmem:[%s2508_s27 + $0x398] sm:$0xff] }
 0x1b0   : > { %v2140_v5 = vmax.f32 %v2136_v19, %v2139_v36  ;;  %v2145_v42 = vsel %vm5856_vm6, %v1773_v30, -inf  ;;  %vm5857_vm7 = vmmov %vm5825_vm0  ;;  %v1748_v7 = vld [vmem:[%s2508_s27 + $0x1f0] sm:$0xff]  ;;  %v1803_v17 = vld [vmem:[%s2508_s27 + $0x3a8] sm:$0xff] }
 0x1b1   : > { %v2142_v10 = vmax.f32 %v2138_v29, %v2141_v46  ;;  %v2147_v52 = vsel %vm5857_vm7, %v1775_v24, -inf  ;;  %vm5858_vm9 = vmmov %vm5825_vm0  ;;  %v1958_v60 = vmax.f32 %v1736_v45, %v1957_v57  ;;  %v1805_v30 = vld [vmem:[%s2508_s27 + $0x3b8] sm:$0xff]  ;;  %v1750_v55 = vld [vmem:[%s2508_s27 + $0x200] sm:$0xff] }
 0x1b2   : > { %v2144_v25 = vmax.f32 %v2140_v5, %v2143_v37  ;;  %v2149_v50 = vsel %vm5858_vm9, %v1777_v0, -inf  ;;  %vm5859_vm2 = vmmov %vm5825_vm0  ;;  %v1807_v24 = vld [vmem:[%s2508_s27 + $0x3c8] sm:$0xff]  ;;  %v1809_v0 = vld [vmem:[%s2508_s27 + $0x3d8] sm:$0xff]  ;;  %v2175_v37 = vsel %vm5825_vm0, %v1803_v17, -inf }
 0x1b3   : > { %v2146_v13 = vmax.f32 %v2142_v10, %v2145_v42  ;;  %v2151_v11 = vsel %vm5859_vm2, %v1779_v20, -inf  ;;  %vm5860_vm10 = vmmov %vm5825_vm0  ;;  %v1959_v34 = vmax.f32 %v1738_v8, %v1958_v60  ;;  %v1752_v45 = vld [vmem:[%s2508_s27 + $0x210] sm:$0xff]  ;;  %v1811_v20 = vld [vmem:[%s2508_s27 + $0x3e8] sm:$0xff] }
 0x1b4   : > { %v2148_v61 = vmax.f32 %v2144_v25, %v2147_v52  ;;  %v2153_v6 = vsel %vm5860_vm10, %v1781_v18, -inf  ;;  %vm5861_vm11 = vmmov %vm5825_vm0  ;;  %v1813_v18 = vld [vmem:[%s2508_s27 + $0x3f8] sm:$0xff]  ;;  %v1754_v8 = vld [vmem:[%s2508_s27 + $0x220] sm:$0xff] }
 0x1b5   : > { %v2150_v43 = vmax.f32 %v2146_v13, %v2149_v50  ;;  %v2155_v40 = vsel %vm5861_vm11, %v1783_v53, -inf  ;;  %vm5862_vm14 = vmmov %vm5825_vm0  ;;  %v1960_v14 = vmax.f32 %v1740_v35, %v1959_v34  ;;  %v1815_v53 = vld [vmem:[%s2508_s27 + $0x408] sm:$0xff]  ;;  %v1756_v35 = vld [vmem:[%s2508_s27 + $0x230] sm:$0xff] }
 0x1b6   : > { %v2152_v63 = vmax.f32 %v2148_v61, %v2151_v11  ;;  %v2157_v21 = vsel %vm5862_vm14, %v1785_v62, -inf  ;;  %vm5863_vm15 = vmmov %vm5825_vm0  ;;  %v1817_v62 = vld [vmem:[%s2508_s27 + $0x418] sm:$0xff]  ;;  %v1835_v17 = vld [vmem:[%s2508_s27 + $0x4a8] sm:$0xff] }
 0x1b7   : > { %v2154_v1 = vmax.f32 %v2150_v43, %v2153_v6  ;;  %v2159_v22 = vsel %vm5863_vm15, %v1787_v47, -inf  ;;  %vm5864_vm1 = vmmov %vm5825_vm0  ;;  %v1961_v39 = vmax.f32 %v1742_v23, %v1960_v14  ;;  %v1819_v47 = vld [vmem:[%s2508_s27 + $0x428] sm:$0xff]  ;;  %v1758_v23 = vld [vmem:[%s2508_s27 + $0x240] sm:$0xff] }
 0x1b8   : > { %v2156_v44 = vmax.f32 %v2152_v63, %v2155_v40  ;;  %v2161_v48 = vsel %vm5864_vm1, %v1789_v41, -inf  ;;  %vm5865_vm8 = vmmov %vm5825_vm0  ;;  %v1821_v41 = vld [vmem:[%s2508_s27 + $0x438] sm:$0xff] }
 0x1b9   : > { %v2158_v38 = vmax.f32 %v2154_v1, %v2157_v21  ;;  %v2163_v2 = vsel %vm5865_vm8, %v1791_v58, -inf  ;;  %vm5866_vm4 = vmmov %vm5825_vm0  ;;  %v1962_v56 = vmax.f32 %v1744_v54, %v1961_v39  ;;  %v1823_v58 = vld [vmem:[%s2508_s27 + $0x448] sm:$0xff]  ;;  %v1760_v54 = vld [vmem:[%s2508_s27 + $0x250] sm:$0xff] }
 0x1ba   : > { %v2160_v16 = vmax.f32 %v2156_v44, %v2159_v22  ;;  %v2165_v59 = vsel %vm5866_vm4, %v1793_v31, -inf  ;;  %vm5867_vm3 = vmmov %vm5825_vm0  ;;  %v1825_v31 = vld [vmem:[%s2508_s27 + $0x458] sm:$0xff] }
 0x1bb   : > { %v2162_v9 = vmax.f32 %v2158_v38, %v2161_v48  ;;  %v2167_v15 = vsel %vm5867_vm3, %v1795_v12, -inf  ;;  %vm5868_vm12 = vmmov %vm5825_vm0  ;;  %v1963_v4 = vmax.f32 %v1746_v26, %v1962_v56  ;;  %v1827_v12 = vld [vmem:[%s2508_s27 + $0x468] sm:$0xff]  ;;  %v1762_v26 = vld [vmem:[%s2508_s27 + $0x260] sm:$0xff] }
 0x1bc   : > { %v2164_v3 = vmax.f32 %v2160_v16, %v2163_v2  ;;  %v2169_v33 = vsel %vm5868_vm12, %v1797_v32, -inf  ;;  %vm5869_vm5 = vmmov %vm5825_vm0  ;;  %v1829_v32 = vld [vmem:[%s2508_s27 + $0x478] sm:$0xff] }
 0x1bd   : > { %v2166_v27 = vmax.f32 %v2162_v9, %v2165_v59  ;;  %v2171_v36 = vsel %vm5869_vm5, %v1799_v49, -inf  ;;  %vm5870_vm13 = vmmov %vm5825_vm0  ;;  %v1964_v51 = vmax.f32 %v1748_v7, %v1963_v4  ;;  %v1831_v49 = vld [vmem:[%s2508_s27 + $0x488] sm:$0xff]  ;;  %v1764_v7 = vld [vmem:[%s2508_s27 + $0x270] sm:$0xff] }
 0x1be   : > { %v2168_v19 = vmax.f32 %v2164_v3, %v2167_v15  ;;  %v2173_v46 = vsel %vm5870_vm13, %v1801_v28, -inf  ;;  %vm5871_vm6 = vmmov %vm5825_vm0  ;;  %v1833_v28 = vld [vmem:[%s2508_s27 + $0x498] sm:$0xff] }
 0x1bf   : > { %v2170_v29 = vmax.f32 %v2166_v27, %v2169_v33  ;;  %v2177_v42 = vsel %vm5871_vm6, %v1805_v30, -inf  ;;  %v1965_v57 = vmax.f32 %v1750_v55, %v1964_v51  ;;  %vm5872_vm7 = vmmov %vm5825_vm0  ;;  %v1837_v30 = vld [vmem:[%s2508_s27 + $0x4b8] sm:$0xff]  ;;  %v1766_v55 = vld [vmem:[%s2508_s27 + $0x280] sm:$0xff] }
 0x1c0   : > { %v2172_v5 = vmax.f32 %v2168_v19, %v2171_v36  ;;  %v2179_v52 = vsel %vm5872_vm7, %v1807_v24, -inf  ;;  %vm5873_vm9 = vmmov %vm5825_vm0  ;;  %v1839_v24 = vld [vmem:[%s2508_s27 + $0x4c8] sm:$0xff] }
 0x1c1   : > { %v2174_v10 = vmax.f32 %v2170_v29, %v2173_v46  ;;  %v2181_v50 = vsel %vm5873_vm9, %v1809_v0, -inf  ;;  %v1966_v60 = vmax.f32 %v1752_v45, %v1965_v57  ;;  %vm5874_vm2 = vmmov %vm5825_vm0  ;;  %v1841_v0 = vld [vmem:[%s2508_s27 + $0x4d8] sm:$0xff]  ;;  %v1768_v45 = vld [vmem:[%s2508_s27 + $0x290] sm:$0xff] }
 0x1c2   : > { %v2176_v25 = vmax.f32 %v2172_v5, %v2175_v37  ;;  %v2183_v11 = vsel %vm5874_vm2, %v1811_v20, -inf  ;;  %vm5875_vm10 = vmmov %vm5825_vm0  ;;  %v2207_v37 = vsel %vm5825_vm0, %v1835_v17, -inf  ;;  %v1843_v20 = vld [vmem:[%s2508_s27 + $0x4e8] sm:$0xff] }
 0x1c3   : > { %v2178_v13 = vmax.f32 %v2174_v10, %v2177_v42  ;;  %v2185_v6 = vsel %vm5875_vm10, %v1813_v18, -inf  ;;  %v1967_v34 = vmax.f32 %v1754_v8, %v1966_v60  ;;  %vm5876_vm11 = vmmov %vm5825_vm0  ;;  %v1845_v18 = vld [vmem:[%s2508_s27 + $0x4f8] sm:$0xff]  ;;  %v1770_v8 = vld [vmem:[%s2508_s27 + $0x2a0] sm:$0xff] }
 0x1c4   : > { %v2180_v61 = vmax.f32 %v2176_v25, %v2179_v52  ;;  %v2187_v40 = vsel %vm5876_vm11, %v1815_v53, -inf  ;;  %vm5877_vm14 = vmmov %vm5825_vm0  ;;  %v1847_v53 = vld [vmem:[%s2508_s27 + $0x508] sm:$0xff] }
 0x1c5   : > { %v2182_v43 = vmax.f32 %v2178_v13, %v2181_v50  ;;  %v2189_v21 = vsel %vm5877_vm14, %v1817_v62, -inf  ;;  %v1968_v14 = vmax.f32 %v1756_v35, %v1967_v34  ;;  %vm5878_vm15 = vmmov %vm5825_vm0  ;;  %v1849_v62 = vld [vmem:[%s2508_s27 + $0x518] sm:$0xff]  ;;  %v1772_v35 = vld [vmem:[%s2508_s27 + $0x2b0] sm:$0xff] }
 0x1c6   : > { %v2184_v63 = vmax.f32 %v2180_v61, %v2183_v11  ;;  %v2191_v22 = vsel %vm5878_vm15, %v1819_v47, -inf  ;;  %vm5879_vm1 = vmmov %vm5825_vm0  ;;  %v1851_v47 = vld [vmem:[%s2508_s27 + $0x528] sm:$0xff] }
 0x1c7   : > { %v2186_v1 = vmax.f32 %v2182_v43, %v2185_v6  ;;  %v2193_v48 = vsel %vm5879_vm1, %v1821_v41, -inf  ;;  %v1969_v39 = vmax.f32 %v1758_v23, %v1968_v14  ;;  %vm5880_vm8 = vmmov %vm5825_vm0  ;;  %v1853_v41 = vld [vmem:[%s2508_s27 + $0x538] sm:$0xff]  ;;  %v1774_v23 = vld [vmem:[%s2508_s27 + $0x2c0] sm:$0xff] }
 0x1c8   : > { %v2188_v44 = vmax.f32 %v2184_v63, %v2187_v40  ;;  %v2195_v2 = vsel %vm5880_vm8, %v1823_v58, -inf  ;;  %vm5881_vm4 = vmmov %vm5825_vm0  ;;  %v1855_v58 = vld [vmem:[%s2508_s27 + $0x548] sm:$0xff] }
 0x1c9   : > { %v2190_v38 = vmax.f32 %v2186_v1, %v2189_v21  ;;  %v2197_v59 = vsel %vm5881_vm4, %v1825_v31, -inf  ;;  %v1970_v56 = vmax.f32 %v1760_v54, %v1969_v39  ;;  %vm5882_vm3 = vmmov %vm5825_vm0  ;;  %v1857_v31 = vld [vmem:[%s2508_s27 + $0x558] sm:$0xff]  ;;  %v1776_v54 = vld [vmem:[%s2508_s27 + $0x2d0] sm:$0xff] }
 0x1ca   : > { %v2192_v16 = vmax.f32 %v2188_v44, %v2191_v22  ;;  %v2199_v15 = vsel %vm5882_vm3, %v1827_v12, -inf  ;;  %vm5883_vm12 = vmmov %vm5825_vm0  ;;  %v1859_v12 = vld [vmem:[%s2508_s27 + $0x568] sm:$0xff] }
 0x1cb   : > { %v2194_v9 = vmax.f32 %v2190_v38, %v2193_v48  ;;  %v2201_v33 = vsel %vm5883_vm12, %v1829_v32, -inf  ;;  %v1971_v4 = vmax.f32 %v1762_v26, %v1970_v56  ;;  %vm5884_vm5 = vmmov %vm5825_vm0  ;;  %v1861_v32 = vld [vmem:[%s2508_s27 + $0x578] sm:$0xff]  ;;  %v1778_v26 = vld [vmem:[%s2508_s27 + $0x2e0] sm:$0xff] }
 0x1cc   : > { %v2196_v3 = vmax.f32 %v2192_v16, %v2195_v2  ;;  %v2203_v36 = vsel %vm5884_vm5, %v1831_v49, -inf  ;;  %vm5885_vm13 = vmmov %vm5825_vm0  ;;  %v1863_v49 = vld [vmem:[%s2508_s27 + $0x588] sm:$0xff] }
 0x1cd   : > { %v2198_v27 = vmax.f32 %v2194_v9, %v2197_v59  ;;  %v2205_v46 = vsel %vm5885_vm13, %v1833_v28, -inf  ;;  %v1972_v51 = vmax.f32 %v1764_v7, %v1971_v4  ;;  %vm5886_vm6 = vmmov %vm5825_vm0  ;;  %v1865_v28 = vld [vmem:[%s2508_s27 + $0x598] sm:$0xff]  ;;  %v1780_v7 = vld [vmem:[%s2508_s27 + $0x2f0] sm:$0xff] }
 0x1ce   : > { %v2200_v19 = vmax.f32 %v2196_v3, %v2199_v15  ;;  %v2209_v42 = vsel %vm5886_vm6, %v1837_v30, -inf  ;;  %vm5887_vm7 = vmmov %vm5825_vm0  ;;  %v1867_v17 = vld [vmem:[%s2508_s27 + $0x5a8] sm:$0xff]  ;;  %v1869_v30 = vld [vmem:[%s2508_s27 + $0x5b8] sm:$0xff] }
 0x1cf   : > { %v2202_v29 = vmax.f32 %v2198_v27, %v2201_v33  ;;  %v1973_v57 = vmax.f32 %v1766_v55, %v1972_v51  ;;  %v2211_v52 = vsel %vm5887_vm7, %v1839_v24, -inf  ;;  %vm5888_vm9 = vmmov %vm5825_vm0  ;;  %v1782_v55 = vld [vmem:[%s2508_s27 + $0x300] sm:$0xff]  ;;  %v1871_v24 = vld [vmem:[%s2508_s27 + $0x5c8] sm:$0xff] }
 0x1d0   : > { %v2204_v5 = vmax.f32 %v2200_v19, %v2203_v36  ;;  %v2213_v50 = vsel %vm5888_vm9, %v1841_v0, -inf  ;;  %vm5889_vm2 = vmmov %vm5825_vm0  ;;  %v1873_v0 = vld [vmem:[%s2508_s27 + $0x5d8] sm:$0xff] }
 0x1d1   : > { %v2206_v10 = vmax.f32 %v2202_v29, %v2205_v46  ;;  %v1974_v60 = vmax.f32 %v1768_v45, %v1973_v57  ;;  %v2215_v11 = vsel %vm5889_vm2, %v1843_v20, -inf  ;;  %vm5890_vm10 = vmmov %vm5825_vm0  ;;  %v1784_v45 = vld [vmem:[%s2508_s27 + $0x310] sm:$0xff]  ;;  %v1875_v20 = vld [vmem:[%s2508_s27 + $0x5e8] sm:$0xff] }
 0x1d2   : > { %v2208_v25 = vmax.f32 %v2204_v5, %v2207_v37  ;;  %v2217_v6 = vsel %vm5890_vm10, %v1845_v18, -inf  ;;  %vm5891_vm11 = vmmov %vm5825_vm0  ;;  %v2239_v37 = vsel %vm5825_vm0, %v1867_v17, -inf  ;;  %v1877_v18 = vld [vmem:[%s2508_s27 + $0x5f8] sm:$0xff]  ;;  %v1899_v17 = vld [vmem:[%s2508_s27 + $0x6a8] sm:$0xff] }
 0x1d3   : > { %v2210_v13 = vmax.f32 %v2206_v10, %v2209_v42  ;;  %v1975_v34 = vmax.f32 %v1770_v8, %v1974_v60  ;;  %v2219_v40 = vsel %vm5891_vm11, %v1847_v53, -inf  ;;  %vm5892_vm14 = vmmov %vm5825_vm0  ;;  %v1786_v8 = vld [vmem:[%s2508_s27 + $0x320] sm:$0xff]  ;;  %v1879_v53 = vld [vmem:[%s2508_s27 + $0x608] sm:$0xff] }
 0x1d4   : > { %v2212_v61 = vmax.f32 %v2208_v25, %v2211_v52  ;;  %v2221_v21 = vsel %vm5892_vm14, %v1849_v62, -inf  ;;  %vm5893_vm15 = vmmov %vm5825_vm0  ;;  %v1881_v62 = vld [vmem:[%s2508_s27 + $0x618] sm:$0xff] }
 0x1d5   : > { %v2214_v43 = vmax.f32 %v2210_v13, %v2213_v50  ;;  %v1976_v14 = vmax.f32 %v1772_v35, %v1975_v34  ;;  %v2223_v22 = vsel %vm5893_vm15, %v1851_v47, -inf  ;;  %vm5894_vm1 = vmmov %vm5825_vm0  ;;  %v1788_v35 = vld [vmem:[%s2508_s27 + $0x330] sm:$0xff]  ;;  %v1883_v47 = vld [vmem:[%s2508_s27 + $0x628] sm:$0xff] }
 0x1d6   : > { %v2216_v63 = vmax.f32 %v2212_v61, %v2215_v11  ;;  %v2225_v48 = vsel %vm5894_vm1, %v1853_v41, -inf  ;;  %vm5895_vm8 = vmmov %vm5825_vm0  ;;  %v1885_v41 = vld [vmem:[%s2508_s27 + $0x638] sm:$0xff] }
 0x1d7   : > { %v2218_v1 = vmax.f32 %v2214_v43, %v2217_v6  ;;  %v1977_v39 = vmax.f32 %v1774_v23, %v1976_v14  ;;  %v2227_v2 = vsel %vm5895_vm8, %v1855_v58, -inf  ;;  %vm5896_vm4 = vmmov %vm5825_vm0  ;;  %v1790_v23 = vld [vmem:[%s2508_s27 + $0x340] sm:$0xff]  ;;  %v1887_v58 = vld [vmem:[%s2508_s27 + $0x648] sm:$0xff] }
 0x1d8   : > { %v2220_v44 = vmax.f32 %v2216_v63, %v2219_v40  ;;  %v2229_v59 = vsel %vm5896_vm4, %v1857_v31, -inf  ;;  %vm5897_vm3 = vmmov %vm5825_vm0  ;;  %v1889_v31 = vld [vmem:[%s2508_s27 + $0x658] sm:$0xff] }
 0x1d9   : > { %v2222_v38 = vmax.f32 %v2218_v1, %v2221_v21  ;;  %v1978_v56 = vmax.f32 %v1776_v54, %v1977_v39  ;;  %v2231_v15 = vsel %vm5897_vm3, %v1859_v12, -inf  ;;  %vm5898_vm12 = vmmov %vm5825_vm0  ;;  %v1792_v54 = vld [vmem:[%s2508_s27 + $0x350] sm:$0xff]  ;;  %v1891_v12 = vld [vmem:[%s2508_s27 + $0x668] sm:$0xff] }
 0x1da   : > { %v2224_v16 = vmax.f32 %v2220_v44, %v2223_v22  ;;  %v2233_v33 = vsel %vm5898_vm12, %v1861_v32, -inf  ;;  %vm5899_vm5 = vmmov %vm5825_vm0  ;;  %v1893_v32 = vld [vmem:[%s2508_s27 + $0x678] sm:$0xff] }
 0x1db   : > { %v2226_v9 = vmax.f32 %v2222_v38, %v2225_v48  ;;  %v1979_v4 = vmax.f32 %v1778_v26, %v1978_v56  ;;  %v2235_v36 = vsel %vm5899_vm5, %v1863_v49, -inf  ;;  %vm5900_vm13 = vmmov %vm5825_vm0  ;;  %v1794_v26 = vld [vmem:[%s2508_s27 + $0x360] sm:$0xff]  ;;  %v1895_v49 = vld [vmem:[%s2508_s27 + $0x688] sm:$0xff] }
 0x1dc   : > { %v2228_v3 = vmax.f32 %v2224_v16, %v2227_v2  ;;  %v2237_v46 = vsel %vm5900_vm13, %v1865_v28, -inf  ;;  %vm5901_vm6 = vmmov %vm5825_vm0  ;;  %v1897_v28 = vld [vmem:[%s2508_s27 + $0x698] sm:$0xff] }
 0x1dd   : > { %v2230_v27 = vmax.f32 %v2226_v9, %v2229_v59  ;;  %v1980_v51 = vmax.f32 %v1780_v7, %v1979_v4  ;;  %v2241_v42 = vsel %vm5901_vm6, %v1869_v30, -inf  ;;  %vm5902_vm7 = vmmov %vm5825_vm0  ;;  %v1796_v7 = vld [vmem:[%s2508_s27 + $0x370] sm:$0xff]  ;;  %v1901_v30 = vld [vmem:[%s2508_s27 + $0x6b8] sm:$0xff] }
 0x1de   : > { %v2232_v19 = vmax.f32 %v2228_v3, %v2231_v15  ;;  %v2243_v52 = vsel %vm5902_vm7, %v1871_v24, -inf  ;;  %vm5903_vm9 = vmmov %vm5825_vm0  ;;  %v1903_v24 = vld [vmem:[%s2508_s27 + $0x6c8] sm:$0xff] }
 0x1df   : > { %v2234_v29 = vmax.f32 %v2230_v27, %v2233_v33  ;;  %v1981_v57 = vmax.f32 %v1782_v55, %v1980_v51  ;;  %v2245_v50 = vsel %vm5903_vm9, %v1873_v0, -inf  ;;  %vm5904_vm2 = vmmov %vm5825_vm0  ;;  %v1798_v55 = vld [vmem:[%s2508_s27 + $0x380] sm:$0xff]  ;;  %v1905_v0 = vld [vmem:[%s2508_s27 + $0x6d8] sm:$0xff] }
 0x1e0   : > { %v2236_v5 = vmax.f32 %v2232_v19, %v2235_v36  ;;  %v2247_v11 = vsel %vm5904_vm2, %v1875_v20, -inf  ;;  %vm5905_vm10 = vmmov %vm5825_vm0  ;;  %v1907_v20 = vld [vmem:[%s2508_s27 + $0x6e8] sm:$0xff] }
 0x1e1   : > { %v2238_v10 = vmax.f32 %v2234_v29, %v2237_v46  ;;  %v1982_v60 = vmax.f32 %v1784_v45, %v1981_v57  ;;  %v2249_v6 = vsel %vm5905_vm10, %v1877_v18, -inf  ;;  %vm5906_vm11 = vmmov %vm5825_vm0  ;;  %v1800_v45 = vld [vmem:[%s2508_s27 + $0x390] sm:$0xff]  ;;  %v1909_v18 = vld [vmem:[%s2508_s27 + $0x6f8] sm:$0xff] }
 0x1e2   : > { %v2240_v25 = vmax.f32 %v2236_v5, %v2239_v37  ;;  %v2251_v40 = vsel %vm5906_vm11, %v1879_v53, -inf  ;;  %vm5907_vm14 = vmmov %vm5825_vm0  ;;  %v2271_v37 = vsel %vm5825_vm0, %v1899_v17, -inf  ;;  %v1911_v53 = vld [vmem:[%s2508_s27 + $0x708] sm:$0xff] }
 0x1e3   : > { %v2242_v13 = vmax.f32 %v2238_v10, %v2241_v42  ;;  %v1983_v34 = vmax.f32 %v1786_v8, %v1982_v60  ;;  %v2253_v21 = vsel %vm5907_vm14, %v1881_v62, -inf  ;;  %vm5908_vm15 = vmmov %vm5825_vm0  ;;  %v1802_v8 = vld [vmem:[%s2508_s27 + $0x3a0] sm:$0xff]  ;;  %v1913_v62 = vld [vmem:[%s2508_s27 + $0x718] sm:$0xff] }
 0x1e4   : > { %v2244_v61 = vmax.f32 %v2240_v25, %v2243_v52  ;;  %v2255_v22 = vsel %vm5908_vm15, %v1883_v47, -inf  ;;  %vm5909_vm1 = vmmov %vm5825_vm0  ;;  %v1915_v47 = vld [vmem:[%s2508_s27 + $0x728] sm:$0xff] }
 0x1e5   : > { %v2246_v43 = vmax.f32 %v2242_v13, %v2245_v50  ;;  %v1984_v14 = vmax.f32 %v1788_v35, %v1983_v34  ;;  %v2257_v48 = vsel %vm5909_vm1, %v1885_v41, -inf  ;;  %vm5910_vm8 = vmmov %vm5825_vm0  ;;  %v1804_v35 = vld [vmem:[%s2508_s27 + $0x3b0] sm:$0xff]  ;;  %v1917_v41 = vld [vmem:[%s2508_s27 + $0x738] sm:$0xff] }
 0x1e6   : > { %v2248_v63 = vmax.f32 %v2244_v61, %v2247_v11  ;;  %v2259_v2 = vsel %vm5910_vm8, %v1887_v58, -inf  ;;  %vm5911_vm4 = vmmov %vm5825_vm0  ;;  %v1919_v58 = vld [vmem:[%s2508_s27 + $0x748] sm:$0xff] }
 0x1e7   : > { %v2250_v1 = vmax.f32 %v2246_v43, %v2249_v6  ;;  %v1985_v39 = vmax.f32 %v1790_v23, %v1984_v14  ;;  %v2261_v59 = vsel %vm5911_vm4, %v1889_v31, -inf  ;;  %vm5912_vm3 = vmmov %vm5825_vm0  ;;  %v1806_v23 = vld [vmem:[%s2508_s27 + $0x3c0] sm:$0xff]  ;;  %v1921_v31 = vld [vmem:[%s2508_s27 + $0x758] sm:$0xff] }
 0x1e8   : > { %v2252_v44 = vmax.f32 %v2248_v63, %v2251_v40  ;;  %v2263_v15 = vsel %vm5912_vm3, %v1891_v12, -inf  ;;  %vm5913_vm12 = vmmov %vm5825_vm0  ;;  %v1923_v12 = vld [vmem:[%s2508_s27 + $0x768] sm:$0xff] }
 0x1e9   : > { %v2254_v38 = vmax.f32 %v2250_v1, %v2253_v21  ;;  %v1986_v56 = vmax.f32 %v1792_v54, %v1985_v39  ;;  %v2265_v33 = vsel %vm5913_vm12, %v1893_v32, -inf  ;;  %vm5914_vm5 = vmmov %vm5825_vm0  ;;  %v1808_v54 = vld [vmem:[%s2508_s27 + $0x3d0] sm:$0xff]  ;;  %v1925_v32 = vld [vmem:[%s2508_s27 + $0x778] sm:$0xff] }
 0x1ea   : > { %v2256_v16 = vmax.f32 %v2252_v44, %v2255_v22  ;;  %v2267_v36 = vsel %vm5914_vm5, %v1895_v49, -inf  ;;  %vm5915_vm13 = vmmov %vm5825_vm0  ;;  %v1927_v49 = vld [vmem:[%s2508_s27 + $0x788] sm:$0xff] }
 0x1eb   : > { %v2258_v9 = vmax.f32 %v2254_v38, %v2257_v48  ;;  %v1987_v4 = vmax.f32 %v1794_v26, %v1986_v56  ;;  %v2269_v46 = vsel %vm5915_vm13, %v1897_v28, -inf  ;;  %vm5916_vm6 = vmmov %vm5825_vm0  ;;  %v1810_v26 = vld [vmem:[%s2508_s27 + $0x3e0] sm:$0xff]  ;;  %v1929_v28 = vld [vmem:[%s2508_s27 + $0x798] sm:$0xff] }
 0x1ec   : > { %v2260_v3 = vmax.f32 %v2256_v16, %v2259_v2  ;;  %v2273_v42 = vsel %vm5916_vm6, %v1901_v30, -inf  ;;  %vm5917_vm7 = vmmov %vm5825_vm0  ;;  %v1931_v17 = vld [vmem:[%s2508_s27 + $0x7a8] sm:$0xff]  ;;  %v1933_v30 = vld [vmem:[%s2508_s27 + $0x7b8] sm:$0xff] }
 0x1ed   : > { %v2262_v27 = vmax.f32 %v2258_v9, %v2261_v59  ;;  %v1988_v51 = vmax.f32 %v1796_v7, %v1987_v4  ;;  %v2275_v52 = vsel %vm5917_vm7, %v1903_v24, -inf  ;;  %vm5918_vm9 = vmmov %vm5825_vm0  ;;  %v1812_v7 = vld [vmem:[%s2508_s27 + $0x3f0] sm:$0xff]  ;;  %v1935_v24 = vld [vmem:[%s2508_s27 + $0x7c8] sm:$0xff] }
 0x1ee   : > { %v2264_v19 = vmax.f32 %v2260_v3, %v2263_v15  ;;  %v2277_v50 = vsel %vm5918_vm9, %v1905_v0, -inf  ;;  %vm5919_vm2 = vmmov %vm5825_vm0 }
 0x1ef   : > { %v2266_v29 = vmax.f32 %v2262_v27, %v2265_v33  ;;  %v1989_v57 = vmax.f32 %v1798_v55, %v1988_v51  ;;  %v2279_v11 = vsel %vm5919_vm2, %v1907_v20, -inf  ;;  %vm5920_vm10 = vmmov %vm5825_vm0  ;;  %v1814_v55 = vld [vmem:[%s2508_s27 + $0x400] sm:$0xff] }
 0x1f0   : > { %v2268_v5 = vmax.f32 %v2264_v19, %v2267_v36  ;;  %v2281_v6 = vsel %vm5920_vm10, %v1909_v18, -inf  ;;  %vm5921_vm11 = vmmov %vm5825_vm0  ;;  %v1818_v18 = vld [vmem:[%s2508_s27 + $0x420] sm:$0xff] }
 0x1f1   : > { %v2270_v10 = vmax.f32 %v2266_v29, %v2269_v46  ;;  %v1990_v60 = vmax.f32 %v1800_v45, %v1989_v57  ;;  %v2283_v40 = vsel %vm5921_vm11, %v1911_v53, -inf  ;;  %vm5922_vm14 = vmmov %vm5825_vm0  ;;  %v2303_v29 = vsel %vm5825_vm0, %v1931_v17, -inf  ;;  %v1820_v53 = vld [vmem:[%s2508_s27 + $0x430] sm:$0xff] }
 0x1f2   : > { %v2272_v25 = vmax.f32 %v2268_v5, %v2271_v37  ;;  %v2285_v21 = vsel %vm5922_vm14, %v1913_v62, -inf  ;;  %vm5923_vm15 = vmmov %vm5825_vm0  ;;  %v1816_v37 = vld [vmem:[%s2508_s27 + $0x410] sm:$0xff]  ;;  %v1822_v62 = vld [vmem:[%s2508_s27 + $0x440] sm:$0xff] }
 0x1f3   : > { %v2274_v13 = vmax.f32 %v2270_v10, %v2273_v42  ;;  %v1991_v34 = vmax.f32 %v1802_v8, %v1990_v60  ;;  %v2287_v22 = vsel %vm5923_vm15, %v1915_v47, -inf  ;;  %vm5924_vm1 = vmmov %vm5825_vm0  ;;  %v2311_v60 = vld [vmem:[#allocation2 + $0x8] sm:$0xff]  ;;  %v1856_v17 = vld [vmem:[%s2508_s27 + $0x550] sm:$0xff] }
 0x1f4   : > { %v2276_v61 = vmax.f32 %v2272_v25, %v2275_v52  ;;  %v2289_v48 = vsel %vm5924_vm1, %v1917_v41, -inf  ;;  %vm5925_vm8 = vmmov %vm5825_vm0  ;;  %v1828_v41 = vld [vmem:[%s2508_s27 + $0x470] sm:$0xff] }
 0x1f5   : > { %v2278_v43 = vmax.f32 %v2274_v13, %v2277_v50  ;;  %v1992_v14 = vmax.f32 %v1804_v35, %v1991_v34  ;;  %v2291_v2 = vsel %vm5925_vm8, %v1919_v58, -inf  ;;  %vm5926_vm4 = vmmov %vm5825_vm0  ;;  %v1824_v35 = vld [vmem:[%s2508_s27 + $0x450] sm:$0xff] }
 0x1f6   : > { %v2280_v63 = vmax.f32 %v2276_v61, %v2279_v11  ;;  %v2293_v59 = vsel %vm5926_vm4, %v1921_v31, -inf  ;;  %vm5927_vm3 = vmmov %vm5825_vm0  ;;  %v1832_v58 = vld [vmem:[%s2508_s27 + $0x490] sm:$0xff] }
 0x1f7   : > { %v2282_v1 = vmax.f32 %v2278_v43, %v2281_v6  ;;  %v1993_v39 = vmax.f32 %v1806_v23, %v1992_v14  ;;  %v2295_v15 = vsel %vm5927_vm3, %v1923_v12, -inf  ;;  %vm5928_vm12 = vmmov %vm5825_vm0  ;;  %v1826_v6 = vld [vmem:[%s2508_s27 + $0x460] sm:$0xff]  ;;  %v1836_v31 = vld [vmem:[%s2508_s27 + $0x4b0] sm:$0xff] }
 0x1f8   : > { %v2284_v44 = vmax.f32 %v2280_v63, %v2283_v40  ;;  %v2297_v33 = vsel %vm5928_vm12, %v1925_v32, -inf  ;;  %vm5929_vm5 = vmmov %vm5825_vm0  ;;  %v1830_v40 = vld [vmem:[%s2508_s27 + $0x480] sm:$0xff]  ;;  %v1840_v12 = vld [vmem:[%s2508_s27 + $0x4d0] sm:$0xff] }
 0x1f9   : > { %v2286_v38 = vmax.f32 %v2282_v1, %v2285_v21  ;;  %v1994_v56 = vmax.f32 %v1808_v54, %v1993_v39  ;;  %v2299_v36 = vsel %vm5929_vm5, %v1927_v49, -inf  ;;  %vm5930_vm13 = vmmov %vm5825_vm0  ;;  %v1834_v21 = vld [vmem:[%s2508_s27 + $0x4a0] sm:$0xff]  ;;  %v1844_v32 = vld [vmem:[%s2508_s27 + $0x4f0] sm:$0xff] }
 0x1fa   : > { %v2288_v16 = vmax.f32 %v2284_v44, %v2287_v22  ;;  %v2301_v46 = vsel %vm5930_vm13, %v1929_v28, -inf  ;;  %vm5931_vm6 = vmmov %vm5825_vm0  ;;  %v1838_v22 = vld [vmem:[%s2508_s27 + $0x4c0] sm:$0xff]  ;;  %v1848_v49 = vld [vmem:[%s2508_s27 + $0x510] sm:$0xff] }
 0x1fb   : > { %v2290_v9 = vmax.f32 %v2286_v38, %v2289_v48  ;;  %v1995_v4 = vmax.f32 %v1810_v26, %v1994_v56  ;;  %v2305_v20 = vsel %vm5931_vm6, %v1933_v30, -inf  ;;  %vm5932_vm7 = vmmov %vm5825_vm0  ;;  %v1842_v48 = vld [vmem:[%s2508_s27 + $0x4e0] sm:$0xff]  ;;  %v1852_v28 = vld [vmem:[%s2508_s27 + $0x530] sm:$0xff] }
 0x1fc   : > { %v2292_v3 = vmax.f32 %v2288_v16, %v2291_v2  ;;  %v2307_v57 = vsel %vm5932_vm7, %v1935_v24, -inf  ;;  %vm5933_vm9 = vmmov %vm5825_vm0  ;;  %v1846_v2 = vld [vmem:[%s2508_s27 + $0x500] sm:$0xff]  ;;  %v1860_v30 = vld [vmem:[%s2508_s27 + $0x570] sm:$0xff] }
 0x1fd   : > { %v2294_v27 = vmax.f32 %v2290_v9, %v2293_v59  ;;  %v1996_v51 = vmax.f32 %v1812_v7, %v1995_v4  ;;  %v1850_v59 = vld [vmem:[%s2508_s27 + $0x520] sm:$0xff]  ;;  %v1864_v24 = vld [vmem:[%s2508_s27 + $0x590] sm:$0xff] }
 0x1fe   : > { %v2296_v19 = vmax.f32 %v2292_v3, %v2295_v15  ;;  %v1854_v15 = vld [vmem:[%s2508_s27 + $0x540] sm:$0xff] }
 0x1ff   : > { %v2298_v0 = vmax.f32 %v2294_v27, %v2297_v33  ;;  %v1997_v5 = vmax.f32 %v1814_v55, %v1996_v51  ;;  %v1858_v33 = vld [vmem:[%s2508_s27 + $0x560] sm:$0xff] }
 0x200   : > { %v2300_v45 = vmax.f32 %v2296_v19, %v2299_v36  ;;  %v1862_v36 = vld [vmem:[%s2508_s27 + $0x580] sm:$0xff] }
 0x201   : > { %v2302_v42 = vmax.f32 %v2298_v0, %v2301_v46  ;;  %v1998_v52 = vmax.f32 %v1816_v37, %v1997_v5  ;;  %v1866_v46 = vld [vmem:[%s2508_s27 + $0x5a0] sm:$0xff]  ;;  %v1868_v0 = vld [vmem:[%s2508_s27 + $0x5b0] sm:$0xff] }
 0x202   : > { %v2304_v10 = vmax.f32 %v2300_v45, %v2303_v29  ;;  %v1870_v37 = vld [vmem:[%s2508_s27 + $0x5c0] sm:$0xff] }
 0x203   : > { %v2306_v8 = vmax.f32 %v2302_v42, %v2305_v20  ;;  %v1999_v50 = vmax.f32 %v1818_v18, %v1998_v52  ;;  %v1872_v20 = vld [vmem:[%s2508_s27 + $0x5d0] sm:$0xff]  ;;  %v1874_v42 = vld [vmem:[%s2508_s27 + $0x5e0] sm:$0xff] }
 0x204   : > { %v2308_v25 = vmax.f32 %v2304_v10, %v2307_v57  ;;  %v1876_v18 = vld [vmem:[%s2508_s27 + $0x5f0] sm:$0xff]  ;;  %v1878_v52 = vld [vmem:[%s2508_s27 + $0x600] sm:$0xff] }
 0x205   : > { %v2000_v11 = vmax.f32 %v1820_v53, %v1999_v50  ;;  %v1880_v53 = vld [vmem:[%s2508_s27 + $0x610] sm:$0xff]  ;;  %v1882_v50 = vld [vmem:[%s2508_s27 + $0x620] sm:$0xff] }
 0x206   : > { %v2309_v13 = vmax.f32 %v2308_v25, %v2306_v8 }
 0x207   : > { %v2001_v61 = vmax.f32 %v1822_v62, %v2000_v11  ;;  %v1884_v62 = vld [vmem:[%s2508_s27 + $0x630] sm:$0xff]  ;;  %v1886_v11 = vld [vmem:[%s2508_s27 + $0x640] sm:$0xff] }
 0x208   : > { %v2313_v47 = vmax.f32 %v2311_v60, %v2309_v13 }
 0x209   : > { %v2002_v34 = vmax.f32 %v1824_v35, %v2001_v61 }
 0x20a   : > { %2315 = vst.msk [vmem:[#allocation2 + $0x8] sm:$0xff] %vm5933_vm9, %v2313_v47  ;;  %v1888_v47 = vld [vmem:[%s2508_s27 + $0x650] sm:$0xff] }
 0x20b   : > { %v2003_v43 = vmax.f32 %v1826_v6, %v2002_v34  ;;  %v1890_v6 = vld [vmem:[%s2508_s27 + $0x660] sm:$0xff] }
 0x20d   : > { %v2004_v23 = vmax.f32 %v1828_v41, %v2003_v43  ;;  %v1892_v41 = vld [vmem:[%s2508_s27 + $0x670] sm:$0xff] }
 0x20f   : > { %v2005_v63 = vmax.f32 %v1830_v40, %v2004_v23  ;;  %v1894_v40 = vld [vmem:[%s2508_s27 + $0x680] sm:$0xff] }
 0x211   : > { %v2006_v14 = vmax.f32 %v1832_v58, %v2005_v63  ;;  %v1896_v58 = vld [vmem:[%s2508_s27 + $0x690] sm:$0xff] }
 0x213   : > { %v2007_v1 = vmax.f32 %v1834_v21, %v2006_v14  ;;  %v1898_v21 = vld [vmem:[%s2508_s27 + $0x6a0] sm:$0xff] }
 0x215   : > { %v2008_v54 = vmax.f32 %v1836_v31, %v2007_v1  ;;  %v1900_v31 = vld [vmem:[%s2508_s27 + $0x6b0] sm:$0xff] }
 0x217   : > { %v2009_v44 = vmax.f32 %v1838_v22, %v2008_v54  ;;  %v1902_v22 = vld [vmem:[%s2508_s27 + $0x6c0] sm:$0xff] }
 0x219   : > { %v2010_v39 = vmax.f32 %v1840_v12, %v2009_v44  ;;  %v1904_v12 = vld [vmem:[%s2508_s27 + $0x6d0] sm:$0xff] }
 0x21b   : > { %v2011_v38 = vmax.f32 %v1842_v48, %v2010_v39  ;;  %v1906_v48 = vld [vmem:[%s2508_s27 + $0x6e0] sm:$0xff] }
 0x21d   : > { %v2012_v26 = vmax.f32 %v1844_v32, %v2011_v38  ;;  %v1908_v32 = vld [vmem:[%s2508_s27 + $0x6f0] sm:$0xff] }
 0x21f   : > { %v2013_v16 = vmax.f32 %v1846_v2, %v2012_v26  ;;  %v1910_v2 = vld [vmem:[%s2508_s27 + $0x700] sm:$0xff] }
 0x221   : > { %v2014_v56 = vmax.f32 %v1848_v49, %v2013_v16  ;;  %v1912_v49 = vld [vmem:[%s2508_s27 + $0x710] sm:$0xff] }
 0x223   : > { %v2015_v9 = vmax.f32 %v1850_v59, %v2014_v56  ;;  %v1914_v59 = vld [vmem:[%s2508_s27 + $0x720] sm:$0xff] }
 0x225   : > { %v2016_v7 = vmax.f32 %v1852_v28, %v2015_v9  ;;  %v1916_v28 = vld [vmem:[%s2508_s27 + $0x730] sm:$0xff] }
 0x227   : > { %v2017_v3 = vmax.f32 %v1854_v15, %v2016_v7  ;;  %v1918_v15 = vld [vmem:[%s2508_s27 + $0x740] sm:$0xff] }
 0x229   : > { %v2018_v4 = vmax.f32 %v1856_v17, %v2017_v3  ;;  %v1920_v17 = vld [vmem:[%s2508_s27 + $0x750] sm:$0xff] }
 0x22b   : > { %v2019_v27 = vmax.f32 %v1858_v33, %v2018_v4  ;;  %v1922_v33 = vld [vmem:[%s2508_s27 + $0x760] sm:$0xff] }
 0x22d   : > { %v2020_v55 = vmax.f32 %v1860_v30, %v2019_v27  ;;  %v1924_v30 = vld [vmem:[%s2508_s27 + $0x770] sm:$0xff] }
 0x22f   : > { %v2021_v19 = vmax.f32 %v1862_v36, %v2020_v55  ;;  %v1926_v36 = vld [vmem:[%s2508_s27 + $0x780] sm:$0xff] }
 0x231   : > { %v2022_v51 = vmax.f32 %v1864_v24, %v2021_v19  ;;  %v1928_v24 = vld [vmem:[%s2508_s27 + $0x790] sm:$0xff] }
 0x233   : > { %v2023_v29 = vmax.f32 %v1866_v46, %v2022_v51  ;;  %v1930_v46 = vld [vmem:[%s2508_s27 + $0x7a0] sm:$0xff] }
 0x235   : > { %v2024_v45 = vmax.f32 %v1868_v0, %v2023_v29  ;;  %v1686_v0 = vld [vmem:[%s2508_s27] sm:$0xff] }
 0x236   : > { %v1690_v29 = vld [vmem:[%s2508_s27 + $0x20] sm:$0xff] }
 0x237   : > { %v2025_v5 = vmax.f32 %v1870_v37, %v2024_v45  ;;  %v1932_v37 = vld [vmem:[%s2508_s27 + $0x7b0] sm:$0xff] }
 0x239   : > { %v2026_v57 = vmax.f32 %v1872_v20, %v2025_v5  ;;  %v1688_v20 = vld [vmem:[%s2508_s27 + $0x10] sm:$0xff] }
 0x23a   : > { %v1692_v5 = vld [vmem:[%s2508_s27 + $0x30] sm:$0xff] }
 0x23b   : > { %v2027_v10 = vmax.f32 %v1874_v42, %v2026_v57  ;;  %v1934_v42 = vld [vmem:[%s2508_s27 + $0x7c0] sm:$0xff] }
 0x23d   : > { %v2028_v8 = vmax.f32 %v1876_v18, %v2027_v10  ;;  %v1936_v18 = vmax.f32 %v1686_v0, %v1690_v29 }
 0x23f   : > { %v2029_v25 = vmax.f32 %v1878_v52, %v2028_v8  ;;  %v1937_v52 = vmax.f32 %v1688_v20, %v1692_v5 }
 0x241   : > { %v2030_v60 = vmax.f32 %v1880_v53, %v2029_v25  ;;  %v2310_v53 = vld [vmem:[#allocation2] sm:$0xff] }
 0x243   : > { %v2031_v13 = vmax.f32 %v1882_v50, %v2030_v60 }
 0x245   : > { %v2032_v35 = vmax.f32 %v1884_v62, %v2031_v13 }
 0x247   : > { %v2033_v61 = vmax.f32 %v1886_v11, %v2032_v35 }
 0x249   : > { %v2034_v34 = vmax.f32 %v1888_v47, %v2033_v61 }
 0x24b   : > { %v2035_v43 = vmax.f32 %v1890_v6, %v2034_v34 }
 0x24d   : > { %v2036_v23 = vmax.f32 %v1892_v41, %v2035_v43 }
 0x24f   : > { %v2037_v63 = vmax.f32 %v1894_v40, %v2036_v23 }
 0x251   : > { %v2038_v14 = vmax.f32 %v1896_v58, %v2037_v63 }
 0x253   : > { %v2039_v1 = vmax.f32 %v1898_v21, %v2038_v14 }
 0x255   : > { %v2040_v54 = vmax.f32 %v1900_v31, %v2039_v1 }
 0x257   : > { %v2041_v44 = vmax.f32 %v1902_v22, %v2040_v54 }
 0x259   : > { %v2042_v39 = vmax.f32 %v1904_v12, %v2041_v44 }
 0x25b   : > { %v2043_v38 = vmax.f32 %v1906_v48, %v2042_v39 }
 0x25d   : > { %v2044_v26 = vmax.f32 %v1908_v32, %v2043_v38 }
 0x25f   : > { %v2045_v16 = vmax.f32 %v1910_v2, %v2044_v26 }
 0x261   : > { %v2046_v56 = vmax.f32 %v1912_v49, %v2045_v16 }
 0x263   : > { %v2047_v9 = vmax.f32 %v1914_v59, %v2046_v56 }
 0x265   : > { %v2048_v7 = vmax.f32 %v1916_v28, %v2047_v9 }
 0x267   : > { %v2049_v3 = vmax.f32 %v1918_v15, %v2048_v7 }
 0x269   : > { %v2050_v4 = vmax.f32 %v1920_v17, %v2049_v3 }
 0x26b   : > { %v2051_v27 = vmax.f32 %v1922_v33, %v2050_v4 }
 0x26d   : > { %v2052_v55 = vmax.f32 %v1924_v30, %v2051_v27 }
 0x26f   : > { %v2053_v19 = vmax.f32 %v1926_v36, %v2052_v55 }
 0x271   : > { %v2054_v51 = vmax.f32 %v1928_v24, %v2053_v19 }
 0x273   : > { %v2055_v45 = vmax.f32 %v1930_v46, %v2054_v51 }
 0x275   : > { %v2056_v57 = vmax.f32 %v1932_v37, %v2055_v45 }
 0x277   : > { %v2057_v10 = vmax.f32 %v1934_v42, %v2056_v57 }
 0x279   : > { %v2058_v8 = vmax.f32 %v1936_v18, %v2057_v10 }
 0x27b   : > { %v2059_v25 = vmax.f32 %v2058_v8, %v1937_v52 }
 0x27d   : > { %v2312_v50 = vmax.f32 %v2310_v53, %v2059_v25 }
 0x27f   : > { %2314 = vst [vmem:[#allocation2] sm:$0xff] %v2312_v50 }
 0x280 PF: > { %v2320_v62 = vld [vmem:[#allocation2 + $0x8] sm:$0xff]  ;;  %vm5934_vm2 = vcmask 588800  }
 0x281   : > { %2323 = vst.msk [vmem:[%s2503_s23 + $0x8] sm:$0xff] %vm5934_vm2, %v2320_v62 }
 0x286   : > { %v2319_v60 = vld [vmem:[#allocation2] sm:$0xff] }
 0x287   : > { %2321 = vst [vmem:[%s2503_s23] sm:$0xff] %v2319_v60 }
 0x288 PF: > { %s13_s13 = sadd.s32 1, %s2449_s13   ;;  %s5935_s11 = smov %s2445_s12 }
 0x289   : > { %p10_p9 = scmp.ge.s32.totalorder %s13_s13, 4   ;;  %s5936_s12 = smov %s5938_s0 }
 0x28b   :  { %12 = sbr.rel (!%p10_p9) target bundleno = 2 (0x2), region = 70 }

</bundles_post_ra>
